<compile_context>
chip_gen: v7x
topology: tpu7x:2x2x1
jax: 0.10.0
libtpu: 0.0.40
codegen_flags: <defaults>
</compile_context>

<pallas_src>
import functools
import math

import jax
import jax.numpy as jnp
from jax.experimental import pallas as pl
from jax.experimental.pallas import tpu as pltpu


# --------------------------- in-kernel helpers (jnp values) ---------------------------

def _dot(a, b):
    # f32 x f32 -> f32 (activation-activation matmuls; already VMEM resident).
    return jnp.dot(a, b, preferred_element_type=jnp.float32)


def _dot_t(a, b):
    # a @ b.T without materializing a transpose (contract last dims).
    return jax.lax.dot_general(a, b, (((1,), (1,)), ((), ())),
                               preferred_element_type=jnp.float32)


def _dot_w(a, w_bf16):
    # f32 activation x bf16 weight -> f32 accumulate.  Cast right before the MXU;
    # the vector path stays f32 (v5e has no bf16 VPU/EUP).
    return jnp.dot(a.astype(jnp.bfloat16), w_bf16,
                   preferred_element_type=jnp.float32)


def _layer_norm(h, gamma, beta):
    # PyTorch LayerNorm: biased variance, eps = 1e-5.
    mu = jnp.mean(h, axis=-1, keepdims=True)
    var = jnp.mean(jnp.square(h - mu), axis=-1, keepdims=True)
    return (h - mu) * jax.lax.rsqrt(var + 1e-5) * gamma + beta


def _softmax_rows(s):
    m = jnp.max(s, axis=-1, keepdims=True)
    p = jnp.exp(s - m)
    return p / jnp.sum(p, axis=-1, keepdims=True)   # exact divide (numerics parity)


def _multihead_self_attention(x, in_w, in_b, out_w, out_b, mask,
                              num_heads, head_dim):
    """x: (N, H) lane-dense f32; in_w/out_w bf16; returns (N, H) f32.
    Matches nn.MultiheadAttention self-attention (inference)."""
    n = x.shape[0]
    h_total = num_heads * head_dim
    scale = 1.0 / math.sqrt(head_dim)

    qkv = _dot_w(x, in_w) + in_b                              # (N, 3H) f32
    q = qkv[:, 0:h_total] * scale                             # scale hoisted onto q
    k = qkv[:, h_total:2 * h_total]
    v = qkv[:, 2 * h_total:3 * h_total]

    # Per-head accumulation directly into a lane-dense (N, H) accumulator:
    # no 16-lane-wide concatenate, every matmul output is a full 128-lane store.
    acc = jnp.zeros((n, h_total), jnp.float32)
    for hh in range(num_heads):
        lo = hh * head_dim
        hi = lo + head_dim
        s = _dot_t(q[:, lo:hi], k[:, lo:hi]) + mask           # (N, N), cross-batch masked
        p = _softmax_rows(s)
        head = _dot(p, v[:, lo:hi])                           # (N, hd) f32
        acc = acc + _dot_w(head, out_w[lo:hi, :])             # (N, H) f32
    return acc + out_b


def _graph_attention(g, w_bf16, a_src, a_dst, bias, num_heads, head_dim):
    """GAT-style multi-head attention over a fully-connected node-feature graph.
    g: (G, H) f32 -> (G, H) f32 (concat of per-head outputs + bias)."""
    # TODO(synk): nn.GraphAttentionLayer does not exist in torch.nn; this is a standard
    # GAT layer (LeakyReLU(0.2) scores, fully-connected adjacency, head concat).
    wh = _dot_w(g, w_bf16)                                    # (G, H) f32
    heads = []
    for hh in range(num_heads):
        lo = hh * head_dim
        hi = lo + head_dim
        wh_h = wh[:, lo:hi]                                   # (G, hd)
        alpha_src = jnp.sum(wh_h * a_src[:, lo:hi], axis=-1, keepdims=True)   # (G, 1)
        alpha_dst = _dot_t(a_dst[:, lo:hi], wh_h)             # (1, G)
        e = alpha_src + alpha_dst                             # (G, G)
        e = jnp.where(e > 0, e, 0.2 * e)                      # LeakyReLU(0.2)
        heads.append(_dot(_softmax_rows(e), wh_h))            # (G, hd)
    return jnp.concatenate(heads, axis=-1) + bias             # runs once, not per layer


# --------------------------------- fused kernel ---------------------------------------

def _cognos_kernel(x_ref, graph_ref,
                   in_w_ref, in_b_ref, out_w_ref, out_b_ref,
                   ln1_g_ref, ln1_b_ref,
                   ff1_w_ref, ff1_b_ref, ff2_w_ref, ff2_b_ref,
                   ln2_g_ref, ln2_b_ref,
                   cf1_w_ref, cf1_b_ref, cf2_w_ref, cf2_b_ref,
                   gat_w_ref, gat_asrc_ref, gat_adst_ref, gat_b_ref,
                   causal_ref, counterfactual_ref, graph_out_ref,
                   h_scratch,
                   *, num_layers, num_heads, head_dim, batch):
    l = pl.program_id(0)
    n = h_scratch.shape[0]

    # Load the activation once into the carried VMEM accumulator.
    @pl.when(l == 0)
    def _():
        h_scratch[...] = x_ref[...]

    # Additive mask blocking attention across different batch elements
    # (row i <-> (seq = i // B, batch = i % B)); generated in-kernel, no DMA operand.
    rows = jax.lax.broadcasted_iota(jnp.int32, (n, n), 0) % batch
    cols = jax.lax.broadcasted_iota(jnp.int32, (n, n), 1) % batch
    mask = jnp.where(rows == cols, 0.0, -1e30).astype(jnp.float32)

    h = h_scratch[...]                                        # (N, H) f32

    # --- one post-norm TransformerEncoder layer (weights for this layer only) ----------
    attn = _multihead_self_attention(
        h, in_w_ref[0], in_b_ref[0], out_w_ref[0], out_b_ref[0],
        mask, num_heads, head_dim)
    h = _layer_norm(h + attn, ln1_g_ref[0], ln1_b_ref[0])
    ff = jnp.maximum(_dot_w(h, ff1_w_ref[0]) + ff1_b_ref[0], 0.0)
    ff = _dot_w(ff, ff2_w_ref[0]) + ff2_b_ref[0]
    h = _layer_norm(h + ff, ln2_g_ref[0], ln2_b_ref[0])
    h_scratch[...] = h

    # --- final grid step: emit causal features, counterfactual MLP and GAT -------------
    @pl.when(l == num_layers - 1)
    def _():
        causal_ref[...] = h

        cf = jnp.maximum(_dot_w(h, cf1_w_ref[...]) + cf1_b_ref[...], 0.0)
        counterfactual_ref[...] = _dot_w(cf, cf2_w_ref[...]) + cf2_b_ref[...]

        graph_out_ref[...] = _graph_attention(
            graph_ref[...], gat_w_ref[...], gat_asrc_ref[...], gat_adst_ref[...],
            gat_b_ref[...], num_heads, head_dim)

    # TODO(synk): explanation_generator (pretrained GPT-2) has no Pallas equivalent.


# ----------------------------------- wrapper -------------------------------------------

def cognos_forward(x, graph, params, *, num_heads, num_layers):
    """x: (S, B, H) [PyTorch batch_first=False], graph: (G, H) node features."""
    s, b, h = x.shape
    n = s * b
    hd = h // num_heads
    g = graph.shape[0]

    # Seq-major flattening: row i <-> (seq i // B, batch i % B); no transpose needed.
    x2d = x.reshape(n, h)

    enc, cf, gat = params["enc"], params["cf"], params["gat"]
    kernel = functools.partial(_cognos_kernel, num_layers=num_layers,
                               num_heads=num_heads, head_dim=hd, batch=b)

    def per_layer(blk):
        return pl.BlockSpec(blk, lambda l: (l, 0, 0))

    def const2d(blk):
        return pl.BlockSpec(blk, lambda l: (0, 0))

    grid_spec = pltpu.PrefetchScalarGridSpec(
        num_scalar_prefetch=0,
        grid=(num_layers,),
        in_specs=[
            const2d((n, h)),            # x2d          (loaded once)
            const2d((g, h)),            # graph        (loaded once)
            per_layer((1, h, 3 * h)),   # in_proj W^T  (bf16, streamed per layer)
            per_layer((1, 1, 3 * h)),   # in_proj b
            per_layer((1, h, h)),       # out_proj W^T (bf16)
            per_layer((1, 1, h)),       # out_proj b
            per_layer((1, 1, h)),       # ln1 gamma
            per_layer((1, 1, h)),       # ln1 beta
            per_layer((1, h, 4 * h)),   # ff1 W^T      (bf16)
            per_layer((1, 1, 4 * h)),   # ff1 b
            per_layer((1, 4 * h, h)),   # ff2 W^T      (bf16)
            per_layer((1, 1, h)),       # ff2 b
            per_layer((1, 1, h)),       # ln2 gamma
            per_layer((1, 1, h)),       # ln2 beta
            const2d((h, 2 * h)),        # cf W1^T      (bf16)
            const2d((1, 2 * h)),        # cf b1
            const2d((2 * h, h)),        # cf W2^T      (bf16)
            const2d((1, h)),            # cf b2
            const2d((h, h)),            # gat W^T      (bf16)
            const2d((1, h)),            # gat a_src
            const2d((1, h)),            # gat a_dst
            const2d((1, h)),            # gat bias
        ],
        out_specs=(const2d((n, h)), const2d((n, h)), const2d((g, h))),
        scratch_shapes=[pltpu.VMEM((n, h), jnp.float32)],     # carried activation
    )

    causal2d, cf2d, graph_out = pl.pallas_call(
        kernel,
        out_shape=(jax.ShapeDtypeStruct((n, h), jnp.float32),
                   jax.ShapeDtypeStruct((n, h), jnp.float32),
                   jax.ShapeDtypeStruct((g, h), jnp.float32)),
        grid_spec=grid_spec,
        compiler_params=pltpu.CompilerParams(
            dimension_semantics=("arbitrary",),                 # carried layer axis
            vmem_limit_bytes=32 * 1024 * 1024),
        cost_estimate=pl.CostEstimate(flops=40_000_000,
                                      transcendentals=16_000,
                                      bytes_accessed=3_000_000),
    )(x2d, graph,
      enc["in_w_t"], enc["in_b"], enc["out_w_t"], enc["out_b"],
      enc["ln1_g"], enc["ln1_b"],
      enc["ff1_w_t"], enc["ff1_b"], enc["ff2_w_t"], enc["ff2_b"],
      enc["ln2_g"], enc["ln2_b"],
      cf["w1_t"], cf["b1"], cf["w2_t"], cf["b2"],
      gat["w_t"], gat["a_src"], gat["a_dst"], gat["b"])

    return {
        "causal_features": causal2d.reshape(s, b, h),
        "counterfactual_features": cf2d.reshape(s, b, h),
        "graph_features": graph_out,
        # TODO(synk): 'explanation_features' (GPT-2 last_hidden_state) omitted.
    }


# -------------------------------- parameter init ---------------------------------------

def init_params(key, hidden, num_heads, num_layers, ff_mult=4):
    ff = hidden * ff_mult
    scale = 0.02

    def nrm(k, shape, dtype=jnp.bfloat16):
        # Weights stored in bf16 in HBM (halves the weight stream); biases/LN stay f32.
        return (scale * jax.random.normal(k, shape, dtype=jnp.float32)).astype(dtype)

    keys = jax.random.split(key, 9)
    L = num_layers
    enc = {
        "in_w_t": nrm(keys[0], (L, hidden, 3 * hidden)),     # W_in^T, stacked over layers
        "in_b": jnp.zeros((L, 1, 3 * hidden), jnp.float32),
        "out_w_t": nrm(keys[1], (L, hidden, hidden)),
        "out_b": jnp.zeros((L, 1, hidden), jnp.float32),
        "ln1_g": jnp.ones((L, 1, hidden), jnp.float32),
        "ln1_b": jnp.zeros((L, 1, hidden), jnp.float32),
        "ff1_w_t": nrm(keys[2], (L, hidden, ff)),
        "ff1_b": jnp.zeros((L, 1, ff), jnp.float32),
        "ff2_w_t": nrm(keys[3], (L, ff, hidden)),
        "ff2_b": jnp.zeros((L, 1, hidden), jnp.float32),
        "ln2_g": jnp.ones((L, 1, hidden), jnp.float32),
        "ln2_b": jnp.zeros((L, 1, hidden), jnp.float32),
    }
    cf = {
        "w1_t": nrm(keys[4], (hidden, 2 * hidden)),
        "b1": jnp.zeros((1, 2 * hidden), jnp.float32),
        "w2_t": nrm(keys[5], (2 * hidden, hidden)),
        "b2": jnp.zeros((1, hidden), jnp.float32),
    }
    gat = {
        "w_t": nrm(keys[6], (hidden, hidden)),
        "a_src": nrm(keys[7], (1, hidden), jnp.float32),
        "a_dst": nrm(keys[8], (1, hidden), jnp.float32),
        "b": jnp.zeros((1, hidden), jnp.float32),
    }
    return {"enc": enc, "cf": cf, "gat": gat}


# ------------------------------------- main ---------------------------------------------

if __name__ == "__main__":
    HIDDEN = 128
    NUM_HEADS = 8
    NUM_LAYERS = 6
    SEQ = 8
    BATCH = 2
    GRAPH_NODES = 16

    root = jax.random.PRNGKey(0)
    k_x, k_g, k_p = jax.random.split(root, 3)
    # x: (seq, batch, hidden) — PyTorch batch_first=False convention.
    x = jax.random.normal(k_x, (SEQ, BATCH, HIDDEN), dtype=jnp.float32)
    graph = jax.random.normal(k_g, (GRAPH_NODES, HIDDEN), dtype=jnp.float32)
    params = init_params(k_p, HIDDEN, NUM_HEADS, NUM_LAYERS)

    fwd = jax.jit(functools.partial(cognos_forward, num_heads=NUM_HEADS,
                                    num_layers=NUM_LAYERS))
    out = fwd(x, graph, params)
    jax.block_until_ready(out)

    assert out["causal_features"].shape == (SEQ, BATCH, HIDDEN)
    assert out["counterfactual_features"].shape == (SEQ, BATCH, HIDDEN)
    assert out["graph_features"].shape == (GRAPH_NODES, HIDDEN)
    assert all(bool(jnp.all(jnp.isfinite(v))) for v in out.values())
    print("KERNEL_OK")
</pallas_src>

<mosaic_0001>
module attributes {stable_mosaic.version = 11 : i64} {
  func.func @_cognos_kernel(%arg0: i32, %arg1: memref<16x128xf32, #tpu.memory_space<vmem>>, %arg2: memref<16x128xf32, #tpu.memory_space<vmem>>, %arg3: memref<1x128x384xbf16, #tpu.memory_space<vmem>>, %arg4: memref<1x1x384xf32, #tpu.memory_space<vmem>>, %arg5: memref<1x128x128xbf16, #tpu.memory_space<vmem>>, %arg6: memref<1x1x128xf32, #tpu.memory_space<vmem>>, %arg7: memref<1x1x128xf32, #tpu.memory_space<vmem>>, %arg8: memref<1x1x128xf32, #tpu.memory_space<vmem>>, %arg9: memref<1x128x512xbf16, #tpu.memory_space<vmem>>, %arg10: memref<1x1x512xf32, #tpu.memory_space<vmem>>, %arg11: memref<1x512x128xbf16, #tpu.memory_space<vmem>>, %arg12: memref<1x1x128xf32, #tpu.memory_space<vmem>>, %arg13: memref<1x1x128xf32, #tpu.memory_space<vmem>>, %arg14: memref<1x1x128xf32, #tpu.memory_space<vmem>>, %arg15: memref<128x256xbf16, #tpu.memory_space<vmem>>, %arg16: memref<1x256xf32, #tpu.memory_space<vmem>>, %arg17: memref<256x128xbf16, #tpu.memory_space<vmem>>, %arg18: memref<1x128xf32, #tpu.memory_space<vmem>>, %arg19: memref<128x128xbf16, #tpu.memory_space<vmem>>, %arg20: memref<1x128xf32, #tpu.memory_space<vmem>>, %arg21: memref<1x128xf32, #tpu.memory_space<vmem>>, %arg22: memref<1x128xf32, #tpu.memory_space<vmem>>, %arg23: memref<16x128xf32, #tpu.memory_space<vmem>>, %arg24: memref<16x128xf32, #tpu.memory_space<vmem>>, %arg25: memref<16x128xf32, #tpu.memory_space<vmem>>, %arg26: memref<16x128xf32, #tpu.memory_space<vmem>>) attributes {dimension_semantics = [#tpu.dimension_semantics<arbitrary>], iteration_bounds = array<i64: 6>, scalar_prefetch = 0 : i64, scratch_operands = 1 : i64, tpu.core_type = #tpu.core_type<tc>, window_params = [{pipeline_mode = #tpu.pipeline_mode<synchronous>, transform_indices = @transform_0, window_bounds = array<i64: 16, 128>}, {pipeline_mode = #tpu.pipeline_mode<synchronous>, transform_indices = @transform_1, window_bounds = array<i64: 16, 128>}, {transform_indices = @transform_2, window_bounds = array<i64: 1, 128, 384>}, {transform_indices = @transform_3, window_bounds = array<i64: 1, 1, 384>}, {transform_indices = @transform_4, window_bounds = array<i64: 1, 128, 128>}, {transform_indices = @transform_5, window_bounds = array<i64: 1, 1, 128>}, {transform_indices = @transform_6, window_bounds = array<i64: 1, 1, 128>}, {transform_indices = @transform_7, window_bounds = array<i64: 1, 1, 128>}, {transform_indices = @transform_8, window_bounds = array<i64: 1, 128, 512>}, {transform_indices = @transform_9, window_bounds = array<i64: 1, 1, 512>}, {transform_indices = @transform_10, window_bounds = array<i64: 1, 512, 128>}, {transform_indices = @transform_11, window_bounds = array<i64: 1, 1, 128>}, {transform_indices = @transform_12, window_bounds = array<i64: 1, 1, 128>}, {transform_indices = @transform_13, window_bounds = array<i64: 1, 1, 128>}, {pipeline_mode = #tpu.pipeline_mode<synchronous>, transform_indices = @transform_14, window_bounds = array<i64: 128, 256>}, {pipeline_mode = #tpu.pipeline_mode<synchronous>, transform_indices = @transform_15, window_bounds = array<i64: 1, 256>}, {pipeline_mode = #tpu.pipeline_mode<synchronous>, transform_indices = @transform_16, window_bounds = array<i64: 256, 128>}, {pipeline_mode = #tpu.pipeline_mode<synchronous>, transform_indices = @transform_17, window_bounds = array<i64: 1, 128>}, {pipeline_mode = #tpu.pipeline_mode<synchronous>, transform_indices = @transform_18, window_bounds = array<i64: 128, 128>}, {pipeline_mode = #tpu.pipeline_mode<synchronous>, transform_indices = @transform_19, window_bounds = array<i64: 1, 128>}, {pipeline_mode = #tpu.pipeline_mode<synchronous>, transform_indices = @transform_20, window_bounds = array<i64: 1, 128>}, {pipeline_mode = #tpu.pipeline_mode<synchronous>, transform_indices = @transform_21, window_bounds = array<i64: 1, 128>}, {pipeline_mode = #tpu.pipeline_mode<synchronous>, transform_indices = @transform_22, window_bounds = array<i64: 16, 128>}, {pipeline_mode = #tpu.pipeline_mode<synchronous>, transform_indices = @transform_23, window_bounds = array<i64: 16, 128>}, {pipeline_mode = #tpu.pipeline_mode<synchronous>, transform_indices = @transform_24, window_bounds = array<i64: 16, 128>}]} {
    %c0_i32 = arith.constant 0 : i32
    %0 = arith.cmpi eq, %arg0, %c0_i32 : i32
    %1 = arith.extui %0 : i1 to i32
    %c0_i32_0 = arith.constant 0 : i32
    %2 = arith.cmpi ne, %1, %c0_i32_0 : i32
    scf.if %2 {
      %c0_108 = arith.constant 0 : index
      %c0_109 = arith.constant 0 : index
      %290 = vector.load %arg1[%c0_108, %c0_109] : memref<16x128xf32, #tpu.memory_space<vmem>>, vector<16x128xf32>
      %c0_110 = arith.constant 0 : index
      %c0_111 = arith.constant 0 : index
      %291 = vector.load %arg26[%c0_110, %c0_111] : memref<16x128xf32, #tpu.memory_space<vmem>>, vector<16x128xf32>
      tpu.vector_store %arg26[%c0_110, %c0_111], %290 {strides = array<i32>} : memref<16x128xf32, #tpu.memory_space<vmem>>, vector<16x128xf32>,
    } else {
    }
    %3 = tpu.iota {dimensions = array<i32: 0>} : vector<16x16xi32>
    %c2_i32 = arith.constant 2 : i32
    %c0_i32_1 = arith.constant 0 : i32
    %4 = arith.cmpi eq, %c2_i32, %c0_i32_1 : i32
    %c1_i32 = arith.constant 1 : i32
    %5 = arith.select %4, %c1_i32, %c2_i32 : i32
    %6 = vector.broadcast %5 : i32 to vector<16x16xi32>
    %7 = arith.remsi %3, %6 : vector<16x16xi32>
    %c0_i32_2 = arith.constant 0 : i32
    %8 = vector.broadcast %c0_i32_2 : i32 to vector<16x16xi32>
    %9 = arith.cmpi ne, %7, %8 : vector<16x16xi32>
    %c0_i32_3 = arith.constant 0 : i32
    %10 = vector.broadcast %c0_i32_3 : i32 to vector<16x16xi32>
    %11 = arith.cmpi slt, %7, %10 : vector<16x16xi32>
    %c0_i32_4 = arith.constant 0 : i32
    %12 = arith.cmpi slt, %5, %c0_i32_4 : i32
    %13 = vector.broadcast %12 : i1 to vector<16x16xi1>
    %14 = vector.broadcast %13 : vector<16x16xi1> to vector<16x16xi1>
    %15 = arith.xori %11, %14 : vector<16x16xi1>
    %16 = arith.andi %15, %9 : vector<16x16xi1>
    %17 = vector.broadcast %5 : i32 to vector<16x16xi32>
    %18 = arith.addi %7, %17 : vector<16x16xi32>
    %19 = arith.select %16, %18, %7 : vector<16x16xi1>, vector<16x16xi32>
    %20 = tpu.iota {dimensions = array<i32: 1>} : vector<16x16xi32>
    %c2_i32_5 = arith.constant 2 : i32
    %c0_i32_6 = arith.constant 0 : i32
    %21 = arith.cmpi eq, %c2_i32_5, %c0_i32_6 : i32
    %c1_i32_7 = arith.constant 1 : i32
    %22 = arith.select %21, %c1_i32_7, %c2_i32_5 : i32
    %23 = vector.broadcast %22 : i32 to vector<16x16xi32>
    %24 = arith.remsi %20, %23 : vector<16x16xi32>
    %c0_i32_8 = arith.constant 0 : i32
    %25 = vector.broadcast %c0_i32_8 : i32 to vector<16x16xi32>
    %26 = arith.cmpi ne, %24, %25 : vector<16x16xi32>
    %c0_i32_9 = arith.constant 0 : i32
    %27 = vector.broadcast %c0_i32_9 : i32 to vector<16x16xi32>
    %28 = arith.cmpi slt, %24, %27 : vector<16x16xi32>
    %c0_i32_10 = arith.constant 0 : i32
    %29 = arith.cmpi slt, %22, %c0_i32_10 : i32
    %30 = vector.broadcast %29 : i1 to vector<16x16xi1>
    %31 = vector.broadcast %30 : vector<16x16xi1> to vector<16x16xi1>
    %32 = arith.xori %28, %31 : vector<16x16xi1>
    %33 = arith.andi %32, %26 : vector<16x16xi1>
    %34 = vector.broadcast %22 : i32 to vector<16x16xi32>
    %35 = arith.addi %24, %34 : vector<16x16xi32>
    %36 = arith.select %33, %35, %24 : vector<16x16xi1>, vector<16x16xi32>
    %37 = arith.cmpi eq, %19, %36 : vector<16x16xi32>
    %cst = arith.constant 0.000000e+00 : f32
    %cst_11 = arith.constant -1.000000e+30 : f32
    %38 = vector.broadcast %cst : f32 to vector<16x16xf32>
    %39 = vector.broadcast %cst_11 : f32 to vector<16x16xf32>
    %40 = arith.select %37, %38, %39 : vector<16x16xi1>, vector<16x16xf32>
    %c0 = arith.constant 0 : index
    %c0_12 = arith.constant 0 : index
    %41 = vector.load %arg26[%c0, %c0_12] : memref<16x128xf32, #tpu.memory_space<vmem>>, vector<16x128xf32>
    %c0_13 = arith.constant 0 : index
    %c0_14 = arith.constant 0 : index
    %c0_15 = arith.constant 0 : index
    %42 = vector.load %arg3[%c0_13, %c0_14, %c0_15] : memref<1x128x384xbf16, #tpu.memory_space<vmem>>, vector<1x128x384xbf16>
    %43 = vector.shape_cast %42 : vector<1x128x384xbf16> to vector<128x384xbf16>
    %c0_16 = arith.constant 0 : index
    %c0_17 = arith.constant 0 : index
    %c0_18 = arith.constant 0 : index
    %44 = vector.load %arg4[%c0_16, %c0_17, %c0_18] : memref<1x1x384xf32, #tpu.memory_space<vmem>>, vector<1x1x384xf32>
    %45 = vector.shape_cast %44 : vector<1x1x384xf32> to vector<1x384xf32>
    %c0_19 = arith.constant 0 : index
    %c0_20 = arith.constant 0 : index
    %c0_21 = arith.constant 0 : index
    %46 = vector.load %arg5[%c0_19, %c0_20, %c0_21] : memref<1x128x128xbf16, #tpu.memory_space<vmem>>, vector<1x128x128xbf16>
    %47 = vector.shape_cast %46 : vector<1x128x128xbf16> to vector<128x128xbf16>
    %c0_22 = arith.constant 0 : index
    %c0_23 = arith.constant 0 : index
    %c0_24 = arith.constant 0 : index
    %48 = vector.load %arg6[%c0_22, %c0_23, %c0_24] : memref<1x1x128xf32, #tpu.memory_space<vmem>>, vector<1x1x128xf32>
    %49 = vector.shape_cast %48 : vector<1x1x128xf32> to vector<1x128xf32>
    %50 = arith.truncf %41 : vector<16x128xf32> to vector<16x128xbf16>
    %cst_25 = arith.constant dense<0.000000e+00> : vector<16x384xf32>
    %51 = tpu.matmul %50, %43, %cst_25 {dimension_numbers = #tpu.dot_dimension_numbers<[1], [0], [0], [1], [0, 0, 1, 1], [], []>} : vector<16x128xbf16>, vector<128x384xbf16>, vector<16x384xf32> -> vector<16x384xf32>
    %52 = vector.broadcast %45 : vector<1x384xf32> to vector<16x384xf32>
    %53 = arith.addf %51, %52 : vector<16x384xf32>
    %54 = vector.extract_strided_slice %53 {offsets = [0, 0], sizes = [16, 128], strides = [1, 1]} : vector<16x384xf32> to vector<16x128xf32>
    %cst_26 = arith.constant 2.500000e-01 : f32
    %55 = vector.broadcast %cst_26 : f32 to vector<16x128xf32>
    %56 = arith.mulf %54, %55 : vector<16x128xf32>
    %57 = vector.extract_strided_slice %53 {offsets = [0, 128], sizes = [16, 128], strides = [1, 1]} : vector<16x384xf32> to vector<16x128xf32>
    %58 = vector.extract_strided_slice %53 {offsets = [0, 256], sizes = [16, 128], strides = [1, 1]} : vector<16x384xf32> to vector<16x128xf32>
    %cst_27 = arith.constant 0.000000e+00 : f32
    %59 = vector.broadcast %cst_27 : f32 to vector<16x128xf32>
    %60 = vector.extract_strided_slice %56 {offsets = [0, 0], sizes = [16, 16], strides = [1, 1]} : vector<16x128xf32> to vector<16x16xf32>
    %61 = vector.extract_strided_slice %57 {offsets = [0, 0], sizes = [16, 16], strides = [1, 1]} : vector<16x128xf32> to vector<16x16xf32>
    %cst_28 = arith.constant dense<0.000000e+00> : vector<16x16xf32>
    %62 = tpu.matmul %60, %61, %cst_28 {dimension_numbers = #tpu.dot_dimension_numbers<[1], [1], [0], [0], [0, 0, 1, 0], [], []>} : vector<16x16xf32>, vector<16x16xf32>, vector<16x16xf32> -> vector<16x16xf32>
    %63 = arith.addf %62, %40 : vector<16x16xf32>
    %cst_29 = arith.constant dense<0xFF800000> : vector<16xf32>
    %64 = vector.multi_reduction <maximumf>, %63, %cst_29 [1] : vector<16x16xf32> to vector<16xf32>
    %65 = vector.shape_cast %64 : vector<16xf32> to vector<16x1xf32>
    %66 = vector.broadcast %65 : vector<16x1xf32> to vector<16x16xf32>
    %67 = arith.subf %63, %66 : vector<16x16xf32>
    %68 = math.exp %67 : vector<16x16xf32>
    %cst_30 = arith.constant dense<0.000000e+00> : vector<16xf32>
    %69 = vector.multi_reduction <add>, %68, %cst_30 [1] : vector<16x16xf32> to vector<16xf32>
    %70 = vector.shape_cast %69 : vector<16xf32> to vector<16x1xf32>
    %71 = vector.broadcast %70 : vector<16x1xf32> to vector<16x16xf32>
    %72 = arith.divf %68, %71 : vector<16x16xf32>
    %73 = vector.extract_strided_slice %58 {offsets = [0, 0], sizes = [16, 16], strides = [1, 1]} : vector<16x128xf32> to vector<16x16xf32>
    %cst_31 = arith.constant dense<0.000000e+00> : vector<16x16xf32>
    %74 = tpu.matmul %72, %73, %cst_31 {dimension_numbers = #tpu.dot_dimension_numbers<[1], [0], [0], [1], [0, 0, 1, 1], [], []>} : vector<16x16xf32>, vector<16x16xf32>, vector<16x16xf32> -> vector<16x16xf32>
    %75 = vector.extract_strided_slice %47 {offsets = [0, 0], sizes = [16, 128], strides = [1, 1]} : vector<128x128xbf16> to vector<16x128xbf16>
    %76 = arith.truncf %74 : vector<16x16xf32> to vector<16x16xbf16>
    %cst_32 = arith.constant dense<0.000000e+00> : vector<16x128xf32>
    %77 = tpu.matmul %76, %75, %cst_32 {dimension_numbers = #tpu.dot_dimension_numbers<[1], [0], [0], [1], [0, 0, 1, 1], [], []>} : vector<16x16xbf16>, vector<16x128xbf16>, vector<16x128xf32> -> vector<16x128xf32>
    %78 = arith.addf %59, %77 : vector<16x128xf32>
    %79 = vector.extract_strided_slice %56 {offsets = [0, 16], sizes = [16, 16], strides = [1, 1]} : vector<16x128xf32> to vector<16x16xf32>
    %80 = vector.extract_strided_slice %57 {offsets = [0, 16], sizes = [16, 16], strides = [1, 1]} : vector<16x128xf32> to vector<16x16xf32>
    %cst_33 = arith.constant dense<0.000000e+00> : vector<16x16xf32>
    %81 = tpu.matmul %79, %80, %cst_33 {dimension_numbers = #tpu.dot_dimension_numbers<[1], [1], [0], [0], [0, 0, 1, 0], [], []>} : vector<16x16xf32>, vector<16x16xf32>, vector<16x16xf32> -> vector<16x16xf32>
    %82 = arith.addf %81, %40 : vector<16x16xf32>
    %cst_34 = arith.constant dense<0xFF800000> : vector<16xf32>
    %83 = vector.multi_reduction <maximumf>, %82, %cst_34 [1] : vector<16x16xf32> to vector<16xf32>
    %84 = vector.shape_cast %83 : vector<16xf32> to vector<16x1xf32>
    %85 = vector.broadcast %84 : vector<16x1xf32> to vector<16x16xf32>
    %86 = arith.subf %82, %85 : vector<16x16xf32>
    %87 = math.exp %86 : vector<16x16xf32>
    %cst_35 = arith.constant dense<0.000000e+00> : vector<16xf32>
    %88 = vector.multi_reduction <add>, %87, %cst_35 [1] : vector<16x16xf32> to vector<16xf32>
    %89 = vector.shape_cast %88 : vector<16xf32> to vector<16x1xf32>
    %90 = vector.broadcast %89 : vector<16x1xf32> to vector<16x16xf32>
    %91 = arith.divf %87, %90 : vector<16x16xf32>
    %92 = vector.extract_strided_slice %58 {offsets = [0, 16], sizes = [16, 16], strides = [1, 1]} : vector<16x128xf32> to vector<16x16xf32>
    %cst_36 = arith.constant dense<0.000000e+00> : vector<16x16xf32>
    %93 = tpu.matmul %91, %92, %cst_36 {dimension_numbers = #tpu.dot_dimension_numbers<[1], [0], [0], [1], [0, 0, 1, 1], [], []>} : vector<16x16xf32>, vector<16x16xf32>, vector<16x16xf32> -> vector<16x16xf32>
    %94 = vector.extract_strided_slice %47 {offsets = [16, 0], sizes = [16, 128], strides = [1, 1]} : vector<128x128xbf16> to vector<16x128xbf16>
    %95 = arith.truncf %93 : vector<16x16xf32> to vector<16x16xbf16>
    %cst_37 = arith.constant dense<0.000000e+00> : vector<16x128xf32>
    %96 = tpu.matmul %95, %94, %cst_37 {dimension_numbers = #tpu.dot_dimension_numbers<[1], [0], [0], [1], [0, 0, 1, 1], [], []>} : vector<16x16xbf16>, vector<16x128xbf16>, vector<16x128xf32> -> vector<16x128xf32>
    %97 = arith.addf %78, %96 : vector<16x128xf32>
    %98 = vector.extract_strided_slice %56 {offsets = [0, 32], sizes = [16, 16], strides = [1, 1]} : vector<16x128xf32> to vector<16x16xf32>
    %99 = vector.extract_strided_slice %57 {offsets = [0, 32], sizes = [16, 16], strides = [1, 1]} : vector<16x128xf32> to vector<16x16xf32>
    %cst_38 = arith.constant dense<0.000000e+00> : vector<16x16xf32>
    %100 = tpu.matmul %98, %99, %cst_38 {dimension_numbers = #tpu.dot_dimension_numbers<[1], [1], [0], [0], [0, 0, 1, 0], [], []>} : vector<16x16xf32>, vector<16x16xf32>, vector<16x16xf32> -> vector<16x16xf32>
    %101 = arith.addf %100, %40 : vector<16x16xf32>
    %cst_39 = arith.constant dense<0xFF800000> : vector<16xf32>
    %102 = vector.multi_reduction <maximumf>, %101, %cst_39 [1] : vector<16x16xf32> to vector<16xf32>
    %103 = vector.shape_cast %102 : vector<16xf32> to vector<16x1xf32>
    %104 = vector.broadcast %103 : vector<16x1xf32> to vector<16x16xf32>
    %105 = arith.subf %101, %104 : vector<16x16xf32>
    %106 = math.exp %105 : vector<16x16xf32>
    %cst_40 = arith.constant dense<0.000000e+00> : vector<16xf32>
    %107 = vector.multi_reduction <add>, %106, %cst_40 [1] : vector<16x16xf32> to vector<16xf32>
    %108 = vector.shape_cast %107 : vector<16xf32> to vector<16x1xf32>
    %109 = vector.broadcast %108 : vector<16x1xf32> to vector<16x16xf32>
    %110 = arith.divf %106, %109 : vector<16x16xf32>
    %111 = vector.extract_strided_slice %58 {offsets = [0, 32], sizes = [16, 16], strides = [1, 1]} : vector<16x128xf32> to vector<16x16xf32>
    %cst_41 = arith.constant dense<0.000000e+00> : vector<16x16xf32>
    %112 = tpu.matmul %110, %111, %cst_41 {dimension_numbers = #tpu.dot_dimension_numbers<[1], [0], [0], [1], [0, 0, 1, 1], [], []>} : vector<16x16xf32>, vector<16x16xf32>, vector<16x16xf32> -> vector<16x16xf32>
    %113 = vector.extract_strided_slice %47 {offsets = [32, 0], sizes = [16, 128], strides = [1, 1]} : vector<128x128xbf16> to vector<16x128xbf16>
    %114 = arith.truncf %112 : vector<16x16xf32> to vector<16x16xbf16>
    %cst_42 = arith.constant dense<0.000000e+00> : vector<16x128xf32>
    %115 = tpu.matmul %114, %113, %cst_42 {dimension_numbers = #tpu.dot_dimension_numbers<[1], [0], [0], [1], [0, 0, 1, 1], [], []>} : vector<16x16xbf16>, vector<16x128xbf16>, vector<16x128xf32> -> vector<16x128xf32>
    %116 = arith.addf %97, %115 : vector<16x128xf32>
    %117 = vector.extract_strided_slice %56 {offsets = [0, 48], sizes = [16, 16], strides = [1, 1]} : vector<16x128xf32> to vector<16x16xf32>
    %118 = vector.extract_strided_slice %57 {offsets = [0, 48], sizes = [16, 16], strides = [1, 1]} : vector<16x128xf32> to vector<16x16xf32>
    %cst_43 = arith.constant dense<0.000000e+00> : vector<16x16xf32>
    %119 = tpu.matmul %117, %118, %cst_43 {dimension_numbers = #tpu.dot_dimension_numbers<[1], [1], [0], [0], [0, 0, 1, 0], [], []>} : vector<16x16xf32>, vector<16x16xf32>, vector<16x16xf32> -> vector<16x16xf32>
    %120 = arith.addf %119, %40 : vector<16x16xf32>
    %cst_44 = arith.constant dense<0xFF800000> : vector<16xf32>
    %121 = vector.multi_reduction <maximumf>, %120, %cst_44 [1] : vector<16x16xf32> to vector<16xf32>
    %122 = vector.shape_cast %121 : vector<16xf32> to vector<16x1xf32>
    %123 = vector.broadcast %122 : vector<16x1xf32> to vector<16x16xf32>
    %124 = arith.subf %120, %123 : vector<16x16xf32>
    %125 = math.exp %124 : vector<16x16xf32>
    %cst_45 = arith.constant dense<0.000000e+00> : vector<16xf32>
    %126 = vector.multi_reduction <add>, %125, %cst_45 [1] : vector<16x16xf32> to vector<16xf32>
    %127 = vector.shape_cast %126 : vector<16xf32> to vector<16x1xf32>
    %128 = vector.broadcast %127 : vector<16x1xf32> to vector<16x16xf32>
    %129 = arith.divf %125, %128 : vector<16x16xf32>
    %130 = vector.extract_strided_slice %58 {offsets = [0, 48], sizes = [16, 16], strides = [1, 1]} : vector<16x128xf32> to vector<16x16xf32>
    %cst_46 = arith.constant dense<0.000000e+00> : vector<16x16xf32>
    %131 = tpu.matmul %129, %130, %cst_46 {dimension_numbers = #tpu.dot_dimension_numbers<[1], [0], [0], [1], [0, 0, 1, 1], [], []>} : vector<16x16xf32>, vector<16x16xf32>, vector<16x16xf32> -> vector<16x16xf32>
    %132 = vector.extract_strided_slice %47 {offsets = [48, 0], sizes = [16, 128], strides = [1, 1]} : vector<128x128xbf16> to vector<16x128xbf16>
    %133 = arith.truncf %131 : vector<16x16xf32> to vector<16x16xbf16>
    %cst_47 = arith.constant dense<0.000000e+00> : vector<16x128xf32>
    %134 = tpu.matmul %133, %132, %cst_47 {dimension_numbers = #tpu.dot_dimension_numbers<[1], [0], [0], [1], [0, 0, 1, 1], [], []>} : vector<16x16xbf16>, vector<16x128xbf16>, vector<16x128xf32> -> vector<16x128xf32>
    %135 = arith.addf %116, %134 : vector<16x128xf32>
    %136 = vector.extract_strided_slice %56 {offsets = [0, 64], sizes = [16, 16], strides = [1, 1]} : vector<16x128xf32> to vector<16x16xf32>
    %137 = vector.extract_strided_slice %57 {offsets = [0, 64], sizes = [16, 16], strides = [1, 1]} : vector<16x128xf32> to vector<16x16xf32>
    %cst_48 = arith.constant dense<0.000000e+00> : vector<16x16xf32>
    %138 = tpu.matmul %136, %137, %cst_48 {dimension_numbers = #tpu.dot_dimension_numbers<[1], [1], [0], [0], [0, 0, 1, 0], [], []>} : vector<16x16xf32>, vector<16x16xf32>, vector<16x16xf32> -> vector<16x16xf32>
    %139 = arith.addf %138, %40 : vector<16x16xf32>
    %cst_49 = arith.constant dense<0xFF800000> : vector<16xf32>
    %140 = vector.multi_reduction <maximumf>, %139, %cst_49 [1] : vector<16x16xf32> to vector<16xf32>
    %141 = vector.shape_cast %140 : vector<16xf32> to vector<16x1xf32>
    %142 = vector.broadcast %141 : vector<16x1xf32> to vector<16x16xf32>
    %143 = arith.subf %139, %142 : vector<16x16xf32>
    %144 = math.exp %143 : vector<16x16xf32>
    %cst_50 = arith.constant dense<0.000000e+00> : vector<16xf32>
    %145 = vector.multi_reduction <add>, %144, %cst_50 [1] : vector<16x16xf32> to vector<16xf32>
    %146 = vector.shape_cast %145 : vector<16xf32> to vector<16x1xf32>
    %147 = vector.broadcast %146 : vector<16x1xf32> to vector<16x16xf32>
    %148 = arith.divf %144, %147 : vector<16x16xf32>
    %149 = vector.extract_strided_slice %58 {offsets = [0, 64], sizes = [16, 16], strides = [1, 1]} : vector<16x128xf32> to vector<16x16xf32>
    %cst_51 = arith.constant dense<0.000000e+00> : vector<16x16xf32>
    %150 = tpu.matmul %148, %149, %cst_51 {dimension_numbers = #tpu.dot_dimension_numbers<[1], [0], [0], [1], [0, 0, 1, 1], [], []>} : vector<16x16xf32>, vector<16x16xf32>, vector<16x16xf32> -> vector<16x16xf32>
    %151 = vector.extract_strided_slice %47 {offsets = [64, 0], sizes = [16, 128], strides = [1, 1]} : vector<128x128xbf16> to vector<16x128xbf16>
    %152 = arith.truncf %150 : vector<16x16xf32> to vector<16x16xbf16>
    %cst_52 = arith.constant dense<0.000000e+00> : vector<16x128xf32>
    %153 = tpu.matmul %152, %151, %cst_52 {dimension_numbers = #tpu.dot_dimension_numbers<[1], [0], [0], [1], [0, 0, 1, 1], [], []>} : vector<16x16xbf16>, vector<16x128xbf16>, vector<16x128xf32> -> vector<16x128xf32>
    %154 = arith.addf %135, %153 : vector<16x128xf32>
    %155 = vector.extract_strided_slice %56 {offsets = [0, 80], sizes = [16, 16], strides = [1, 1]} : vector<16x128xf32> to vector<16x16xf32>
    %156 = vector.extract_strided_slice %57 {offsets = [0, 80], sizes = [16, 16], strides = [1, 1]} : vector<16x128xf32> to vector<16x16xf32>
    %cst_53 = arith.constant dense<0.000000e+00> : vector<16x16xf32>
    %157 = tpu.matmul %155, %156, %cst_53 {dimension_numbers = #tpu.dot_dimension_numbers<[1], [1], [0], [0], [0, 0, 1, 0], [], []>} : vector<16x16xf32>, vector<16x16xf32>, vector<16x16xf32> -> vector<16x16xf32>
    %158 = arith.addf %157, %40 : vector<16x16xf32>
    %cst_54 = arith.constant dense<0xFF800000> : vector<16xf32>
    %159 = vector.multi_reduction <maximumf>, %158, %cst_54 [1] : vector<16x16xf32> to vector<16xf32>
    %160 = vector.shape_cast %159 : vector<16xf32> to vector<16x1xf32>
    %161 = vector.broadcast %160 : vector<16x1xf32> to vector<16x16xf32>
    %162 = arith.subf %158, %161 : vector<16x16xf32>
    %163 = math.exp %162 : vector<16x16xf32>
    %cst_55 = arith.constant dense<0.000000e+00> : vector<16xf32>
    %164 = vector.multi_reduction <add>, %163, %cst_55 [1] : vector<16x16xf32> to vector<16xf32>
    %165 = vector.shape_cast %164 : vector<16xf32> to vector<16x1xf32>
    %166 = vector.broadcast %165 : vector<16x1xf32> to vector<16x16xf32>
    %167 = arith.divf %163, %166 : vector<16x16xf32>
    %168 = vector.extract_strided_slice %58 {offsets = [0, 80], sizes = [16, 16], strides = [1, 1]} : vector<16x128xf32> to vector<16x16xf32>
    %cst_56 = arith.constant dense<0.000000e+00> : vector<16x16xf32>
    %169 = tpu.matmul %167, %168, %cst_56 {dimension_numbers = #tpu.dot_dimension_numbers<[1], [0], [0], [1], [0, 0, 1, 1], [], []>} : vector<16x16xf32>, vector<16x16xf32>, vector<16x16xf32> -> vector<16x16xf32>
    %170 = vector.extract_strided_slice %47 {offsets = [80, 0], sizes = [16, 128], strides = [1, 1]} : vector<128x128xbf16> to vector<16x128xbf16>
    %171 = arith.truncf %169 : vector<16x16xf32> to vector<16x16xbf16>
    %cst_57 = arith.constant dense<0.000000e+00> : vector<16x128xf32>
    %172 = tpu.matmul %171, %170, %cst_57 {dimension_numbers = #tpu.dot_dimension_numbers<[1], [0], [0], [1], [0, 0, 1, 1], [], []>} : vector<16x16xbf16>, vector<16x128xbf16>, vector<16x128xf32> -> vector<16x128xf32>
    %173 = arith.addf %154, %172 : vector<16x128xf32>
    %174 = vector.extract_strided_slice %56 {offsets = [0, 96], sizes = [16, 16], strides = [1, 1]} : vector<16x128xf32> to vector<16x16xf32>
    %175 = vector.extract_strided_slice %57 {offsets = [0, 96], sizes = [16, 16], strides = [1, 1]} : vector<16x128xf32> to vector<16x16xf32>
    %cst_58 = arith.constant dense<0.000000e+00> : vector<16x16xf32>
    %176 = tpu.matmul %174, %175, %cst_58 {dimension_numbers = #tpu.dot_dimension_numbers<[1], [1], [0], [0], [0, 0, 1, 0], [], []>} : vector<16x16xf32>, vector<16x16xf32>, vector<16x16xf32> -> vector<16x16xf32>
    %177 = arith.addf %176, %40 : vector<16x16xf32>
    %cst_59 = arith.constant dense<0xFF800000> : vector<16xf32>
    %178 = vector.multi_reduction <maximumf>, %177, %cst_59 [1] : vector<16x16xf32> to vector<16xf32>
    %179 = vector.shape_cast %178 : vector<16xf32> to vector<16x1xf32>
    %180 = vector.broadcast %179 : vector<16x1xf32> to vector<16x16xf32>
    %181 = arith.subf %177, %180 : vector<16x16xf32>
    %182 = math.exp %181 : vector<16x16xf32>
    %cst_60 = arith.constant dense<0.000000e+00> : vector<16xf32>
    %183 = vector.multi_reduction <add>, %182, %cst_60 [1] : vector<16x16xf32> to vector<16xf32>
    %184 = vector.shape_cast %183 : vector<16xf32> to vector<16x1xf32>
    %185 = vector.broadcast %184 : vector<16x1xf32> to vector<16x16xf32>
    %186 = arith.divf %182, %185 : vector<16x16xf32>
    %187 = vector.extract_strided_slice %58 {offsets = [0, 96], sizes = [16, 16], strides = [1, 1]} : vector<16x128xf32> to vector<16x16xf32>
    %cst_61 = arith.constant dense<0.000000e+00> : vector<16x16xf32>
    %188 = tpu.matmul %186, %187, %cst_61 {dimension_numbers = #tpu.dot_dimension_numbers<[1], [0], [0], [1], [0, 0, 1, 1], [], []>} : vector<16x16xf32>, vector<16x16xf32>, vector<16x16xf32> -> vector<16x16xf32>
    %189 = vector.extract_strided_slice %47 {offsets = [96, 0], sizes = [16, 128], strides = [1, 1]} : vector<128x128xbf16> to vector<16x128xbf16>
    %190 = arith.truncf %188 : vector<16x16xf32> to vector<16x16xbf16>
    %cst_62 = arith.constant dense<0.000000e+00> : vector<16x128xf32>
    %191 = tpu.matmul %190, %189, %cst_62 {dimension_numbers = #tpu.dot_dimension_numbers<[1], [0], [0], [1], [0, 0, 1, 1], [], []>} : vector<16x16xbf16>, vector<16x128xbf16>, vector<16x128xf32> -> vector<16x128xf32>
    %192 = arith.addf %173, %191 : vector<16x128xf32>
    %193 = vector.extract_strided_slice %56 {offsets = [0, 112], sizes = [16, 16], strides = [1, 1]} : vector<16x128xf32> to vector<16x16xf32>
    %194 = vector.extract_strided_slice %57 {offsets = [0, 112], sizes = [16, 16], strides = [1, 1]} : vector<16x128xf32> to vector<16x16xf32>
    %cst_63 = arith.constant dense<0.000000e+00> : vector<16x16xf32>
    %195 = tpu.matmul %193, %194, %cst_63 {dimension_numbers = #tpu.dot_dimension_numbers<[1], [1], [0], [0], [0, 0, 1, 0], [], []>} : vector<16x16xf32>, vector<16x16xf32>, vector<16x16xf32> -> vector<16x16xf32>
    %196 = arith.addf %195, %40 : vector<16x16xf32>
    %cst_64 = arith.constant dense<0xFF800000> : vector<16xf32>
    %197 = vector.multi_reduction <maximumf>, %196, %cst_64 [1] : vector<16x16xf32> to vector<16xf32>
    %198 = vector.shape_cast %197 : vector<16xf32> to vector<16x1xf32>
    %199 = vector.broadcast %198 : vector<16x1xf32> to vector<16x16xf32>
    %200 = arith.subf %196, %199 : vector<16x16xf32>
    %201 = math.exp %200 : vector<16x16xf32>
    %cst_65 = arith.constant dense<0.000000e+00> : vector<16xf32>
    %202 = vector.multi_reduction <add>, %201, %cst_65 [1] : vector<16x16xf32> to vector<16xf32>
    %203 = vector.shape_cast %202 : vector<16xf32> to vector<16x1xf32>
    %204 = vector.broadcast %203 : vector<16x1xf32> to vector<16x16xf32>
    %205 = arith.divf %201, %204 : vector<16x16xf32>
    %206 = vector.extract_strided_slice %58 {offsets = [0, 112], sizes = [16, 16], strides = [1, 1]} : vector<16x128xf32> to vector<16x16xf32>
    %cst_66 = arith.constant dense<0.000000e+00> : vector<16x16xf32>
    %207 = tpu.matmul %205, %206, %cst_66 {dimension_numbers = #tpu.dot_dimension_numbers<[1], [0], [0], [1], [0, 0, 1, 1], [], []>} : vector<16x16xf32>, vector<16x16xf32>, vector<16x16xf32> -> vector<16x16xf32>
    %208 = vector.extract_strided_slice %47 {offsets = [112, 0], sizes = [16, 128], strides = [1, 1]} : vector<128x128xbf16> to vector<16x128xbf16>
    %209 = arith.truncf %207 : vector<16x16xf32> to vector<16x16xbf16>
    %cst_67 = arith.constant dense<0.000000e+00> : vector<16x128xf32>
    %210 = tpu.matmul %209, %208, %cst_67 {dimension_numbers = #tpu.dot_dimension_numbers<[1], [0], [0], [1], [0, 0, 1, 1], [], []>} : vector<16x16xbf16>, vector<16x128xbf16>, vector<16x128xf32> -> vector<16x128xf32>
    %211 = arith.addf %192, %210 : vector<16x128xf32>
    %212 = vector.broadcast %49 : vector<1x128xf32> to vector<16x128xf32>
    %213 = arith.addf %211, %212 : vector<16x128xf32>
    %214 = arith.addf %41, %213 : vector<16x128xf32>
    %c0_68 = arith.constant 0 : index
    %c0_69 = arith.constant 0 : index
    %c0_70 = arith.constant 0 : index
    %215 = vector.load %arg7[%c0_68, %c0_69, %c0_70] : memref<1x1x128xf32, #tpu.memory_space<vmem>>, vector<1x1x128xf32>
    %216 = vector.shape_cast %215 : vector<1x1x128xf32> to vector<1x128xf32>
    %c0_71 = arith.constant 0 : index
    %c0_72 = arith.constant 0 : index
    %c0_73 = arith.constant 0 : index
    %217 = vector.load %arg8[%c0_71, %c0_72, %c0_73] : memref<1x1x128xf32, #tpu.memory_space<vmem>>, vector<1x1x128xf32>
    %218 = vector.shape_cast %217 : vector<1x1x128xf32> to vector<1x128xf32>
    %cst_74 = arith.constant dense<0.000000e+00> : vector<16xf32>
    %219 = vector.multi_reduction <add>, %214, %cst_74 [1] : vector<16x128xf32> to vector<16xf32>
    %220 = vector.shape_cast %219 : vector<16xf32> to vector<16x1xf32>
    %cst_75 = arith.constant 1.280000e+02 : f32
    %221 = vector.broadcast %cst_75 : f32 to vector<16x1xf32>
    %222 = arith.divf %220, %221 : vector<16x1xf32>
    %223 = vector.broadcast %222 : vector<16x1xf32> to vector<16x128xf32>
    %224 = arith.subf %214, %223 : vector<16x128xf32>
    %225 = arith.mulf %224, %224 : vector<16x128xf32>
    %cst_76 = arith.constant dense<0.000000e+00> : vector<16xf32>
    %226 = vector.multi_reduction <add>, %225, %cst_76 [1] : vector<16x128xf32> to vector<16xf32>
    %227 = vector.shape_cast %226 : vector<16xf32> to vector<16x1xf32>
    %cst_77 = arith.constant 1.280000e+02 : f32
    %228 = vector.broadcast %cst_77 : f32 to vector<16x1xf32>
    %229 = arith.divf %227, %228 : vector<16x1xf32>
    %230 = vector.broadcast %222 : vector<16x1xf32> to vector<16x128xf32>
    %231 = arith.subf %214, %230 : vector<16x128xf32>
    %cst_78 = arith.constant 9.99999974E-6 : f32
    %232 = vector.broadcast %cst_78 : f32 to vector<16x1xf32>
    %233 = arith.addf %229, %232 : vector<16x1xf32>
    %234 = math.rsqrt %233 : vector<16x1xf32>
    %235 = vector.broadcast %234 : vector<16x1xf32> to vector<16x128xf32>
    %236 = arith.mulf %231, %235 : vector<16x128xf32>
    %237 = vector.broadcast %216 : vector<1x128xf32> to vector<16x128xf32>
    %238 = arith.mulf %236, %237 : vector<16x128xf32>
    %239 = vector.broadcast %218 : vector<1x128xf32> to vector<16x128xf32>
    %240 = arith.addf %238, %239 : vector<16x128xf32>
    %c0_79 = arith.constant 0 : index
    %c0_80 = arith.constant 0 : index
    %c0_81 = arith.constant 0 : index
    %241 = vector.load %arg9[%c0_79, %c0_80, %c0_81] : memref<1x128x512xbf16, #tpu.memory_space<vmem>>, vector<1x128x512xbf16>
    %242 = vector.shape_cast %241 : vector<1x128x512xbf16> to vector<128x512xbf16>
    %243 = arith.truncf %240 : vector<16x128xf32> to vector<16x128xbf16>
    %cst_82 = arith.constant dense<0.000000e+00> : vector<16x512xf32>
    %244 = tpu.matmul %243, %242, %cst_82 {dimension_numbers = #tpu.dot_dimension_numbers<[1], [0], [0], [1], [0, 0, 1, 1], [], []>} : vector<16x128xbf16>, vector<128x512xbf16>, vector<16x512xf32> -> vector<16x512xf32>
    %c0_83 = arith.constant 0 : index
    %c0_84 = arith.constant 0 : index
    %c0_85 = arith.constant 0 : index
    %245 = vector.load %arg10[%c0_83, %c0_84, %c0_85] : memref<1x1x512xf32, #tpu.memory_space<vmem>>, vector<1x1x512xf32>
    %246 = vector.shape_cast %245 : vector<1x1x512xf32> to vector<1x512xf32>
    %247 = vector.broadcast %246 : vector<1x512xf32> to vector<16x512xf32>
    %248 = arith.addf %244, %247 : vector<16x512xf32>
    %cst_86 = arith.constant 0.000000e+00 : f32
    %249 = vector.broadcast %cst_86 : f32 to vector<16x512xf32>
    %250 = arith.maximumf %248, %249 : vector<16x512xf32>
    %c0_87 = arith.constant 0 : index
    %c0_88 = arith.constant 0 : index
    %c0_89 = arith.constant 0 : index
    %251 = vector.load %arg11[%c0_87, %c0_88, %c0_89] : memref<1x512x128xbf16, #tpu.memory_space<vmem>>, vector<1x512x128xbf16>
    %252 = vector.shape_cast %251 : vector<1x512x128xbf16> to vector<512x128xbf16>
    %253 = arith.truncf %250 : vector<16x512xf32> to vector<16x512xbf16>
    %cst_90 = arith.constant dense<0.000000e+00> : vector<16x128xf32>
    %254 = tpu.matmul %253, %252, %cst_90 {dimension_numbers = #tpu.dot_dimension_numbers<[1], [0], [0], [1], [0, 0, 1, 1], [], []>} : vector<16x512xbf16>, vector<512x128xbf16>, vector<16x128xf32> -> vector<16x128xf32>
    %c0_91 = arith.constant 0 : index
    %c0_92 = arith.constant 0 : index
    %c0_93 = arith.constant 0 : index
    %255 = vector.load %arg12[%c0_91, %c0_92, %c0_93] : memref<1x1x128xf32, #tpu.memory_space<vmem>>, vector<1x1x128xf32>
    %256 = vector.shape_cast %255 : vector<1x1x128xf32> to vector<1x128xf32>
    %257 = vector.broadcast %256 : vector<1x128xf32> to vector<16x128xf32>
    %258 = arith.addf %254, %257 : vector<16x128xf32>
    %259 = arith.addf %240, %258 : vector<16x128xf32>
    %c0_94 = arith.constant 0 : index
    %c0_95 = arith.constant 0 : index
    %c0_96 = arith.constant 0 : index
    %260 = vector.load %arg13[%c0_94, %c0_95, %c0_96] : memref<1x1x128xf32, #tpu.memory_space<vmem>>, vector<1x1x128xf32>
    %261 = vector.shape_cast %260 : vector<1x1x128xf32> to vector<1x128xf32>
    %c0_97 = arith.constant 0 : index
    %c0_98 = arith.constant 0 : index
    %c0_99 = arith.constant 0 : index
    %262 = vector.load %arg14[%c0_97, %c0_98, %c0_99] : memref<1x1x128xf32, #tpu.memory_space<vmem>>, vector<1x1x128xf32>
    %263 = vector.shape_cast %262 : vector<1x1x128xf32> to vector<1x128xf32>
    %cst_100 = arith.constant dense<0.000000e+00> : vector<16xf32>
    %264 = vector.multi_reduction <add>, %259, %cst_100 [1] : vector<16x128xf32> to vector<16xf32>
    %265 = vector.shape_cast %264 : vector<16xf32> to vector<16x1xf32>
    %cst_101 = arith.constant 1.280000e+02 : f32
    %266 = vector.broadcast %cst_101 : f32 to vector<16x1xf32>
    %267 = arith.divf %265, %266 : vector<16x1xf32>
    %268 = vector.broadcast %267 : vector<16x1xf32> to vector<16x128xf32>
    %269 = arith.subf %259, %268 : vector<16x128xf32>
    %270 = arith.mulf %269, %269 : vector<16x128xf32>
    %cst_102 = arith.constant dense<0.000000e+00> : vector<16xf32>
    %271 = vector.multi_reduction <add>, %270, %cst_102 [1] : vector<16x128xf32> to vector<16xf32>
    %272 = vector.shape_cast %271 : vector<16xf32> to vector<16x1xf32>
    %cst_103 = arith.constant 1.280000e+02 : f32
    %273 = vector.broadcast %cst_103 : f32 to vector<16x1xf32>
    %274 = arith.divf %272, %273 : vector<16x1xf32>
    %275 = vector.broadcast %267 : vector<16x1xf32> to vector<16x128xf32>
    %276 = arith.subf %259, %275 : vector<16x128xf32>
    %cst_104 = arith.constant 9.99999974E-6 : f32
    %277 = vector.broadcast %cst_104 : f32 to vector<16x1xf32>
    %278 = arith.addf %274, %277 : vector<16x1xf32>
    %279 = math.rsqrt %278 : vector<16x1xf32>
    %280 = vector.broadcast %279 : vector<16x1xf32> to vector<16x128xf32>
    %281 = arith.mulf %276, %280 : vector<16x128xf32>
    %282 = vector.broadcast %261 : vector<1x128xf32> to vector<16x128xf32>
    %283 = arith.mulf %281, %282 : vector<16x128xf32>
    %284 = vector.broadcast %263 : vector<1x128xf32> to vector<16x128xf32>
    %285 = arith.addf %283, %284 : vector<16x128xf32>
    %c0_105 = arith.constant 0 : index
    %c0_106 = arith.constant 0 : index
    %286 = vector.load %arg26[%c0_105, %c0_106] : memref<16x128xf32, #tpu.memory_space<vmem>>, vector<16x128xf32>
    tpu.vector_store %arg26[%c0_105, %c0_106], %285 {strides = array<i32>} : memref<16x128xf32, #tpu.memory_space<vmem>>, vector<16x128xf32>,
    %c5_i32 = arith.constant 5 : i32
    %287 = arith.cmpi eq, %arg0, %c5_i32 : i32
    %288 = arith.extui %287 : i1 to i32
    %c0_i32_107 = arith.constant 0 : i32
    %289 = arith.cmpi ne, %288, %c0_i32_107 : i32
    scf.if %289 {
      %c0_108 = arith.constant 0 : index
      %c0_109 = arith.constant 0 : index
      %290 = vector.load %arg23[%c0_108, %c0_109] : memref<16x128xf32, #tpu.memory_space<vmem>>, vector<16x128xf32>
      tpu.vector_store %arg23[%c0_108, %c0_109], %285 {strides = array<i32>} : memref<16x128xf32, #tpu.memory_space<vmem>>, vector<16x128xf32>,
      %c0_110 = arith.constant 0 : index
      %c0_111 = arith.constant 0 : index
      %291 = vector.load %arg15[%c0_110, %c0_111] : memref<128x256xbf16, #tpu.memory_space<vmem>>, vector<128x256xbf16>
      %292 = arith.truncf %285 : vector<16x128xf32> to vector<16x128xbf16>
      %cst_112 = arith.constant dense<0.000000e+00> : vector<16x256xf32>
      %293 = tpu.matmul %292, %291, %cst_112 {dimension_numbers = #tpu.dot_dimension_numbers<[1], [0], [0], [1], [0, 0, 1, 1], [], []>} : vector<16x128xbf16>, vector<128x256xbf16>, vector<16x256xf32> -> vector<16x256xf32>
      %c0_113 = arith.constant 0 : index
      %c0_114 = arith.constant 0 : index
      %294 = vector.load %arg16[%c0_113, %c0_114] : memref<1x256xf32, #tpu.memory_space<vmem>>, vector<1x256xf32>
      %295 = vector.broadcast %294 : vector<1x256xf32> to vector<16x256xf32>
      %296 = arith.addf %293, %295 : vector<16x256xf32>
      %cst_115 = arith.constant 0.000000e+00 : f32
      %297 = vector.broadcast %cst_115 : f32 to vector<16x256xf32>
      %298 = arith.maximumf %296, %297 : vector<16x256xf32>
      %c0_116 = arith.constant 0 : index
      %c0_117 = arith.constant 0 : index
      %299 = vector.load %arg17[%c0_116, %c0_117] : memref<256x128xbf16, #tpu.memory_space<vmem>>, vector<256x128xbf16>
      %300 = arith.truncf %298 : vector<16x256xf32> to vector<16x256xbf16>
      %cst_118 = arith.constant dense<0.000000e+00> : vector<16x128xf32>
      %301 = tpu.matmul %300, %299, %cst_118 {dimension_numbers = #tpu.dot_dimension_numbers<[1], [0], [0], [1], [0, 0, 1, 1], [], []>} : vector<16x256xbf16>, vector<256x128xbf16>, vector<16x128xf32> -> vector<16x128xf32>
      %c0_119 = arith.constant 0 : index
      %c0_120 = arith.constant 0 : index
      %302 = vector.load %arg18[%c0_119, %c0_120] : memref<1x128xf32, #tpu.memory_space<vmem>>, vector<1x128xf32>
      %303 = vector.broadcast %302 : vector<1x128xf32> to vector<16x128xf32>
      %304 = arith.addf %301, %303 : vector<16x128xf32>
      %c0_121 = arith.constant 0 : index
      %c0_122 = arith.constant 0 : index
      %305 = vector.load %arg24[%c0_121, %c0_122] : memref<16x128xf32, #tpu.memory_space<vmem>>, vector<16x128xf32>
      tpu.vector_store %arg24[%c0_121, %c0_122], %304 {strides = array<i32>} : memref<16x128xf32, #tpu.memory_space<vmem>>, vector<16x128xf32>,
      %c0_123 = arith.constant 0 : index
      %c0_124 = arith.constant 0 : index
      %306 = vector.load %arg2[%c0_123, %c0_124] : memref<16x128xf32, #tpu.memory_space<vmem>>, vector<16x128xf32>
      %c0_125 = arith.constant 0 : index
      %c0_126 = arith.constant 0 : index
      %307 = vector.load %arg19[%c0_125, %c0_126] : memref<128x128xbf16, #tpu.memory_space<vmem>>, vector<128x128xbf16>
      %c0_127 = arith.constant 0 : index
      %c0_128 = arith.constant 0 : index
      %308 = vector.load %arg20[%c0_127, %c0_128] : memref<1x128xf32, #tpu.memory_space<vmem>>, vector<1x128xf32>
      %c0_129 = arith.constant 0 : index
      %c0_130 = arith.constant 0 : index
      %309 = vector.load %arg21[%c0_129, %c0_130] : memref<1x128xf32, #tpu.memory_space<vmem>>, vector<1x128xf32>
      %c0_131 = arith.constant 0 : index
      %c0_132 = arith.constant 0 : index
      %310 = vector.load %arg22[%c0_131, %c0_132] : memref<1x128xf32, #tpu.memory_space<vmem>>, vector<1x128xf32>
      %311 = arith.truncf %306 : vector<16x128xf32> to vector<16x128xbf16>
      %cst_133 = arith.constant dense<0.000000e+00> : vector<16x128xf32>
      %312 = tpu.matmul %311, %307, %cst_133 {dimension_numbers = #tpu.dot_dimension_numbers<[1], [0], [0], [1], [0, 0, 1, 1], [], []>} : vector<16x128xbf16>, vector<128x128xbf16>, vector<16x128xf32> -> vector<16x128xf32>
      %313 = vector.extract_strided_slice %312 {offsets = [0, 0], sizes = [16, 16], strides = [1, 1]} : vector<16x128xf32> to vector<16x16xf32>
      %314 = vector.extract_strided_slice %308 {offsets = [0, 0], sizes = [1, 16], strides = [1, 1]} : vector<1x128xf32> to vector<1x16xf32>
      %315 = vector.broadcast %314 : vector<1x16xf32> to vector<16x16xf32>
      %316 = arith.mulf %313, %315 : vector<16x16xf32>
      %cst_134 = arith.constant dense<0.000000e+00> : vector<16xf32>
      %317 = vector.multi_reduction <add>, %316, %cst_134 [1] : vector<16x16xf32> to vector<16xf32>
      %318 = vector.shape_cast %317 : vector<16xf32> to vector<16x1xf32>
      %319 = vector.extract_strided_slice %309 {offsets = [0, 0], sizes = [1, 16], strides = [1, 1]} : vector<1x128xf32> to vector<1x16xf32>
      %cst_135 = arith.constant dense<0.000000e+00> : vector<1x16xf32>
      %320 = tpu.matmul %319, %313, %cst_135 {dimension_numbers = #tpu.dot_dimension_numbers<[1], [1], [0], [0], [0, 0, 1, 0], [], []>} : vector<1x16xf32>, vector<16x16xf32>, vector<1x16xf32> -> vector<1x16xf32>
      %321 = vector.broadcast %318 : vector<16x1xf32> to vector<16x16xf32>
      %322 = vector.broadcast %320 : vector<1x16xf32> to vector<16x16xf32>
      %323 = arith.addf %321, %322 : vector<16x16xf32>
      %cst_136 = arith.constant 0.000000e+00 : f32
      %324 = vector.broadcast %cst_136 : f32 to vector<16x16xf32>
      %325 = arith.cmpf ogt, %323, %324 : vector<16x16xf32>
      %cst_137 = arith.constant 2.000000e-01 : f32
      %326 = vector.broadcast %cst_137 : f32 to vector<16x16xf32>
      %327 = arith.mulf %326, %323 : vector<16x16xf32>
      %328 = arith.select %325, %323, %327 : vector<16x16xi1>, vector<16x16xf32>
      %cst_138 = arith.constant dense<0xFF800000> : vector<16xf32>
      %329 = vector.multi_reduction <maximumf>, %328, %cst_138 [1] : vector<16x16xf32> to vector<16xf32>
      %330 = vector.shape_cast %329 : vector<16xf32> to vector<16x1xf32>
      %331 = vector.broadcast %330 : vector<16x1xf32> to vector<16x16xf32>
      %332 = arith.subf %328, %331 : vector<16x16xf32>
      %333 = math.exp %332 : vector<16x16xf32>
      %cst_139 = arith.constant dense<0.000000e+00> : vector<16xf32>
      %334 = vector.multi_reduction <add>, %333, %cst_139 [1] : vector<16x16xf32> to vector<16xf32>
      %335 = vector.shape_cast %334 : vector<16xf32> to vector<16x1xf32>
      %336 = vector.broadcast %335 : vector<16x1xf32> to vector<16x16xf32>
      %337 = arith.divf %333, %336 : vector<16x16xf32>
      %cst_140 = arith.constant dense<0.000000e+00> : vector<16x16xf32>
      %338 = tpu.matmul %337, %313, %cst_140 {dimension_numbers = #tpu.dot_dimension_numbers<[1], [0], [0], [1], [0, 0, 1, 1], [], []>} : vector<16x16xf32>, vector<16x16xf32>, vector<16x16xf32> -> vector<16x16xf32>
      %339 = vector.extract_strided_slice %312 {offsets = [0, 16], sizes = [16, 16], strides = [1, 1]} : vector<16x128xf32> to vector<16x16xf32>
      %340 = vector.extract_strided_slice %308 {offsets = [0, 16], sizes = [1, 16], strides = [1, 1]} : vector<1x128xf32> to vector<1x16xf32>
      %341 = vector.broadcast %340 : vector<1x16xf32> to vector<16x16xf32>
      %342 = arith.mulf %339, %341 : vector<16x16xf32>
      %cst_141 = arith.constant dense<0.000000e+00> : vector<16xf32>
      %343 = vector.multi_reduction <add>, %342, %cst_141 [1] : vector<16x16xf32> to vector<16xf32>
      %344 = vector.shape_cast %343 : vector<16xf32> to vector<16x1xf32>
      %345 = vector.extract_strided_slice %309 {offsets = [0, 16], sizes = [1, 16], strides = [1, 1]} : vector<1x128xf32> to vector<1x16xf32>
      %cst_142 = arith.constant dense<0.000000e+00> : vector<1x16xf32>
      %346 = tpu.matmul %345, %339, %cst_142 {dimension_numbers = #tpu.dot_dimension_numbers<[1], [1], [0], [0], [0, 0, 1, 0], [], []>} : vector<1x16xf32>, vector<16x16xf32>, vector<1x16xf32> -> vector<1x16xf32>
      %347 = vector.broadcast %344 : vector<16x1xf32> to vector<16x16xf32>
      %348 = vector.broadcast %346 : vector<1x16xf32> to vector<16x16xf32>
      %349 = arith.addf %347, %348 : vector<16x16xf32>
      %cst_143 = arith.constant 0.000000e+00 : f32
      %350 = vector.broadcast %cst_143 : f32 to vector<16x16xf32>
      %351 = arith.cmpf ogt, %349, %350 : vector<16x16xf32>
      %cst_144 = arith.constant 2.000000e-01 : f32
      %352 = vector.broadcast %cst_144 : f32 to vector<16x16xf32>
      %353 = arith.mulf %352, %349 : vector<16x16xf32>
      %354 = arith.select %351, %349, %353 : vector<16x16xi1>, vector<16x16xf32>
      %cst_145 = arith.constant dense<0xFF800000> : vector<16xf32>
      %355 = vector.multi_reduction <maximumf>, %354, %cst_145 [1] : vector<16x16xf32> to vector<16xf32>
      %356 = vector.shape_cast %355 : vector<16xf32> to vector<16x1xf32>
      %357 = vector.broadcast %356 : vector<16x1xf32> to vector<16x16xf32>
      %358 = arith.subf %354, %357 : vector<16x16xf32>
      %359 = math.exp %358 : vector<16x16xf32>
      %cst_146 = arith.constant dense<0.000000e+00> : vector<16xf32>
      %360 = vector.multi_reduction <add>, %359, %cst_146 [1] : vector<16x16xf32> to vector<16xf32>
      %361 = vector.shape_cast %360 : vector<16xf32> to vector<16x1xf32>
      %362 = vector.broadcast %361 : vector<16x1xf32> to vector<16x16xf32>
      %363 = arith.divf %359, %362 : vector<16x16xf32>
      %cst_147 = arith.constant dense<0.000000e+00> : vector<16x16xf32>
      %364 = tpu.matmul %363, %339, %cst_147 {dimension_numbers = #tpu.dot_dimension_numbers<[1], [0], [0], [1], [0, 0, 1, 1], [], []>} : vector<16x16xf32>, vector<16x16xf32>, vector<16x16xf32> -> vector<16x16xf32>
      %365 = vector.extract_strided_slice %312 {offsets = [0, 32], sizes = [16, 16], strides = [1, 1]} : vector<16x128xf32> to vector<16x16xf32>
      %366 = vector.extract_strided_slice %308 {offsets = [0, 32], sizes = [1, 16], strides = [1, 1]} : vector<1x128xf32> to vector<1x16xf32>
      %367 = vector.broadcast %366 : vector<1x16xf32> to vector<16x16xf32>
      %368 = arith.mulf %365, %367 : vector<16x16xf32>
      %cst_148 = arith.constant dense<0.000000e+00> : vector<16xf32>
      %369 = vector.multi_reduction <add>, %368, %cst_148 [1] : vector<16x16xf32> to vector<16xf32>
      %370 = vector.shape_cast %369 : vector<16xf32> to vector<16x1xf32>
      %371 = vector.extract_strided_slice %309 {offsets = [0, 32], sizes = [1, 16], strides = [1, 1]} : vector<1x128xf32> to vector<1x16xf32>
      %cst_149 = arith.constant dense<0.000000e+00> : vector<1x16xf32>
      %372 = tpu.matmul %371, %365, %cst_149 {dimension_numbers = #tpu.dot_dimension_numbers<[1], [1], [0], [0], [0, 0, 1, 0], [], []>} : vector<1x16xf32>, vector<16x16xf32>, vector<1x16xf32> -> vector<1x16xf32>
      %373 = vector.broadcast %370 : vector<16x1xf32> to vector<16x16xf32>
      %374 = vector.broadcast %372 : vector<1x16xf32> to vector<16x16xf32>
      %375 = arith.addf %373, %374 : vector<16x16xf32>
      %cst_150 = arith.constant 0.000000e+00 : f32
      %376 = vector.broadcast %cst_150 : f32 to vector<16x16xf32>
      %377 = arith.cmpf ogt, %375, %376 : vector<16x16xf32>
      %cst_151 = arith.constant 2.000000e-01 : f32
      %378 = vector.broadcast %cst_151 : f32 to vector<16x16xf32>
      %379 = arith.mulf %378, %375 : vector<16x16xf32>
      %380 = arith.select %377, %375, %379 : vector<16x16xi1>, vector<16x16xf32>
      %cst_152 = arith.constant dense<0xFF800000> : vector<16xf32>
      %381 = vector.multi_reduction <maximumf>, %380, %cst_152 [1] : vector<16x16xf32> to vector<16xf32>
      %382 = vector.shape_cast %381 : vector<16xf32> to vector<16x1xf32>
      %383 = vector.broadcast %382 : vector<16x1xf32> to vector<16x16xf32>
      %384 = arith.subf %380, %383 : vector<16x16xf32>
      %385 = math.exp %384 : vector<16x16xf32>
      %cst_153 = arith.constant dense<0.000000e+00> : vector<16xf32>
      %386 = vector.multi_reduction <add>, %385, %cst_153 [1] : vector<16x16xf32> to vector<16xf32>
      %387 = vector.shape_cast %386 : vector<16xf32> to vector<16x1xf32>
      %388 = vector.broadcast %387 : vector<16x1xf32> to vector<16x16xf32>
      %389 = arith.divf %385, %388 : vector<16x16xf32>
      %cst_154 = arith.constant dense<0.000000e+00> : vector<16x16xf32>
      %390 = tpu.matmul %389, %365, %cst_154 {dimension_numbers = #tpu.dot_dimension_numbers<[1], [0], [0], [1], [0, 0, 1, 1], [], []>} : vector<16x16xf32>, vector<16x16xf32>, vector<16x16xf32> -> vector<16x16xf32>
      %391 = vector.extract_strided_slice %312 {offsets = [0, 48], sizes = [16, 16], strides = [1, 1]} : vector<16x128xf32> to vector<16x16xf32>
      %392 = vector.extract_strided_slice %308 {offsets = [0, 48], sizes = [1, 16], strides = [1, 1]} : vector<1x128xf32> to vector<1x16xf32>
      %393 = vector.broadcast %392 : vector<1x16xf32> to vector<16x16xf32>
      %394 = arith.mulf %391, %393 : vector<16x16xf32>
      %cst_155 = arith.constant dense<0.000000e+00> : vector<16xf32>
      %395 = vector.multi_reduction <add>, %394, %cst_155 [1] : vector<16x16xf32> to vector<16xf32>
      %396 = vector.shape_cast %395 : vector<16xf32> to vector<16x1xf32>
      %397 = vector.extract_strided_slice %309 {offsets = [0, 48], sizes = [1, 16], strides = [1, 1]} : vector<1x128xf32> to vector<1x16xf32>
      %cst_156 = arith.constant dense<0.000000e+00> : vector<1x16xf32>
      %398 = tpu.matmul %397, %391, %cst_156 {dimension_numbers = #tpu.dot_dimension_numbers<[1], [1], [0], [0], [0, 0, 1, 0], [], []>} : vector<1x16xf32>, vector<16x16xf32>, vector<1x16xf32> -> vector<1x16xf32>
      %399 = vector.broadcast %396 : vector<16x1xf32> to vector<16x16xf32>
      %400 = vector.broadcast %398 : vector<1x16xf32> to vector<16x16xf32>
      %401 = arith.addf %399, %400 : vector<16x16xf32>
      %cst_157 = arith.constant 0.000000e+00 : f32
      %402 = vector.broadcast %cst_157 : f32 to vector<16x16xf32>
      %403 = arith.cmpf ogt, %401, %402 : vector<16x16xf32>
      %cst_158 = arith.constant 2.000000e-01 : f32
      %404 = vector.broadcast %cst_158 : f32 to vector<16x16xf32>
      %405 = arith.mulf %404, %401 : vector<16x16xf32>
      %406 = arith.select %403, %401, %405 : vector<16x16xi1>, vector<16x16xf32>
      %cst_159 = arith.constant dense<0xFF800000> : vector<16xf32>
      %407 = vector.multi_reduction <maximumf>, %406, %cst_159 [1] : vector<16x16xf32> to vector<16xf32>
      %408 = vector.shape_cast %407 : vector<16xf32> to vector<16x1xf32>
      %409 = vector.broadcast %408 : vector<16x1xf32> to vector<16x16xf32>
      %410 = arith.subf %406, %409 : vector<16x16xf32>
      %411 = math.exp %410 : vector<16x16xf32>
      %cst_160 = arith.constant dense<0.000000e+00> : vector<16xf32>
      %412 = vector.multi_reduction <add>, %411, %cst_160 [1] : vector<16x16xf32> to vector<16xf32>
      %413 = vector.shape_cast %412 : vector<16xf32> to vector<16x1xf32>
      %414 = vector.broadcast %413 : vector<16x1xf32> to vector<16x16xf32>
      %415 = arith.divf %411, %414 : vector<16x16xf32>
      %cst_161 = arith.constant dense<0.000000e+00> : vector<16x16xf32>
      %416 = tpu.matmul %415, %391, %cst_161 {dimension_numbers = #tpu.dot_dimension_numbers<[1], [0], [0], [1], [0, 0, 1, 1], [], []>} : vector<16x16xf32>, vector<16x16xf32>, vector<16x16xf32> -> vector<16x16xf32>
      %417 = vector.extract_strided_slice %312 {offsets = [0, 64], sizes = [16, 16], strides = [1, 1]} : vector<16x128xf32> to vector<16x16xf32>
      %418 = vector.extract_strided_slice %308 {offsets = [0, 64], sizes = [1, 16], strides = [1, 1]} : vector<1x128xf32> to vector<1x16xf32>
      %419 = vector.broadcast %418 : vector<1x16xf32> to vector<16x16xf32>
      %420 = arith.mulf %417, %419 : vector<16x16xf32>
      %cst_162 = arith.constant dense<0.000000e+00> : vector<16xf32>
      %421 = vector.multi_reduction <add>, %420, %cst_162 [1] : vector<16x16xf32> to vector<16xf32>
      %422 = vector.shape_cast %421 : vector<16xf32> to vector<16x1xf32>
      %423 = vector.extract_strided_slice %309 {offsets = [0, 64], sizes = [1, 16], strides = [1, 1]} : vector<1x128xf32> to vector<1x16xf32>
      %cst_163 = arith.constant dense<0.000000e+00> : vector<1x16xf32>
      %424 = tpu.matmul %423, %417, %cst_163 {dimension_numbers = #tpu.dot_dimension_numbers<[1], [1], [0], [0], [0, 0, 1, 0], [], []>} : vector<1x16xf32>, vector<16x16xf32>, vector<1x16xf32> -> vector<1x16xf32>
      %425 = vector.broadcast %422 : vector<16x1xf32> to vector<16x16xf32>
      %426 = vector.broadcast %424 : vector<1x16xf32> to vector<16x16xf32>
      %427 = arith.addf %425, %426 : vector<16x16xf32>
      %cst_164 = arith.constant 0.000000e+00 : f32
      %428 = vector.broadcast %cst_164 : f32 to vector<16x16xf32>
      %429 = arith.cmpf ogt, %427, %428 : vector<16x16xf32>
      %cst_165 = arith.constant 2.000000e-01 : f32
      %430 = vector.broadcast %cst_165 : f32 to vector<16x16xf32>
      %431 = arith.mulf %430, %427 : vector<16x16xf32>
      %432 = arith.select %429, %427, %431 : vector<16x16xi1>, vector<16x16xf32>
      %cst_166 = arith.constant dense<0xFF800000> : vector<16xf32>
      %433 = vector.multi_reduction <maximumf>, %432, %cst_166 [1] : vector<16x16xf32> to vector<16xf32>
      %434 = vector.shape_cast %433 : vector<16xf32> to vector<16x1xf32>
      %435 = vector.broadcast %434 : vector<16x1xf32> to vector<16x16xf32>
      %436 = arith.subf %432, %435 : vector<16x16xf32>
      %437 = math.exp %436 : vector<16x16xf32>
      %cst_167 = arith.constant dense<0.000000e+00> : vector<16xf32>
      %438 = vector.multi_reduction <add>, %437, %cst_167 [1] : vector<16x16xf32> to vector<16xf32>
      %439 = vector.shape_cast %438 : vector<16xf32> to vector<16x1xf32>
      %440 = vector.broadcast %439 : vector<16x1xf32> to vector<16x16xf32>
      %441 = arith.divf %437, %440 : vector<16x16xf32>
      %cst_168 = arith.constant dense<0.000000e+00> : vector<16x16xf32>
      %442 = tpu.matmul %441, %417, %cst_168 {dimension_numbers = #tpu.dot_dimension_numbers<[1], [0], [0], [1], [0, 0, 1, 1], [], []>} : vector<16x16xf32>, vector<16x16xf32>, vector<16x16xf32> -> vector<16x16xf32>
      %443 = vector.extract_strided_slice %312 {offsets = [0, 80], sizes = [16, 16], strides = [1, 1]} : vector<16x128xf32> to vector<16x16xf32>
      %444 = vector.extract_strided_slice %308 {offsets = [0, 80], sizes = [1, 16], strides = [1, 1]} : vector<1x128xf32> to vector<1x16xf32>
      %445 = vector.broadcast %444 : vector<1x16xf32> to vector<16x16xf32>
      %446 = arith.mulf %443, %445 : vector<16x16xf32>
      %cst_169 = arith.constant dense<0.000000e+00> : vector<16xf32>
      %447 = vector.multi_reduction <add>, %446, %cst_169 [1] : vector<16x16xf32> to vector<16xf32>
      %448 = vector.shape_cast %447 : vector<16xf32> to vector<16x1xf32>
      %449 = vector.extract_strided_slice %309 {offsets = [0, 80], sizes = [1, 16], strides = [1, 1]} : vector<1x128xf32> to vector<1x16xf32>
      %cst_170 = arith.constant dense<0.000000e+00> : vector<1x16xf32>
      %450 = tpu.matmul %449, %443, %cst_170 {dimension_numbers = #tpu.dot_dimension_numbers<[1], [1], [0], [0], [0, 0, 1, 0], [], []>} : vector<1x16xf32>, vector<16x16xf32>, vector<1x16xf32> -> vector<1x16xf32>
      %451 = vector.broadcast %448 : vector<16x1xf32> to vector<16x16xf32>
      %452 = vector.broadcast %450 : vector<1x16xf32> to vector<16x16xf32>
      %453 = arith.addf %451, %452 : vector<16x16xf32>
      %cst_171 = arith.constant 0.000000e+00 : f32
      %454 = vector.broadcast %cst_171 : f32 to vector<16x16xf32>
      %455 = arith.cmpf ogt, %453, %454 : vector<16x16xf32>
      %cst_172 = arith.constant 2.000000e-01 : f32
      %456 = vector.broadcast %cst_172 : f32 to vector<16x16xf32>
      %457 = arith.mulf %456, %453 : vector<16x16xf32>
      %458 = arith.select %455, %453, %457 : vector<16x16xi1>, vector<16x16xf32>
      %cst_173 = arith.constant dense<0xFF800000> : vector<16xf32>
      %459 = vector.multi_reduction <maximumf>, %458, %cst_173 [1] : vector<16x16xf32> to vector<16xf32>
      %460 = vector.shape_cast %459 : vector<16xf32> to vector<16x1xf32>
      %461 = vector.broadcast %460 : vector<16x1xf32> to vector<16x16xf32>
      %462 = arith.subf %458, %461 : vector<16x16xf32>
      %463 = math.exp %462 : vector<16x16xf32>
      %cst_174 = arith.constant dense<0.000000e+00> : vector<16xf32>
      %464 = vector.multi_reduction <add>, %463, %cst_174 [1] : vector<16x16xf32> to vector<16xf32>
      %465 = vector.shape_cast %464 : vector<16xf32> to vector<16x1xf32>
      %466 = vector.broadcast %465 : vector<16x1xf32> to vector<16x16xf32>
      %467 = arith.divf %463, %466 : vector<16x16xf32>
      %cst_175 = arith.constant dense<0.000000e+00> : vector<16x16xf32>
      %468 = tpu.matmul %467, %443, %cst_175 {dimension_numbers = #tpu.dot_dimension_numbers<[1], [0], [0], [1], [0, 0, 1, 1], [], []>} : vector<16x16xf32>, vector<16x16xf32>, vector<16x16xf32> -> vector<16x16xf32>
      %469 = vector.extract_strided_slice %312 {offsets = [0, 96], sizes = [16, 16], strides = [1, 1]} : vector<16x128xf32> to vector<16x16xf32>
      %470 = vector.extract_strided_slice %308 {offsets = [0, 96], sizes = [1, 16], strides = [1, 1]} : vector<1x128xf32> to vector<1x16xf32>
      %471 = vector.broadcast %470 : vector<1x16xf32> to vector<16x16xf32>
      %472 = arith.mulf %469, %471 : vector<16x16xf32>
      %cst_176 = arith.constant dense<0.000000e+00> : vector<16xf32>
      %473 = vector.multi_reduction <add>, %472, %cst_176 [1] : vector<16x16xf32> to vector<16xf32>
      %474 = vector.shape_cast %473 : vector<16xf32> to vector<16x1xf32>
      %475 = vector.extract_strided_slice %309 {offsets = [0, 96], sizes = [1, 16], strides = [1, 1]} : vector<1x128xf32> to vector<1x16xf32>
      %cst_177 = arith.constant dense<0.000000e+00> : vector<1x16xf32>
      %476 = tpu.matmul %475, %469, %cst_177 {dimension_numbers = #tpu.dot_dimension_numbers<[1], [1], [0], [0], [0, 0, 1, 0], [], []>} : vector<1x16xf32>, vector<16x16xf32>, vector<1x16xf32> -> vector<1x16xf32>
      %477 = vector.broadcast %474 : vector<16x1xf32> to vector<16x16xf32>
      %478 = vector.broadcast %476 : vector<1x16xf32> to vector<16x16xf32>
      %479 = arith.addf %477, %478 : vector<16x16xf32>
      %cst_178 = arith.constant 0.000000e+00 : f32
      %480 = vector.broadcast %cst_178 : f32 to vector<16x16xf32>
      %481 = arith.cmpf ogt, %479, %480 : vector<16x16xf32>
      %cst_179 = arith.constant 2.000000e-01 : f32
      %482 = vector.broadcast %cst_179 : f32 to vector<16x16xf32>
      %483 = arith.mulf %482, %479 : vector<16x16xf32>
      %484 = arith.select %481, %479, %483 : vector<16x16xi1>, vector<16x16xf32>
      %cst_180 = arith.constant dense<0xFF800000> : vector<16xf32>
      %485 = vector.multi_reduction <maximumf>, %484, %cst_180 [1] : vector<16x16xf32> to vector<16xf32>
      %486 = vector.shape_cast %485 : vector<16xf32> to vector<16x1xf32>
      %487 = vector.broadcast %486 : vector<16x1xf32> to vector<16x16xf32>
      %488 = arith.subf %484, %487 : vector<16x16xf32>
      %489 = math.exp %488 : vector<16x16xf32>
      %cst_181 = arith.constant dense<0.000000e+00> : vector<16xf32>
      %490 = vector.multi_reduction <add>, %489, %cst_181 [1] : vector<16x16xf32> to vector<16xf32>
      %491 = vector.shape_cast %490 : vector<16xf32> to vector<16x1xf32>
      %492 = vector.broadcast %491 : vector<16x1xf32> to vector<16x16xf32>
      %493 = arith.divf %489, %492 : vector<16x16xf32>
      %cst_182 = arith.constant dense<0.000000e+00> : vector<16x16xf32>
      %494 = tpu.matmul %493, %469, %cst_182 {dimension_numbers = #tpu.dot_dimension_numbers<[1], [0], [0], [1], [0, 0, 1, 1], [], []>} : vector<16x16xf32>, vector<16x16xf32>, vector<16x16xf32> -> vector<16x16xf32>
      %495 = vector.extract_strided_slice %312 {offsets = [0, 112], sizes = [16, 16], strides = [1, 1]} : vector<16x128xf32> to vector<16x16xf32>
      %496 = vector.extract_strided_slice %308 {offsets = [0, 112], sizes = [1, 16], strides = [1, 1]} : vector<1x128xf32> to vector<1x16xf32>
      %497 = vector.broadcast %496 : vector<1x16xf32> to vector<16x16xf32>
      %498 = arith.mulf %495, %497 : vector<16x16xf32>
      %cst_183 = arith.constant dense<0.000000e+00> : vector<16xf32>
      %499 = vector.multi_reduction <add>, %498, %cst_183 [1] : vector<16x16xf32> to vector<16xf32>
      %500 = vector.shape_cast %499 : vector<16xf32> to vector<16x1xf32>
      %501 = vector.extract_strided_slice %309 {offsets = [0, 112], sizes = [1, 16], strides = [1, 1]} : vector<1x128xf32> to vector<1x16xf32>
      %cst_184 = arith.constant dense<0.000000e+00> : vector<1x16xf32>
      %502 = tpu.matmul %501, %495, %cst_184 {dimension_numbers = #tpu.dot_dimension_numbers<[1], [1], [0], [0], [0, 0, 1, 0], [], []>} : vector<1x16xf32>, vector<16x16xf32>, vector<1x16xf32> -> vector<1x16xf32>
      %503 = vector.broadcast %500 : vector<16x1xf32> to vector<16x16xf32>
      %504 = vector.broadcast %502 : vector<1x16xf32> to vector<16x16xf32>
      %505 = arith.addf %503, %504 : vector<16x16xf32>
      %cst_185 = arith.constant 0.000000e+00 : f32
      %506 = vector.broadcast %cst_185 : f32 to vector<16x16xf32>
      %507 = arith.cmpf ogt, %505, %506 : vector<16x16xf32>
      %cst_186 = arith.constant 2.000000e-01 : f32
      %508 = vector.broadcast %cst_186 : f32 to vector<16x16xf32>
      %509 = arith.mulf %508, %505 : vector<16x16xf32>
      %510 = arith.select %507, %505, %509 : vector<16x16xi1>, vector<16x16xf32>
      %cst_187 = arith.constant dense<0xFF800000> : vector<16xf32>
      %511 = vector.multi_reduction <maximumf>, %510, %cst_187 [1] : vector<16x16xf32> to vector<16xf32>
      %512 = vector.shape_cast %511 : vector<16xf32> to vector<16x1xf32>
      %513 = vector.broadcast %512 : vector<16x1xf32> to vector<16x16xf32>
      %514 = arith.subf %510, %513 : vector<16x16xf32>
      %515 = math.exp %514 : vector<16x16xf32>
      %cst_188 = arith.constant dense<0.000000e+00> : vector<16xf32>
      %516 = vector.multi_reduction <add>, %515, %cst_188 [1] : vector<16x16xf32> to vector<16xf32>
      %517 = vector.shape_cast %516 : vector<16xf32> to vector<16x1xf32>
      %518 = vector.broadcast %517 : vector<16x1xf32> to vector<16x16xf32>
      %519 = arith.divf %515, %518 : vector<16x16xf32>
      %cst_189 = arith.constant dense<0.000000e+00> : vector<16x16xf32>
      %520 = tpu.matmul %519, %495, %cst_189 {dimension_numbers = #tpu.dot_dimension_numbers<[1], [0], [0], [1], [0, 0, 1, 1], [], []>} : vector<16x16xf32>, vector<16x16xf32>, vector<16x16xf32> -> vector<16x16xf32>
      %521 = tpu.concatenate %338, %364, %390, %416, %442, %468, %494, %520 in 1 : vector<16x16xf32>, vector<16x16xf32>, vector<16x16xf32>, vector<16x16xf32>, vector<16x16xf32>, vector<16x16xf32>, vector<16x16xf32>, vector<16x16xf32> -> vector<16x128xf32>
      %522 = vector.broadcast %310 : vector<1x128xf32> to vector<16x128xf32>
      %523 = arith.addf %521, %522 : vector<16x128xf32>
      %c0_190 = arith.constant 0 : index
      %c0_191 = arith.constant 0 : index
      %524 = vector.load %arg25[%c0_190, %c0_191] : memref<16x128xf32, #tpu.memory_space<vmem>>, vector<16x128xf32>
      tpu.vector_store %arg25[%c0_190, %c0_191], %523 {strides = array<i32>} : memref<16x128xf32, #tpu.memory_space<vmem>>, vector<16x128xf32>,
    } else {
    }
    return
  }
  func.func @transform_0(%arg0: i32) -> (i32, i32) {
    %c0_i32 = arith.constant 0 : i32
    %c0_i32_0 = arith.constant 0 : i32
    %c0_i32_1 = arith.constant 0 : i32
    return %c0_i32, %c0_i32_0 : i32, i32
  }
  func.func @transform_1(%arg0: i32) -> (i32, i32) {
    %c0_i32 = arith.constant 0 : i32
    %c0_i32_0 = arith.constant 0 : i32
    %c0_i32_1 = arith.constant 0 : i32
    return %c0_i32, %c0_i32_0 : i32, i32
  }
  func.func @transform_2(%arg0: i32) -> (i32, i32, i32) {
    %c0_i32 = arith.constant 0 : i32
    %c0_i32_0 = arith.constant 0 : i32
    %c0_i32_1 = arith.constant 0 : i32
    return %arg0, %c0_i32, %c0_i32_0 : i32, i32, i32
  }
  func.func @transform_3(%arg0: i32) -> (i32, i32, i32) {
    %c0_i32 = arith.constant 0 : i32
    %c0_i32_0 = arith.constant 0 : i32
    %c0_i32_1 = arith.constant 0 : i32
    return %arg0, %c0_i32, %c0_i32_0 : i32, i32, i32
  }
  func.func @transform_4(%arg0: i32) -> (i32, i32, i32) {
    %c0_i32 = arith.constant 0 : i32
    %c0_i32_0 = arith.constant 0 : i32
    %c0_i32_1 = arith.constant 0 : i32
    return %arg0, %c0_i32, %c0_i32_0 : i32, i32, i32
  }
  func.func @transform_5(%arg0: i32) -> (i32, i32, i32) {
    %c0_i32 = arith.constant 0 : i32
    %c0_i32_0 = arith.constant 0 : i32
    %c0_i32_1 = arith.constant 0 : i32
    return %arg0, %c0_i32, %c0_i32_0 : i32, i32, i32
  }
  func.func @transform_6(%arg0: i32) -> (i32, i32, i32) {
    %c0_i32 = arith.constant 0 : i32
    %c0_i32_0 = arith.constant 0 : i32
    %c0_i32_1 = arith.constant 0 : i32
    return %arg0, %c0_i32, %c0_i32_0 : i32, i32, i32
  }
  func.func @transform_7(%arg0: i32) -> (i32, i32, i32) {
    %c0_i32 = arith.constant 0 : i32
    %c0_i32_0 = arith.constant 0 : i32
    %c0_i32_1 = arith.constant 0 : i32
    return %arg0, %c0_i32, %c0_i32_0 : i32, i32, i32
  }
  func.func @transform_8(%arg0: i32) -> (i32, i32, i32) {
    %c0_i32 = arith.constant 0 : i32
    %c0_i32_0 = arith.constant 0 : i32
    %c0_i32_1 = arith.constant 0 : i32
    return %arg0, %c0_i32, %c0_i32_0 : i32, i32, i32
  }
  func.func @transform_9(%arg0: i32) -> (i32, i32, i32) {
    %c0_i32 = arith.constant 0 : i32
    %c0_i32_0 = arith.constant 0 : i32
    %c0_i32_1 = arith.constant 0 : i32
    return %arg0, %c0_i32, %c0_i32_0 : i32, i32, i32
  }
  func.func @transform_10(%arg0: i32) -> (i32, i32, i32) {
    %c0_i32 = arith.constant 0 : i32
    %c0_i32_0 = arith.constant 0 : i32
    %c0_i32_1 = arith.constant 0 : i32
    return %arg0, %c0_i32, %c0_i32_0 : i32, i32, i32
  }
  func.func @transform_11(%arg0: i32) -> (i32, i32, i32) {
    %c0_i32 = arith.constant 0 : i32
    %c0_i32_0 = arith.constant 0 : i32
    %c0_i32_1 = arith.constant 0 : i32
    return %arg0, %c0_i32, %c0_i32_0 : i32, i32, i32
  }
  func.func @transform_12(%arg0: i32) -> (i32, i32, i32) {
    %c0_i32 = arith.constant 0 : i32
    %c0_i32_0 = arith.constant 0 : i32
    %c0_i32_1 = arith.constant 0 : i32
    return %arg0, %c0_i32, %c0_i32_0 : i32, i32, i32
  }
  func.func @transform_13(%arg0: i32) -> (i32, i32, i32) {
    %c0_i32 = arith.constant 0 : i32
    %c0_i32_0 = arith.constant 0 : i32
    %c0_i32_1 = arith.constant 0 : i32
    return %arg0, %c0_i32, %c0_i32_0 : i32, i32, i32
  }
  func.func @transform_14(%arg0: i32) -> (i32, i32) {
    %c0_i32 = arith.constant 0 : i32
    %c0_i32_0 = arith.constant 0 : i32
    %c0_i32_1 = arith.constant 0 : i32
    return %c0_i32, %c0_i32_0 : i32, i32
  }
  func.func @transform_15(%arg0: i32) -> (i32, i32) {
    %c0_i32 = arith.constant 0 : i32
    %c0_i32_0 = arith.constant 0 : i32
    %c0_i32_1 = arith.constant 0 : i32
    return %c0_i32, %c0_i32_0 : i32, i32
  }
  func.func @transform_16(%arg0: i32) -> (i32, i32) {
    %c0_i32 = arith.constant 0 : i32
    %c0_i32_0 = arith.constant 0 : i32
    %c0_i32_1 = arith.constant 0 : i32
    return %c0_i32, %c0_i32_0 : i32, i32
  }
  func.func @transform_17(%arg0: i32) -> (i32, i32) {
    %c0_i32 = arith.constant 0 : i32
    %c0_i32_0 = arith.constant 0 : i32
    %c0_i32_1 = arith.constant 0 : i32
    return %c0_i32, %c0_i32_0 : i32, i32
  }
  func.func @transform_18(%arg0: i32) -> (i32, i32) {
    %c0_i32 = arith.constant 0 : i32
    %c0_i32_0 = arith.constant 0 : i32
    %c0_i32_1 = arith.constant 0 : i32
    return %c0_i32, %c0_i32_0 : i32, i32
  }
  func.func @transform_19(%arg0: i32) -> (i32, i32) {
    %c0_i32 = arith.constant 0 : i32
    %c0_i32_0 = arith.constant 0 : i32
    %c0_i32_1 = arith.constant 0 : i32
    return %c0_i32, %c0_i32_0 : i32, i32
  }
  func.func @transform_20(%arg0: i32) -> (i32, i32) {
    %c0_i32 = arith.constant 0 : i32
    %c0_i32_0 = arith.constant 0 : i32
    %c0_i32_1 = arith.constant 0 : i32
    return %c0_i32, %c0_i32_0 : i32, i32
  }
  func.func @transform_21(%arg0: i32) -> (i32, i32) {
    %c0_i32 = arith.constant 0 : i32
    %c0_i32_0 = arith.constant 0 : i32
    %c0_i32_1 = arith.constant 0 : i32
    return %c0_i32, %c0_i32_0 : i32, i32
  }
  func.func @transform_22(%arg0: i32) -> (i32, i32) {
    %c0_i32 = arith.constant 0 : i32
    %c0_i32_0 = arith.constant 0 : i32
    %c0_i32_1 = arith.constant 0 : i32
    return %c0_i32, %c0_i32_0 : i32, i32
  }
  func.func @transform_23(%arg0: i32) -> (i32, i32) {
    %c0_i32 = arith.constant 0 : i32
    %c0_i32_0 = arith.constant 0 : i32
    %c0_i32_1 = arith.constant 0 : i32
    return %c0_i32, %c0_i32_0 : i32, i32
  }
  func.func @transform_24(%arg0: i32) -> (i32, i32) {
    %c0_i32 = arith.constant 0 : i32
    %c0_i32_0 = arith.constant 0 : i32
    %c0_i32_1 = arith.constant 0 : i32
    return %c0_i32, %c0_i32_0 : i32, i32
  }
}

</mosaic_0001>

<bundles_post_ra>
// kernel: cognos_forward.1
= control target key start
LH: loop header
LB: loop body
LE: loop exit
PB: predicated region body
PF: predicated region fallthrough
CT: control target
= control target key end

     0   :  { %s10816_s0 = inlined_call_operand.hbm [shape: f32[16,128], index: 0, kind: input, shape index: {}]   ;;  %s10817_s1 = inlined_call_operand.hbm [shape: f32[16,128], index: 1, kind: input, shape index: {}]   ;;  %s10818_s2 = inlined_call_operand.hbm [shape: bf16[6,128,384], index: 2, kind: input, shape index: {}]   ;;  %s10819_s3 = inlined_call_operand.vmem [shape: f32[6,1,384], index: 3, kind: input, shape index: {}]   ;;  %s10820_s4 = inlined_call_operand.hbm [shape: bf16[6,128,128], index: 4, kind: input, shape index: {}]   ;;  %s10821_s5 = inlined_call_operand.hbm [shape: f32[6,1,128], index: 5, kind: input, shape index: {}]   ;;  %s10822_s6 = inlined_call_operand.hbm [shape: f32[6,1,128], index: 6, kind: input, shape index: {}]   ;;  %s10823_s7 = inlined_call_operand.hbm [shape: f32[6,1,128], index: 7, kind: input, shape index: {}]   ;;  %s10824_s8 = inlined_call_operand.hbm [shape: bf16[6,128,512], index: 8, kind: input, shape index: {}]   ;;  %s10825_s9 = inlined_call_operand.hbm [shape: f32[6,1,512], index: 9, kind: input, shape index: {}]   ;;  %s10826_s10 = inlined_call_operand.hbm [shape: bf16[6,512,128], index: 10, kind: input, shape index: {}]   ;;  %s10827_s11 = inlined_call_operand.hbm [shape: f32[6,1,128], index: 11, kind: input, shape index: {}]   ;;  %s10828_s12 = inlined_call_operand.hbm [shape: f32[6,1,128], index: 12, kind: input, shape index: {}]   ;;  %s10829_s13 = inlined_call_operand.hbm [shape: f32[6,1,128], index: 13, kind: input, shape index: {}]   ;;  %s10830_s14 = inlined_call_operand.hbm [shape: bf16[128,256], index: 14, kind: input, shape index: {}]   ;;  %s10831_s15 = inlined_call_operand.hbm [shape: f32[1,256], index: 15, kind: input, shape index: {}]   ;;  %s10832_s16 = inlined_call_operand.hbm [shape: bf16[256,128], index: 16, kind: input, shape index: {}]   ;;  %s10833_s17 = inlined_call_operand.vmem [shape: f32[1,128], index: 17, kind: input, shape index: {}]   ;;  %s10834_s18 = inlined_call_operand.vmem [shape: bf16[128,128], index: 18, kind: input, shape index: {}]   ;;  %s10835_s19 = inlined_call_operand.hbm [shape: f32[1,128], index: 19, kind: input, shape index: {}]   ;;  %s10836_s20 = inlined_call_operand.hbm [shape: f32[1,128], index: 20, kind: input, shape index: {}]   ;;  %s10837_s21 = inlined_call_operand.hbm [shape: f32[1,128], index: 21, kind: input, shape index: {}]   ;;  %s10838_s22 = inlined_call_operand.hbm [shape: f32[16,128], index: 22, kind: output, shape index: {0}]   ;;  %s10839_s23 = inlined_call_operand.hbm [shape: f32[16,128], index: 23, kind: output, shape index: {1}]   ;;  %s10840_s24 = inlined_call_operand.hbm [shape: f32[16,128], index: 24, kind: output, shape index: {2}]  }
   0x1   :  { %10896 = sst [smem:[#allocation48_spill]] %s10816_s0 }
   0x2   :  { %10897 = sst [smem:[#allocation49_spill]] %s10817_s1 }
   0x3   :  { %10898 = sst [smem:[#allocation50_spill]] %s10818_s2 }
   0x4   :  { %10899 = sst [smem:[#allocation51_spill]] %s10819_s3 }
   0x5   :  { %10900 = sst [smem:[#allocation52_spill]] %s10820_s4 }
   0x6   :  { %10901 = sst [smem:[#allocation53_spill]] %s10821_s5 }
   0x7   :  { %10902 = sst [smem:[#allocation54_spill]] %s10822_s6 }
   0x8   :  { %10903 = sst [smem:[#allocation55_spill]] %s10823_s7 }
   0x9   :  { %10904 = sst [smem:[#allocation56_spill]] %s10824_s8 }
   0xa   :  { %10905 = sst [smem:[#allocation57_spill]] %s10825_s9 }
   0xb   :  { %10906 = sst [smem:[#allocation58_spill]] %s10826_s10 }
   0xc   :  { %10907 = sst [smem:[#allocation59_spill]] %s10827_s11 }
   0xd   :  { %10908 = sst [smem:[#allocation60_spill]] %s10829_s13 }
   0xe   :  { %10909 = sst [smem:[#allocation61_spill]] %s10833_s17 }
   0xf   :  { %10910 = sst [smem:[#allocation62_spill]] %s10834_s18 }
  0x10   :  { %10911 = sst [smem:[#allocation63_spill]] %s10837_s21 }
  0x11   :  { %10912 = sst [smem:[#allocation64_spill]] %s10838_s22 }
  0x12   :  { %10913 = sst [smem:[#allocation65_spill]] %s10839_s23 }
  0x13   :  { %10914 = sst [smem:[#allocation66_spill]] %s10840_s24 }
  0x14   :  { %30 = vsyncpa [#allocation4], 0 }
  0x15   :  { %31 = vsyncpa [#allocation7], 0 }
  0x16   :  { %32 = vsyncpa [#allocation21], 0 }
  0x17   :  { %33 = vsyncpa [#allocation24], 0 }
  0x18   :  { %34 = vsyncpa [#allocation27], 0 }
  0x19   :  { %35 = vsyncpa [#allocation5], 0 }
  0x1a   :  { %36 = vsyncpa [#allocation30], 0  ;;  %s9395_s5 = smov 0   ;;  %s9397_s26 = smov 0  }
  0x1b   :  { %s9399_s27 = smov 0   ;;  %s9401_s28 = smov 0  }
  0x1c LB: > { %10915 = sst [smem:[#allocation41_spill]] %s9206_s26  ;;  %s9414_s6 = sadd.s32 4294967295, %s9214_s28   ;;  %s9214_s28 = sphi %s9401_s28, %s10993_s28   ;;  %s9210_s27 = sphi %s9399_s27, %s10996_s27   ;;  %s9206_s26 = sphi %s9397_s26, %s10995_s26   ;;  %s9202_s5 = sphi %s9395_s5, %s10994_s5  }
  0x1d   : > { %10916 = sst [smem:[#allocation42_spill]] %s9210_s27  ;;  %p104_p0 = scmp.ne.s32.totalorder %s9206_s26, %s9202_s5 }
  0x1e   : > { %10917 = sst [smem:[#allocation43_spill]] %s9414_s6  ;;  %p10855_p1 = scmp.eq.s32.totalorder %s9414_s6, 0 }
  0x1f   : > { %p6905_p2 = scmp.ge.s32.totalorder %s9214_s28, 1  ;;  %p632_p3 = scmp.lt.s32.totalorder %s9214_s28, 7 }
  0x20   : > { %p9423_p5 = por %p10855_p1, %p104_p0  ;;  %s9216_s0 = smov [#allocation3]  }
  0x21   : > { %p9427_p6 = pnand %p6905_p2, %p632_p3  ;;  %s644_s7 = sshll.u32 %s9216_s0, 4  ;;  %s645_s7 = int_to_ptr.vmem [resolvable:$true] %s644_s7 }
  0x22   : > { %s10918_s2 = scalar_select %p9423_p5, 1, 0 }
  0x23   : > { %s10920_s29 = scalar_select %p9427_p6, 1, 0 }
  0x24   : > { %10919 = sst [smem:[#allocation44_spill]] %s10918_s2  ;;  %p7948_p7 = pneg %p9427_p6 }
  0x25   : > { %10921 = sst [smem:[#allocation45_spill]] %s10920_s29  ;;  %s9440_s3 = sadd.s32 1, %s9214_s28  }
  0x26   : > { %p9435_p8 = pnand %p7948_p7, %p10855_p1  ;;  %10923 = sst [smem:[#allocation46_spill]] %s9440_s3 }
  0x27   : > { %s91_s25 = sadd.s32 1, %s9210_s27  ;;  %s88_s8 = ssub.s32 %s9214_s28, %s9440_s3 }
  0x28   : > { %s10922_s30 = scalar_select %p9435_p8, 1, 0 }
  0x29   : > { %s10924_s5 = sld [smem:[#allocation48_spill]]  ;;  %p9453_p10 = pneg %p9435_p8 }
  0x2b   : > { %s10926_s17 = scalar_select %p9453_p10, 1, 0 }
  0x2f   : > { %s10925_s24 = smov %s10924_s5  ;;  %s8516_s22 = scalar_lea.hbm %s10924_s5, 256 }
  0x30   : > { %p8517_p9 = scmp.ne.s32.totalorder %s10925_s24, %s8516_s22  ;;  %p8523_p13 = scmp.lt.u32.totalorder %s8516_s22, %s10925_s24 }
  0x32   : > { %p8519_p11 = pnand %p9453_p10, %p8517_p9 }
  0x34   : > { %p8520_p12 = pneg %p8519_p11 }
  0x36   : > { %p8525_p0 = pnand %p8523_p13, %p8520_p12 }
  0x38   : > { %8528 = shalt.err (!%p8525_p0)
}
  0x39   : > { %s8529_s4 = scalar_lea.vmem %s645_s7, 256  ;;  %p8537_p4 = scmp.lt.s32.totalorder %s645_s7, %s645_s7 }
  0x3a   : > { %p8530_p2 = scmp.ne.s32.totalorder %s645_s7, %s8529_s4  ;;  %p8538_p1 = scmp.lt.s32.totalorder %s8529_s4, %s8529_s4 }
  0x3c   : > { %p8532_p3 = pnand %p8530_p2, %p9453_p10  ;;  %p8539_p5 = por %p8538_p1, %p8537_p4 }
  0x3e   : > { %p8533_p7 = pneg %p8532_p3 }
  0x40   : > { %p8540_p6 = pnand %p8539_p5, %p8533_p7 }
  0x42   : > { %8543 = shalt.err (!%p8540_p6)
}
  0x43   : > { %s10863_s23 = smov 128   ;;  %s10865_s18 = smov 8  }
  0x44   : > { %7951 = dma.hbm_to_vmem [thread:$0]  (!%p9435_p8), %s10925_s24, 256, %s645_s7, [#allocation4], %s10863_s23, %s10863_s23, %s10865_s18  }
  0x45   : > { %p89_p1 = scmp.eq.s32.totalorder %s88_s8, 0  ;;  %p98_p4 = scmp.ne.s32.totalorder %s9210_s27, %s9206_s26 }
  0x46   : > { %p99_p5 = scmp.eq.s32.totalorder %s9214_s28, 0  ;;  %p8015_p6 = scmp.lt.s32.totalorder %s9214_s28, 6 }
  0x47   : > { %s9477_s1 = scalar_select %p89_p1, %s9210_s27, %s91_s25  }
  0x48   : > { %p100_p9 = por %p99_p5, %p98_p4  ;;  %s747_s5 = sand.u32 1, %s9214_s28  }
  0x49   : > { %10927 = sst [smem:[#allocation47_spill]] %s9477_s1  ;;  %s9481_s0 = sand.u32 1, %s9210_s27  }
  0x4a   : > { %s7878_s4 = smul.u32 192, %s9481_s0  ;;  %p9484_p11 = pnand %p8015_p6, %p100_p9 }
  0x4b   : > { %s7879_s6 = smul.u32 3072, %s9214_s28  ;;  %s10929_s8 = sld [smem:[#allocation50_spill]] }
  0x4c   : > { %s10928_s3 = scalar_select %p9484_p11, 1, 0 }
  0x4d   : > { %s751_s25 = scalar_lea.vmem [#allocation8], %s7878_s4  ;;  %s9496_s18 = scalar_lea.sflag [#allocation4], %s747_s5 }
  0x4e   : > { %s758_s23 = sshll.u32 %s751_s25, 4  ;;  %p9502_p13 = pneg %p9484_p11  ;;  %s9494_s23 = int_to_ptr.vmem [resolvable:$true] %s758_s23 }
  0x50   : > { %s10930_s1 = scalar_select %p9502_p13, 1, 0 }
  0x51   : > { %s9492_s2 = scalar_lea.hbm %s10929_s8, %s7879_s6  ;;  %s8549_s4 = scalar_lea.hbm %s10929_s8, 18432 }
  0x52   : > { %s8544_s24 = scalar_lea.hbm %s9492_s2, 3072  ;;  %p8550_p3 = scmp.lt.u32.totalorder %s9492_s2, %s10929_s8 }
  0x53   : > { %p8545_p12 = scmp.ne.s32.totalorder %s9492_s2, %s8544_s24  ;;  %p8551_p7 = scmp.lt.u32.totalorder %s8549_s4, %s8544_s24 }
  0x54   : > { %p8553_p4 = scmp.lt.u32.totalorder %s8544_s24, %s9492_s2 }
  0x55   : > { %p8547_p0 = pnand %p9502_p13, %p8545_p12  ;;  %p8552_p1 = por %p8551_p7, %p8550_p3 }
  0x57   : > { %p8548_p2 = pneg %p8547_p0  ;;  %p8554_p5 = por %p8553_p4, %p8552_p1 }
  0x59   : > { %p8555_p6 = pnand %p8554_p5, %p8548_p2 }
  0x5b   : > { %8558 = shalt.err (!%p8555_p6)
}
  0x5c   : > { %s8559_s5 = scalar_lea.vmem %s9494_s23, 3072  ;;  %s9219_s6 = smov [#allocation8]  }
  0x5d   : > { %p8560_p9 = scmp.ne.s32.totalorder %s9494_s23, %s8559_s5  ;;  %s8564_s22 = sshll.u32 %s9219_s6, 4  ;;  %s8565_s22 = int_to_ptr.vmem [resolvable:$false] %s8564_s22 }
  0x5e   : > { %s8566_s7 = scalar_lea.vmem %s8565_s22, 6144  ;;  %p8567_p8 = scmp.lt.s32.totalorder %s9494_s23, %s8565_s22 }
  0x5f   : > { %p8562_p12 = pnand %p8560_p9, %p9502_p13  ;;  %p8568_p10 = scmp.lt.s32.totalorder %s8566_s7, %s8559_s5 }
  0x61   : > { %p8563_p0 = pneg %p8562_p12  ;;  %p8569_p3 = por %p8568_p10, %p8567_p8 }
  0x63   : > { %p8570_p7 = pnand %p8569_p3, %p8563_p0 }
  0x65   : > { %8573 = shalt.err (!%p8570_p7)
}
  0x66   : > { %s9220_s24 = smov 192   ;;  %s9221_s4 = smov 12  }
  0x67   : > { %7976 = dma.hbm_to_vmem [thread:$0]  (!%p9484_p11), %s9492_s2, 3072, %s9494_s23, %s9496_s18, %s9220_s24, %s9220_s24, %s9221_s4  }
  0x68   : > { %s6916_s25 = sshll.u32 %s9481_s0, 6  ;;  %s7198_s6 = sshll.u32 %s9214_s28, 10 }
  0x69   : > { %s10931_s5 = sld [smem:[#allocation52_spill]]  ;;  %s779_s26 = scalar_lea.vmem [#allocation9], %s6916_s25 }
  0x6a   : > { %s786_s29 = sshll.u32 %s779_s26, 4  ;;  %s9536_s21 = sshll.u32 %s9214_s28, 4  ;;  %s9533_s29 = int_to_ptr.vmem [resolvable:$true] %s786_s29 }
  0x6f   : > { %s10932_s7 = smov %s10931_s5  ;;  %s9531_s27 = scalar_lea.hbm %s10931_s5, %s7198_s6 }
  0x70   : > { %s8574_s13 = scalar_lea.hbm %s9531_s27, 1024  ;;  %s8579_s8 = scalar_lea.hbm %s10932_s7, 6144 }
  0x71   : > { %p8575_p8 = scmp.ne.s32.totalorder %s9531_s27, %s8574_s13  ;;  %p8580_p1 = scmp.lt.u32.totalorder %s9531_s27, %s10932_s7 }
  0x72   : > { %p8581_p4 = scmp.lt.u32.totalorder %s8579_s8, %s8574_s13  ;;  %p8583_p6 = scmp.lt.u32.totalorder %s8574_s13, %s9531_s27 }
  0x73   : > { %p8577_p10 = pnand %p8575_p8, %p9502_p13 }
  0x74   : > { %p8582_p5 = por %p8581_p4, %p8580_p1 }
  0x75   : > { %p8578_p2 = pneg %p8577_p10 }
  0x76   : > { %p8584_p9 = por %p8583_p6, %p8582_p5 }
  0x78   : > { %p8585_p12 = pnand %p8584_p9, %p8578_p2 }
  0x7a   : > { %8588 = shalt.err (!%p8585_p12)
}
  0x7b   : > { %s8589_s26 = scalar_lea.vmem %s9533_s29, 1024  ;;  %s9222_s25 = smov [#allocation9]  }
  0x7c   : > { %p8590_p0 = scmp.ne.s32.totalorder %s9533_s29, %s8589_s26  ;;  %s8594_s6 = sshll.u32 %s9222_s25, 4  ;;  %s8595_s6 = int_to_ptr.vmem [resolvable:$false] %s8594_s6 }
  0x7d   : > { %s8596_s22 = scalar_lea.vmem %s8595_s6, 2048  ;;  %p8597_p8 = scmp.lt.s32.totalorder %s9533_s29, %s8595_s6 }
  0x7e   : > { %p8592_p3 = pnand %p8590_p0, %p9502_p13  ;;  %p8598_p10 = scmp.lt.s32.totalorder %s8596_s22, %s8589_s26 }
  0x80   : > { %p8593_p7 = pneg %p8592_p3  ;;  %p8599_p1 = por %p8598_p10, %p8597_p8 }
  0x82   : > { %p8600_p4 = pnand %p8599_p1, %p8593_p7 }
  0x84   : > { %8603 = shalt.err (!%p8600_p4)
}
  0x85   : > { %s10878_s13 = smov 64   ;;  %s10882_s5 = smov 4  }
  0x86   : > { %7979 = dma.hbm_to_vmem [thread:$0]  (!%p9484_p11), %s9531_s27, 1024, %s9533_s29, %s9496_s18, %s10878_s13, %s10878_s13, %s10882_s5  }
  0x87   : > { %s10933_s8 = sld [smem:[#allocation53_spill]]  ;;  %s799_s4 = scalar_lea.vmem [#allocation10], %s9481_s0 }
  0x88   : > { %s806_s26 = sshll.u32 %s799_s4, 4  ;;  %s807_s26 = int_to_ptr.vmem [resolvable:$true] %s806_s26 }
  0x8d   : > { %s9567_s24 = scalar_lea.hbm %s10933_s8, %s9536_s21  ;;  %s8609_s27 = scalar_lea.hbm %s10933_s8, 96 }
  0x8e   : > { %s8604_s25 = scalar_lea.hbm %s9567_s24, 16  ;;  %p8610_p9 = scmp.lt.u32.totalorder %s9567_s24, %s10933_s8 }
  0x8f   : > { %p8605_p2 = scmp.ne.s32.totalorder %s9567_s24, %s8604_s25  ;;  %p8611_p12 = scmp.lt.u32.totalorder %s8609_s27, %s8604_s25 }
  0x90   : > { %p8613_p3 = scmp.lt.u32.totalorder %s8604_s25, %s9567_s24 }
  0x91   : > { %p8607_p5 = pnand %p8605_p2, %p9502_p13  ;;  %p8612_p0 = por %p8611_p12, %p8610_p9 }
  0x93   : > { %p8608_p6 = pneg %p8607_p5  ;;  %p8614_p7 = por %p8613_p3, %p8612_p0 }
  0x95   : > { %p8615_p8 = pnand %p8614_p7, %p8608_p6 }
  0x97   : > { %8618 = shalt.err (!%p8615_p8)
}
  0x98   : > { %s8619_s2 = scalar_lea.vmem %s807_s26, 16  ;;  %s9225_s4 = smov [#allocation10]  }
  0x99   : > { %p8620_p10 = scmp.ne.s32.totalorder %s807_s26, %s8619_s2  ;;  %s8624_s13 = sshll.u32 %s9225_s4, 4  ;;  %s8625_s13 = int_to_ptr.vmem [resolvable:$false] %s8624_s13 }
  0x9a   : > { %s8626_s6 = scalar_lea.vmem %s8625_s13, 32  ;;  %p8627_p2 = scmp.lt.s32.totalorder %s807_s26, %s8625_s13 }
  0x9b   : > { %p8622_p1 = pnand %p8620_p10, %p9502_p13  ;;  %p8628_p5 = scmp.lt.s32.totalorder %s8626_s6, %s8619_s2 }
  0x9d   : > { %p8623_p4 = pneg %p8622_p1  ;;  %p8629_p11 = por %p8628_p5, %p8627_p2 }
  0x9f   : > { %p8630_p9 = pnand %p8629_p11, %p8623_p4 }
  0xa1   : > { %8633 = shalt.err (!%p8630_p9)
}
  0xa2   : > { %p10934_p12 = scmp.ne.s32.totalorder %s10928_s3, 0  ;;  %s10935_s27 = sld [smem:[#allocation54_spill]] }
  0xa3   : > { %s816_s13 = scalar_lea.vmem [#allocation11], %s9481_s0 }
  0xa4   : > { %7982 = dma.hbm_to_vmem [thread:$0]  (!%p10934_p12), %s9567_s24, 16, %s807_s26, %s9496_s18  }
  0xa5   : > { %s823_s2 = sshll.u32 %s816_s13, 4  ;;  %s824_s2 = int_to_ptr.vmem [resolvable:$true] %s823_s2 }
  0xa8   : > { %s10936_s29 = smov %s10935_s27  ;;  %s9592_s23 = scalar_lea.hbm %s10935_s27, %s9536_s21 }
  0xa9   : > { %s8634_s4 = scalar_lea.hbm %s9592_s23, 16  ;;  %s8639_s24 = scalar_lea.hbm %s10936_s29, 96 }
  0xaa   : > { %p8635_p11 = scmp.ne.s32.totalorder %s9592_s23, %s8634_s4  ;;  %p8640_p3 = scmp.lt.u32.totalorder %s9592_s23, %s10936_s29 }
  0xab   : > { %p8641_p7 = scmp.lt.u32.totalorder %s8639_s24, %s8634_s4  ;;  %p8643_p10 = scmp.lt.u32.totalorder %s8634_s4, %s9592_s23 }
  0xac   : > { %p8637_p6 = pnand %p8635_p11, %p9502_p13 }
  0xad   : > { %p8642_p8 = por %p8641_p7, %p8640_p3 }
  0xae   : > { %p8638_p0 = pneg %p8637_p6 }
  0xaf   : > { %p8644_p1 = por %p8643_p10, %p8642_p8 }
  0xb1   : > { %p8645_p4 = pnand %p8644_p1, %p8638_p0 }
  0xb3   : > { %8648 = shalt.err (!%p8645_p4)
}
  0xb4   : > { %s8649_s22 = scalar_lea.vmem %s824_s2, 16  ;;  %s9226_s27 = smov [#allocation11]  }
  0xb5   : > { %p8650_p2 = scmp.ne.s32.totalorder %s824_s2, %s8649_s22  ;;  %s8654_s13 = sshll.u32 %s9226_s27, 4  ;;  %s8655_s13 = int_to_ptr.vmem [resolvable:$false] %s8654_s13 }
  0xb6   : > { %s8656_s5 = scalar_lea.vmem %s8655_s13, 32  ;;  %p8657_p11 = scmp.lt.s32.totalorder %s824_s2, %s8655_s13 }
  0xb7   : > { %p8652_p5 = pnand %p8650_p2, %p9502_p13  ;;  %p8658_p6 = scmp.lt.s32.totalorder %s8656_s5, %s8649_s22 }
  0xb9   : > { %p8653_p9 = pneg %p8652_p5  ;;  %p8659_p12 = por %p8658_p6, %p8657_p11 }
  0xbb   : > { %p8660_p3 = pnand %p8659_p12, %p8653_p9 }
  0xbd   : > { %8663 = shalt.err (!%p8660_p3)
}
  0xbe   : > { %p10937_p7 = scmp.ne.s32.totalorder %s10928_s3, 0  ;;  %s10938_s24 = sld [smem:[#allocation55_spill]] }
  0xbf   : > { %s833_s25 = scalar_lea.vmem [#allocation12], %s9481_s0 }
  0xc0   : > { %7985 = dma.hbm_to_vmem [thread:$0]  (!%p10937_p7), %s9592_s23, 16, %s824_s2, %s9496_s18  }
  0xc1   : > { %s840_s22 = sshll.u32 %s833_s25, 4  ;;  %s841_s22 = int_to_ptr.vmem [resolvable:$true] %s840_s22 }
  0xc4   : > { %s9617_s26 = scalar_lea.hbm %s10938_s24, %s9536_s21  ;;  %s8669_s2 = scalar_lea.hbm %s10938_s24, 96 }
  0xc5   : > { %s8664_s13 = scalar_lea.hbm %s9617_s26, 16  ;;  %p8670_p10 = scmp.lt.u32.totalorder %s9617_s26, %s10938_s24 }
  0xc6   : > { %p8665_p12 = scmp.ne.s32.totalorder %s9617_s26, %s8664_s13  ;;  %p8671_p1 = scmp.lt.u32.totalorder %s8669_s2, %s8664_s13 }
  0xc7   : > { %p8673_p2 = scmp.lt.u32.totalorder %s8664_s13, %s9617_s26 }
  0xc8   : > { %p8667_p0 = pnand %p8665_p12, %p9502_p13  ;;  %p8672_p4 = por %p8671_p1, %p8670_p10 }
  0xca   : > { %p8668_p8 = pneg %p8667_p0  ;;  %p8674_p5 = por %p8673_p2, %p8672_p4 }
  0xcc   : > { %p8675_p9 = pnand %p8674_p5, %p8668_p8 }
  0xce   : > { %8678 = shalt.err (!%p8675_p9)
}
  0xcf   : > { %s8679_s25 = scalar_lea.vmem %s841_s22, 16  ;;  %s9227_s27 = smov [#allocation12]  }
  0xd0   : > { %p8680_p11 = scmp.ne.s32.totalorder %s841_s22, %s8679_s25  ;;  %s8684_s7 = sshll.u32 %s9227_s27, 4  ;;  %s8685_s7 = int_to_ptr.vmem [resolvable:$false] %s8684_s7 }
  0xd1   : > { %s8686_s5 = scalar_lea.vmem %s8685_s7, 32  ;;  %p8687_p12 = scmp.lt.s32.totalorder %s841_s22, %s8685_s7 }
  0xd2   : > { %p8682_p6 = pnand %p8680_p11, %p9502_p13  ;;  %p8688_p0 = scmp.lt.s32.totalorder %s8686_s5, %s8679_s25 }
  0xd4   : > { %p8683_p3 = pneg %p8682_p6  ;;  %p8689_p7 = por %p8688_p0, %p8687_p12 }
  0xd6   : > { %p8690_p1 = pnand %p8689_p7, %p8683_p3 }
  0xd8   : > { %8693 = shalt.err (!%p8690_p1)
}
  0xd9   : > { %p10939_p10 = scmp.ne.s32.totalorder %s10928_s3, 0  ;;  %s10886_s13 = sshll.u32 %s9214_s28, 12 }
  0xda   : > { %s10940_s2 = sld [smem:[#allocation56_spill]]  ;;  %s10941_s4 = sshll.u32 %s9481_s0, 8 }
  0xdb   : > { %7988 = dma.hbm_to_vmem [thread:$0]  (!%p10939_p10), %s9617_s26, 16, %s841_s22, %s9496_s18  }
  0xdc   : > { %s851_s6 = scalar_lea.vmem [#allocation13], %s10941_s4  ;;  %s6925_s5 = sshll.u32 %s9481_s0, 2 }
  0xdd   : > { %s858_s25 = sshll.u32 %s851_s6, 4  ;;  %s9649_s25 = int_to_ptr.vmem [resolvable:$true] %s858_s25 }
  0xe0   : > { %s9645_s7 = scalar_lea.hbm %s10940_s2, %s10886_s13  ;;  %s8699_s27 = scalar_lea.hbm %s10940_s2, 24576 }
  0xe1   : > { %s8694_s8 = scalar_lea.hbm %s9645_s7, 4096  ;;  %p8700_p2 = scmp.lt.u32.totalorder %s9645_s7, %s10940_s2 }
  0xe2   : > { %p8695_p7 = scmp.ne.s32.totalorder %s9645_s7, %s8694_s8  ;;  %p8701_p5 = scmp.lt.u32.totalorder %s8699_s27, %s8694_s8 }
  0xe3   : > { %p8703_p11 = scmp.lt.u32.totalorder %s8694_s8, %s9645_s7 }
  0xe4   : > { %p8697_p8 = pnand %p8695_p7, %p9502_p13  ;;  %p8702_p9 = por %p8701_p5, %p8700_p2 }
  0xe6   : > { %p8698_p4 = pneg %p8697_p8  ;;  %p8704_p6 = por %p8703_p11, %p8702_p9 }
  0xe8   : > { %p8705_p3 = pnand %p8704_p6, %p8698_p4 }
  0xea   : > { %8708 = shalt.err (!%p8705_p3)
}
  0xeb   : > { %s8709_s4 = scalar_lea.vmem %s9649_s25, 4096  ;;  %s9228_s6 = smov [#allocation13]  }
  0xec   : > { %p8710_p12 = scmp.ne.s32.totalorder %s9649_s25, %s8709_s4  ;;  %s8714_s26 = sshll.u32 %s9228_s6, 4  ;;  %s8715_s26 = int_to_ptr.vmem [resolvable:$false] %s8714_s26 }
  0xed   : > { %s8716_s13 = scalar_lea.vmem %s8715_s26, 8192  ;;  %p8717_p7 = scmp.lt.s32.totalorder %s9649_s25, %s8715_s26 }
  0xee   : > { %p8712_p0 = pnand %p8710_p12, %p9502_p13  ;;  %p8718_p8 = scmp.lt.s32.totalorder %s8716_s13, %s8709_s4 }
  0xf0   : > { %p8713_p1 = pneg %p8712_p0  ;;  %p8719_p2 = por %p8718_p8, %p8717_p7 }
  0xf2   : > { %p8720_p5 = pnand %p8719_p2, %p8713_p1 }
  0xf4   : > { %8723 = shalt.err (!%p8720_p5)
}
  0xf5   : > { %s9229_s8 = smov 256   ;;  %s9230_s22 = smov 16  }
  0xf6   : > { %7991 = dma.hbm_to_vmem [thread:$0]  (!%p10939_p10), %s9645_s7, 4096, %s9649_s25, %s9496_s18, %s9229_s8, %s9229_s8, %s9230_s22  }
  0xf7   : > { %s7200_s27 = sshll.u32 %s9214_s28, 6  ;;  %s10942_s9 = sld [smem:[#allocation57_spill]] }
  0xf8   : > { %s872_s4 = scalar_lea.vmem [#allocation14], %s6925_s5 }
  0xf9   : > { %s880_s13 = sshll.u32 %s872_s4, 4  ;;  %s881_s13 = int_to_ptr.vmem [resolvable:$true] %s880_s13 }
  0xfd   : > { %s9678_s26 = scalar_lea.hbm %s10942_s9, %s7200_s27  ;;  %s8729_s8 = scalar_lea.hbm %s10942_s9, 384 }
  0xfe   : > { %s8724_s2 = scalar_lea.hbm %s9678_s26, 64  ;;  %p8730_p6 = scmp.lt.u32.totalorder %s9678_s26, %s10942_s9 }
  0xff   : > { %p8725_p4 = scmp.ne.s32.totalorder %s9678_s26, %s8724_s2  ;;  %p8731_p3 = scmp.lt.u32.totalorder %s8729_s8, %s8724_s2 }
 0x100   : > { %p8733_p0 = scmp.lt.u32.totalorder %s8724_s2, %s9678_s26 }
 0x101   : > { %p8727_p9 = pnand %p8725_p4, %p9502_p13  ;;  %p8732_p12 = por %p8731_p3, %p8730_p6 }
 0x103   : > { %p8728_p11 = pneg %p8727_p9  ;;  %p8734_p1 = por %p8733_p0, %p8732_p12 }
 0x105   : > { %p8735_p7 = pnand %p8734_p1, %p8728_p11 }
 0x107   : > { %8738 = shalt.err (!%p8735_p7)
}
 0x108   : > { %s8739_s5 = scalar_lea.vmem %s881_s13, 64  ;;  %s9231_s23 = smov [#allocation14]  }
 0x109   : > { %p8740_p8 = scmp.ne.s32.totalorder %s881_s13, %s8739_s5  ;;  %s8744_s6 = sshll.u32 %s9231_s23, 4  ;;  %s8745_s6 = int_to_ptr.vmem [resolvable:$false] %s8744_s6 }
 0x10a   : > { %s8746_s4 = scalar_lea.vmem %s8745_s6, 128  ;;  %p8747_p4 = scmp.lt.s32.totalorder %s881_s13, %s8745_s6 }
 0x10b   : > { %p8742_p2 = pnand %p8740_p8, %p9502_p13  ;;  %p8748_p9 = scmp.lt.s32.totalorder %s8746_s4, %s8739_s5 }
 0x10d   : > { %p8743_p5 = pneg %p8742_p2  ;;  %p8749_p10 = por %p8748_p9, %p8747_p4 }
 0x10f   : > { %p8750_p3 = pnand %p8749_p10, %p8743_p5 }
 0x111   : > { %8753 = shalt.err (!%p8750_p3)
}
 0x112   : > { %p10943_p6 = scmp.ne.s32.totalorder %s10928_s3, 0  ;;  %s10944_s2 = sshll.u32 %s9214_s28, 12 }
 0x113   : > { %s10945_s10 = sld [smem:[#allocation58_spill]]  ;;  %s10946_s22 = sshll.u32 %s9481_s0, 8 }
 0x114   : > { %7994 = dma.hbm_to_vmem [thread:$0]  (!%p10943_p6), %s9678_s26, 64, %s881_s13, %s9496_s18  }
 0x115   : > { %s891_s27 = scalar_lea.vmem [#allocation15], %s10946_s22 }
 0x116   : > { %s898_s5 = sshll.u32 %s891_s27, 4  ;;  %s9709_s5 = int_to_ptr.vmem [resolvable:$true] %s898_s5 }
 0x119   : > { %s9705_s8 = scalar_lea.hbm %s10945_s10, %s10944_s2  ;;  %s8759_s13 = scalar_lea.hbm %s10945_s10, 24576 }
 0x11a   : > { %s8754_s23 = scalar_lea.hbm %s9705_s8, 4096  ;;  %p8760_p0 = scmp.lt.u32.totalorder %s9705_s8, %s10945_s10 }
 0x11b   : > { %p8755_p10 = scmp.ne.s32.totalorder %s9705_s8, %s8754_s23  ;;  %p8761_p1 = scmp.lt.u32.totalorder %s8759_s13, %s8754_s23 }
 0x11c   : > { %p8763_p8 = scmp.lt.u32.totalorder %s8754_s23, %s9705_s8 }
 0x11d   : > { %p8757_p11 = pnand %p8755_p10, %p9502_p13  ;;  %p8762_p7 = por %p8761_p1, %p8760_p0 }
 0x11f   : > { %p8758_p12 = pneg %p8757_p11  ;;  %p8764_p2 = por %p8763_p8, %p8762_p7 }
 0x121   : > { %p8765_p5 = pnand %p8764_p2, %p8758_p12 }
 0x123   : > { %8768 = shalt.err (!%p8765_p5)
}
 0x124   : > { %s8769_s2 = scalar_lea.vmem %s9709_s5, 4096  ;;  %s9232_s7 = smov [#allocation15]  }
 0x125   : > { %p8770_p4 = scmp.ne.s32.totalorder %s9709_s5, %s8769_s2  ;;  %s8774_s25 = sshll.u32 %s9232_s7, 4  ;;  %s8775_s25 = int_to_ptr.vmem [resolvable:$false] %s8774_s25 }
 0x126   : > { %s8776_s22 = scalar_lea.vmem %s8775_s25, 8192  ;;  %p8777_p10 = scmp.lt.s32.totalorder %s9709_s5, %s8775_s25 }
 0x127   : > { %p8772_p9 = pnand %p8770_p4, %p9502_p13  ;;  %p8778_p11 = scmp.lt.s32.totalorder %s8776_s22, %s8769_s2 }
 0x129   : > { %p8773_p3 = pneg %p8772_p9  ;;  %p8779_p0 = por %p8778_p11, %p8777_p10 }
 0x12b   : > { %p8780_p1 = pnand %p8779_p0, %p8773_p3 }
 0x12d   : > { %8783 = shalt.err (!%p8780_p1)
}
 0x12e   : > { %s10947_s27 = smov 4   ;;  %s10948_s23 = smov 64  }
 0x12f   : > { %7997 = dma.hbm_to_vmem [thread:$0]  (!%p10943_p6), %s9705_s8, 4096, %s9709_s5, %s9496_s18, %s10948_s23, %s10948_s23, %s10947_s27  }
 0x130   : > { %s10949_s11 = sld [smem:[#allocation59_spill]]  ;;  %s911_s6 = scalar_lea.vmem [#allocation16], %s9481_s0 }
 0x131   : > { %s918_s4 = sshll.u32 %s911_s6, 4  ;;  %s919_s4 = int_to_ptr.vmem [resolvable:$true] %s918_s4 }
 0x136   : > { %s9740_s13 = scalar_lea.hbm %s10949_s11, %s9536_s21  ;;  %s8789_s8 = scalar_lea.hbm %s10949_s11, 96 }
 0x137   : > { %s8784_s2 = scalar_lea.hbm %s9740_s13, 16  ;;  %p8790_p2 = scmp.lt.u32.totalorder %s9740_s13, %s10949_s11 }
 0x138   : > { %p8785_p12 = scmp.ne.s32.totalorder %s9740_s13, %s8784_s2  ;;  %p8791_p5 = scmp.lt.u32.totalorder %s8789_s8, %s8784_s2 }
 0x139   : > { %p8793_p9 = scmp.lt.u32.totalorder %s8784_s2, %s9740_s13 }
 0x13a   : > { %p8787_p7 = pnand %p8785_p12, %p9502_p13  ;;  %p8792_p4 = por %p8791_p5, %p8790_p2 }
 0x13c   : > { %p8788_p8 = pneg %p8787_p7  ;;  %p8794_p3 = por %p8793_p9, %p8792_p4 }
 0x13e   : > { %p8795_p10 = pnand %p8794_p3, %p8788_p8 }
 0x140   : > { %8798 = shalt.err (!%p8795_p10)
}
 0x141   : > { %s8799_s28 = scalar_lea.vmem %s919_s4, 16  ;;  %s9233_s26 = smov [#allocation16]  }
 0x142   : > { %p8800_p11 = scmp.ne.s32.totalorder %s919_s4, %s8799_s28  ;;  %s8804_s6 = sshll.u32 %s9233_s26, 4  ;;  %s8805_s6 = int_to_ptr.vmem [resolvable:$false] %s8804_s6 }
 0x143   : > { %s8806_s7 = scalar_lea.vmem %s8805_s6, 32  ;;  %p8807_p12 = scmp.lt.s32.totalorder %s919_s4, %s8805_s6 }
 0x144   : > { %p8802_p0 = pnand %p8800_p11, %p9502_p13  ;;  %p8808_p7 = scmp.lt.s32.totalorder %s8806_s7, %s8799_s28 }
 0x146   : > { %p8803_p1 = pneg %p8802_p0  ;;  %p8809_p6 = por %p8808_p7, %p8807_p12 }
 0x148   : > { %p8810_p2 = pnand %p8809_p6, %p8803_p1 }
 0x14a   : > { %8813 = shalt.err (!%p8810_p2)
}
 0x14b   : > { %p10950_p5 = scmp.ne.s32.totalorder %s10928_s3, 0  ;;  %s9234_s2 = smov [#allocation6]  }
 0x14c   : > { %s657_s25 = sshll.u32 %s9234_s2, 4  ;;  %s9235_s8 = smov [#allocation20]   ;;  %s658_s25 = int_to_ptr.vmem [resolvable:$true] %s657_s25 }
 0x14d   : > { %8000 = dma.hbm_to_vmem [thread:$0]  (!%p10950_p5), %s9740_s13, 16, %s919_s4, %s9496_s18  }
 0x14e   : > { %s684_s5 = sshll.u32 %s9235_s8, 4  ;;  %s10951_s9 = sld [smem:[#allocation49_spill]]  ;;  %s685_s5 = int_to_ptr.vmem [resolvable:$true] %s684_s5 }
 0x14f   : > { %p10952_p8 = scmp.ne.s32.totalorder %s10926_s17, 0 }
 0x154   : > { %s8814_s10 = scalar_lea.hbm %s10951_s9, 256 }
 0x155   : > { %p8815_p6 = scmp.ne.s32.totalorder %s10951_s9, %s8814_s10  ;;  %p8821_p3 = scmp.lt.u32.totalorder %s8814_s10, %s10951_s9 }
 0x157   : > { %p8817_p4 = pnand %p8815_p6, %p10952_p8 }
 0x159   : > { %p8818_p9 = pneg %p8817_p4 }
 0x15b   : > { %p8823_p10 = pnand %p8821_p3, %p8818_p9 }
 0x15d   : > { %8826 = shalt.err (!%p8823_p10)
}
 0x15e   : > { %s8827_s13 = scalar_lea.vmem %s658_s25, 256  ;;  %p8835_p12 = scmp.lt.s32.totalorder %s658_s25, %s658_s25 }
 0x15f   : > { %p8828_p11 = scmp.ne.s32.totalorder %s658_s25, %s8827_s13  ;;  %p8836_p7 = scmp.lt.s32.totalorder %s8827_s13, %s8827_s13 }
 0x161   : > { %p8830_p0 = pnand %p8828_p11, %p10952_p8  ;;  %p8837_p2 = por %p8836_p7, %p8835_p12 }
 0x163   : > { %p8831_p1 = pneg %p8830_p0 }
 0x165   : > { %p8838_p5 = pnand %p8837_p2, %p8831_p1 }
 0x167   : > { %8841 = shalt.err (!%p8838_p5)
}
 0x168   : > { %p10953_p6 = scmp.ne.s32.totalorder %s10922_s30, 0  ;;  %s10954_s4 = smov 8  }
 0x169   : > { %s10955_s2 = smov 128   ;;  %s8842_s26 = scalar_lea.hbm %s10831_s15, 32 }
 0x16a   : > { %7954 = dma.hbm_to_vmem [thread:$0]  (!%p10953_p6), %s10951_s9, 256, %s658_s25, [#allocation7], %s10955_s2, %s10955_s2, %s10954_s4  }
 0x16b   : > { %p8843_p4 = scmp.ne.s32.totalorder %s10831_s15, %s8842_s26  ;;  %p8849_p3 = scmp.lt.u32.totalorder %s8842_s26, %s10831_s15 }
 0x16d   : > { %p8845_p5 = pnand %p8843_p4, %p10952_p8 }
 0x16f   : > { %p8846_p9 = pneg %p8845_p5 }
 0x171   : > { %p8851_p10 = pnand %p8849_p3, %p8846_p9 }
 0x173   : > { %8854 = shalt.err (!%p8851_p10)
}
 0x174   : > { %s8855_s11 = scalar_lea.vmem %s685_s5, 32  ;;  %p8863_p12 = scmp.lt.s32.totalorder %s685_s5, %s685_s5 }
 0x175   : > { %p8856_p11 = scmp.ne.s32.totalorder %s685_s5, %s8855_s11  ;;  %p8864_p7 = scmp.lt.s32.totalorder %s8855_s11, %s8855_s11 }
 0x177   : > { %p8858_p0 = pnand %p8856_p11, %p10952_p8  ;;  %p8865_p2 = por %p8864_p7, %p8863_p12 }
 0x179   : > { %p8859_p1 = pneg %p8858_p0 }
 0x17b   : > { %p8866_p13 = pnand %p8865_p2, %p8859_p1 }
 0x17d   : > { %8869 = shalt.err (!%p8866_p13)
}
 0x17e   : > { %7960 = dma.hbm_to_vmem [thread:$0]  (!%p10953_p6), %s10831_s15, 32, %s685_s5, [#allocation21]  }
 0x17f   : > { %s9236_s8 = smov [#allocation23]   ;;  %s9804_s28 = scalar_lea.hbm %s10828_s12, %s9536_s21 }
 0x180   : > { %s714_s22 = sshll.u32 %s9236_s8, 4  ;;  %s8870_s11 = scalar_lea.hbm %s10835_s19, 16  ;;  %s715_s22 = int_to_ptr.vmem [resolvable:$true] %s714_s22 }
 0x181   : > { %p8871_p13 = scmp.ne.s32.totalorder %s10835_s19, %s8870_s11  ;;  %p8877_p9 = scmp.lt.u32.totalorder %s8870_s11, %s10835_s19 }
 0x183   : > { %p8873_p4 = pnand %p8871_p13, %p10952_p8 }
 0x185   : > { %p8874_p5 = pneg %p8873_p4 }
 0x187   : > { %p8879_p3 = pnand %p8877_p9, %p8874_p5 }
 0x189   : > { %8882 = shalt.err (!%p8879_p3)
}
 0x18a   : > { %s8883_s10 = scalar_lea.vmem %s715_s22, 16  ;;  %s8890_s8 = scalar_lea.vmem %s715_s22, 32 }
 0x18b   : > { %p8884_p10 = scmp.ne.s32.totalorder %s715_s22, %s8883_s10  ;;  %p8891_p1 = scmp.lt.s32.totalorder %s715_s22, %s715_s22 }
 0x18c   : > { %p8892_p12 = scmp.lt.s32.totalorder %s8890_s8, %s8883_s10 }
 0x18d   : > { %p8886_p11 = pnand %p8884_p10, %p10952_p8 }
 0x18e   : > { %p8893_p7 = por %p8892_p12, %p8891_p1 }
 0x18f   : > { %p8887_p0 = pneg %p8886_p11 }
 0x191   : > { %p8894_p2 = pnand %p8893_p7, %p8887_p0 }
 0x193   : > { %8897 = shalt.err (!%p8894_p2)
}
 0x194   : > { %7966 = dma.hbm_to_vmem [thread:$0]  (!%p10953_p6), %s10835_s19, 16, %s715_s22, [#allocation24]  }
 0x195   : > { %s928_s26 = scalar_lea.vmem [#allocation17], %s9481_s0  ;;  %s9237_s7 = smov [#allocation19]  }
 0x196   : > { %s935_s6 = sshll.u32 %s928_s26, 4  ;;  %s670_s13 = sshll.u32 %s9237_s7, 4  ;;  %s9825_s6 = int_to_ptr.vmem [resolvable:$true] %s935_s6  ;;  %s671_s13 = int_to_ptr.vmem [resolvable:$true] %s670_s13 }
 0x197   : > { %s8898_s11 = scalar_lea.hbm %s9804_s28, 16  ;;  %p10956_p4 = scmp.ne.s32.totalorder %s10930_s1, 0 }
 0x198   : > { %p8899_p13 = scmp.ne.s32.totalorder %s9804_s28, %s8898_s11  ;;  %s8903_s10 = scalar_lea.hbm %s10828_s12, 96 }
 0x199   : > { %p8904_p3 = scmp.lt.u32.totalorder %s9804_s28, %s10828_s12  ;;  %p8905_p10 = scmp.lt.u32.totalorder %s8903_s10, %s8898_s11 }
 0x19a   : > { %p8901_p5 = pnand %p8899_p13, %p10956_p4  ;;  %p8907_p0 = scmp.lt.u32.totalorder %s8898_s11, %s9804_s28 }
 0x19b   : > { %p8906_p11 = por %p8905_p10, %p8904_p3 }
 0x19c   : > { %p8902_p9 = pneg %p8901_p5 }
 0x19d   : > { %p8908_p1 = por %p8907_p0, %p8906_p11 }
 0x19f   : > { %p8909_p12 = pnand %p8908_p1, %p8902_p9 }
 0x1a1   : > { %8912 = shalt.err (!%p8909_p12)
}
 0x1a2   : > { %s8913_s22 = scalar_lea.vmem %s9825_s6, 16  ;;  %s9238_s24 = smov [#allocation17]  }
 0x1a3   : > { %p8914_p7 = scmp.ne.s32.totalorder %s9825_s6, %s8913_s22  ;;  %s8918_s26 = sshll.u32 %s9238_s24, 4  ;;  %s8919_s26 = int_to_ptr.vmem [resolvable:$false] %s8918_s26 }
 0x1a4   : > { %s8920_s7 = scalar_lea.vmem %s8919_s26, 32  ;;  %p8921_p5 = scmp.lt.s32.totalorder %s9825_s6, %s8919_s26 }
 0x1a5   : > { %p8916_p2 = pnand %p8914_p7, %p10956_p4  ;;  %p8922_p6 = scmp.lt.s32.totalorder %s8920_s7, %s8913_s22 }
 0x1a7   : > { %p8917_p13 = pneg %p8916_p2  ;;  %p8923_p3 = por %p8922_p6, %p8921_p5 }
 0x1a9   : > { %p8924_p10 = pnand %p8923_p3, %p8917_p13 }
 0x1ab   : > { %8927 = shalt.err (!%p8924_p10)
}
 0x1ac   : > { %p10957_p9 = scmp.ne.s32.totalorder %s10928_s3, 0  ;;  %s8928_s25 = scalar_lea.hbm %s10830_s14, 2048 }
 0x1ad   : > { %p8929_p11 = scmp.ne.s32.totalorder %s10830_s14, %s8928_s25  ;;  %p8935_p1 = scmp.lt.u32.totalorder %s8928_s25, %s10830_s14 }
 0x1ae   : > { %8003 = dma.hbm_to_vmem [thread:$0]  (!%p10957_p9), %s9804_s28, 16, %s9825_s6, %s9496_s18  }
 0x1af   : > { %p8931_p6 = pnand %p8929_p11, %p10952_p8 }
 0x1b1   : > { %p8932_p0 = pneg %p8931_p6 }
 0x1b3   : > { %p8937_p12 = pnand %p8935_p1, %p8932_p0 }
 0x1b5   : > { %8940 = shalt.err (!%p8937_p12)
}
 0x1b6   : > { %s8941_s24 = scalar_lea.vmem %s671_s13, 2048  ;;  %p8949_p5 = scmp.lt.s32.totalorder %s671_s13, %s671_s13 }
 0x1b7   : > { %p8942_p7 = scmp.ne.s32.totalorder %s671_s13, %s8941_s24  ;;  %p8950_p3 = scmp.lt.s32.totalorder %s8941_s24, %s8941_s24 }
 0x1b9   : > { %p8944_p2 = pnand %p8942_p7, %p10952_p8  ;;  %p8951_p10 = por %p8950_p3, %p8949_p5 }
 0x1bb   : > { %p8945_p13 = pneg %p8944_p2 }
 0x1bd   : > { %p8952_p9 = pnand %p8951_p10, %p8945_p13 }
 0x1bf   : > { %8955 = shalt.err (!%p8952_p9)
}
 0x1c0   : > { %p10958_p11 = scmp.ne.s32.totalorder %s10922_s30, 0  ;;  %s9239_s26 = smov [#allocation22]  }
 0x1c1   : > { %s694_s7 = sshll.u32 %s9239_s26, 4  ;;  %s9240_s11 = smov [#allocation25]   ;;  %s695_s7 = int_to_ptr.vmem [resolvable:$true] %s694_s7 }
 0x1c2   : > { %7957 = dma.hbm_to_vmem [thread:$0]  (!%p10958_p11), %s10830_s14, 2048, %s671_s13, [#allocation7], %s10955_s2, %s10955_s2, %s10954_s4  }
 0x1c3   : > { %s725_s5 = sshll.u32 %s9240_s11, 4  ;;  %s8956_s8 = scalar_lea.hbm %s10832_s16, 2048  ;;  %s726_s5 = int_to_ptr.vmem [resolvable:$true] %s725_s5 }
 0x1c4   : > { %p8957_p9 = scmp.ne.s32.totalorder %s10832_s16, %s8956_s8  ;;  %p8963_p1 = scmp.lt.u32.totalorder %s8956_s8, %s10832_s16 }
 0x1c6   : > { %p8959_p6 = pnand %p8957_p9, %p10952_p8 }
 0x1c8   : > { %p8960_p0 = pneg %p8959_p6 }
 0x1ca   : > { %p8965_p12 = pnand %p8963_p1, %p8960_p0 }
 0x1cc   : > { %8968 = shalt.err (!%p8965_p12)
}
 0x1cd   : > { %s8969_s4 = scalar_lea.vmem %s695_s7, 2048  ;;  %p8977_p5 = scmp.lt.s32.totalorder %s695_s7, %s695_s7 }
 0x1ce   : > { %p8970_p7 = scmp.ne.s32.totalorder %s695_s7, %s8969_s4  ;;  %p8978_p3 = scmp.lt.s32.totalorder %s8969_s4, %s8969_s4 }
 0x1d0   : > { %p8972_p2 = pnand %p8970_p7, %p10952_p8  ;;  %p8979_p10 = por %p8978_p3, %p8977_p5 }
 0x1d2   : > { %p8973_p13 = pneg %p8972_p2 }
 0x1d4   : > { %p8980_p4 = pnand %p8979_p10, %p8973_p13 }
 0x1d6   : > { %8983 = shalt.err (!%p8980_p4)
}
 0x1d7   : > { %7963 = dma.hbm_to_vmem [thread:$0]  (!%p10958_p11), %s10832_s16, 2048, %s695_s7, [#allocation21], %s10948_s23, %s10948_s23, %s10947_s27  }
 0x1d8   : > { %s8984_s11 = scalar_lea.hbm %s10836_s20, 16 }
 0x1d9   : > { %p8985_p9 = scmp.ne.s32.totalorder %s10836_s20, %s8984_s11  ;;  %p8991_p0 = scmp.lt.u32.totalorder %s8984_s11, %s10836_s20 }
 0x1db   : > { %p8987_p4 = pnand %p8985_p9, %p10952_p8 }
 0x1dd   : > { %p8988_p6 = pneg %p8987_p4 }
 0x1df   : > { %p8993_p1 = pnand %p8991_p0, %p8988_p6 }
 0x1e1   : > { %8996 = shalt.err (!%p8993_p1)
}
 0x1e2   : > { %s8997_s22 = scalar_lea.vmem %s726_s5, 16  ;;  %s9004_s27 = scalar_lea.vmem %s726_s5, 32 }
 0x1e3   : > { %p8998_p12 = scmp.ne.s32.totalorder %s726_s5, %s8997_s22  ;;  %p9005_p13 = scmp.lt.s32.totalorder %s726_s5, %s726_s5 }
 0x1e4   : > { %p9006_p5 = scmp.lt.s32.totalorder %s9004_s27, %s8997_s22 }
 0x1e5   : > { %p9000_p7 = pnand %p8998_p12, %p10952_p8 }
 0x1e6   : > { %p9007_p3 = por %p9006_p5, %p9005_p13 }
 0x1e7   : > { %p9001_p2 = pneg %p9000_p7 }
 0x1e9   : > { %p9008_p10 = pnand %p9007_p3, %p9001_p2 }
 0x1eb   : > { %9011 = shalt.err (!%p9008_p10)
}
 0x1ec   : > { %7969 = dma.hbm_to_vmem [thread:$0]  (!%p10958_p11), %s10836_s20, 16, %s726_s5, [#allocation24]  }
 0x1ed   : > { %s9241_s24 = smov [#allocation26]   ;;  %s10959_s13 = sld [smem:[#allocation60_spill]] }
 0x1ee   : > { %s736_s28 = sshll.u32 %s9241_s24, 4  ;;  %s10960_s25 = sld [smem:[#allocation63_spill]]  ;;  %s737_s28 = int_to_ptr.vmem [resolvable:$true] %s736_s28 }
 0x1f3   : > { %s9913_s6 = scalar_lea.hbm %s10959_s13, %s9536_s21 }
 0x1f4   : > { %s9012_s10 = scalar_lea.hbm %s10960_s25, 16 }
 0x1f5   : > { %p9013_p9 = scmp.ne.s32.totalorder %s10960_s25, %s9012_s10  ;;  %p9019_p0 = scmp.lt.u32.totalorder %s9012_s10, %s10960_s25 }
 0x1f7   : > { %p9015_p4 = pnand %p9013_p9, %p10952_p8 }
 0x1f9   : > { %p9016_p6 = pneg %p9015_p4 }
 0x1fb   : > { %p9021_p1 = pnand %p9019_p0, %p9016_p6 }
 0x1fd   : > { %9024 = shalt.err (!%p9021_p1)
}
 0x1fe   : > { %s9025_s27 = scalar_lea.vmem %s737_s28, 16  ;;  %s9032_s21 = scalar_lea.vmem %s737_s28, 32 }
 0x1ff   : > { %p9026_p12 = scmp.ne.s32.totalorder %s737_s28, %s9025_s27  ;;  %p9033_p13 = scmp.lt.s32.totalorder %s737_s28, %s737_s28 }
 0x200   : > { %p9034_p5 = scmp.lt.s32.totalorder %s9032_s21, %s9025_s27 }
 0x201   : > { %p9028_p7 = pnand %p9026_p12, %p10952_p8 }
 0x202   : > { %p9035_p3 = por %p9034_p5, %p9033_p13 }
 0x203   : > { %p9029_p2 = pneg %p9028_p7 }
 0x205   : > { %p9036_p10 = pnand %p9035_p3, %p9029_p2 }
 0x207   : > { %9039 = shalt.err (!%p9036_p10)
}
 0x208   : > { %7972 = dma.hbm_to_vmem [thread:$0]  (!%p10958_p11), %s10960_s25, 16, %s737_s28, [#allocation27]  }
 0x209   : > { %s945_s17 = scalar_lea.vmem [#allocation18], %s9481_s0  ;;  %s9040_s4 = scalar_lea.hbm %s9913_s6, 16 }
 0x20a   : > { %s952_s24 = sshll.u32 %s945_s17, 4  ;;  %p9041_p8 = scmp.ne.s32.totalorder %s9913_s6, %s9040_s4  ;;  %s953_s24 = int_to_ptr.vmem [resolvable:$true] %s952_s24 }
 0x20b   : > { %p10961_p9 = scmp.ne.s32.totalorder %s10930_s1, 0  ;;  %s9045_s26 = scalar_lea.hbm %s10959_s13, 96 }
 0x20c   : > { %p9046_p0 = scmp.lt.u32.totalorder %s9913_s6, %s10959_s13  ;;  %p9047_p1 = scmp.lt.u32.totalorder %s9045_s26, %s9040_s4 }
 0x20d   : > { %p9043_p4 = pnand %p9041_p8, %p10961_p9  ;;  %p9049_p7 = scmp.lt.u32.totalorder %s9040_s4, %s9913_s6 }
 0x20e   : > { %p9048_p12 = por %p9047_p1, %p9046_p0 }
 0x20f   : > { %p9044_p6 = pneg %p9043_p4 }
 0x210   : > { %p9050_p11 = por %p9049_p7, %p9048_p12 }
 0x212   : > { %p9051_p2 = pnand %p9050_p11, %p9044_p6 }
 0x214   : > { %9054 = shalt.err (!%p9051_p2)
}
 0x215   : > { %s9055_s0 = scalar_lea.vmem %s953_s24, 16  ;;  %s9242_s28 = smov [#allocation18]  }
 0x216   : > { %p9056_p13 = scmp.ne.s32.totalorder %s953_s24, %s9055_s0  ;;  %s9060_s8 = sshll.u32 %s9242_s28, 4  ;;  %s9061_s8 = int_to_ptr.vmem [resolvable:$false] %s9060_s8 }
 0x217   : > { %s9062_s9 = scalar_lea.vmem %s9061_s8, 32  ;;  %p9063_p10 = scmp.lt.s32.totalorder %s953_s24, %s9061_s8 }
 0x218   : > { %p9058_p5 = pnand %p9056_p13, %p10961_p9  ;;  %p9064_p8 = scmp.lt.s32.totalorder %s9062_s9, %s9055_s0 }
 0x21a   : > { %p9059_p3 = pneg %p9058_p5  ;;  %p9065_p4 = por %p9064_p8, %p9063_p10 }
 0x21c   : > { %p9066_p0 = pnand %p9065_p4, %p9059_p3 }
 0x21e   : > { %9069 = shalt.err (!%p9066_p0)
}
 0x21f   : > { %p10962_p1 = scmp.ne.s32.totalorder %s10928_s3, 0  ;;  %s10963_s5 = sld [smem:[#allocation45_spill]] }
 0x221   : > { %8006 = dma.hbm_to_vmem [thread:$0]  (!%p10962_p1), %s9913_s6, 16, %s953_s24, %s9496_s18  }
 0x225   : > { %p10964_p6 = scmp.ne.s32.totalorder %s10963_s5, 0 }
 0x226   : > { %s10965_s1 = sld [smem:[#allocation43_spill]] (!%p10964_p6) }
 0x227   : > { %961 = sbr.rel (%p10964_p6) target bundleno = 10431 (0x28bf), region = 108 }
 0x22c   : > { %p10966_p9 = scmp.eq.s32.totalorder (!%p10964_p6), %s10965_s1, 0 }
 0x22e   : > { %9165 = dma.done.wait (%p10966_p9), [#allocation4], 256   ;;  %p10967_p12 = pmov %p10966_p9 }
 0x22f   : > { %p10968_p7 = pmov %p10966_p9 }
 0x230   : > { %9167 = vsyncadd (%p10967_p12), [#allocation4], 4294967040 }
 0x231   : > { %9169 = dma.done.wait (%p10968_p7), [#allocation7], 256   ;;  %p10969_p11 = pmov %p10968_p7 }
 0x232   : > { %s10970_s3 = sld [smem:[#allocation41_spill]]  ;;  %s10971_s22 = sld [smem:[#allocation44_spill]] }
 0x233   : > { %9171 = vsyncadd (%p10969_p11), [#allocation7], 4294967040  ;;  %s971_s27 = sand.u32 1, %s10965_s1  }
 0x234   : > { %s972_s21 = scalar_lea.sflag [#allocation4], %s971_s27 }
 0x238   : > { %s9964_s18 = sand.u32 1, %s10970_s3   ;;  %p10972_p2 = scmp.ne.s32.totalorder %s10971_s22, 0 }
 0x239   : > { %s7880_s6 = smul.u32 192, %s9964_s18 }
 0x23b   : > { %s9967_s23 = scalar_lea.vmem [#allocation8], %s7880_s6 }
 0x23c   : > { %9173 = dma.done.wait (%p10972_p2), %s972_s21, 12448  }
 0x23d   : > { %9175 = vsyncadd (%p10972_p2), %s972_s21, 4294954848  ;;  %s6937_s7 = sshll.u32 %s9964_s18, 6  ;;  %s6938_s17 = sshll.u32 %s9964_s18, 8 }
 0x23e   : > { %s6939_s24 = sshll.u32 %s9964_s18, 2  ;;  %s9976_s4 = scalar_lea.vmem [#allocation9], %s6937_s7 }
 0x23f   : > { %s992_s2 = scalar_lea.vmem [#allocation10], %s9964_s18  ;;  %s1000_s30 = scalar_lea.vmem [#allocation11], %s9964_s18 }
 0x240   : > { %s1008_s26 = scalar_lea.vmem [#allocation12], %s9964_s18  ;;  %s9981_s11 = scalar_lea.vmem [#allocation13], %s6938_s17 }
 0x241   : > { %s9983_s10 = scalar_lea.vmem [#allocation14], %s6939_s24  ;;  %s9985_s0 = scalar_lea.vmem [#allocation15], %s6938_s17 }
 0x242   : > { %s1043_s28 = scalar_lea.vmem [#allocation16], %s9964_s18  ;;  %s1051_s8 = scalar_lea.vmem [#allocation17], %s9964_s18 }
 0x243   : > { %s1059_s9 = scalar_lea.vmem [#allocation18], %s9964_s18  ;;  %p10973_p13 = pmov %p10968_p7 }
 0x244   : > { %p10974_p5 = pmov %p10968_p7 }
 0x245   : > { %9177 = dma.done.wait (%p10973_p13), [#allocation7], 2048  }
 0x246   : > { %9179 = vsyncadd (%p10974_p5), [#allocation7], 4294965248  ;;  %p10975_p3 = pmov %p10974_p5 }
 0x248   : > { %9181 = dma.done.wait (%p10975_p3), [#allocation21], 2080   ;;  %p10976_p10 = pmov %p10975_p3 }
 0x249   : > { %p10977_p8 = pmov %p10975_p3 }
 0x24a   : > { %9183 = vsyncadd (%p10976_p10), [#allocation21], 4294965216 }
 0x24b   : > { %9185 = dma.done.wait (%p10977_p8), [#allocation24], 32   ;;  %p10978_p4 = pmov %p10975_p3 }
 0x24c   : > { %p10979_p0 = pmov %p10975_p3 }
 0x24d   : > { %9187 = vsyncadd (%p10978_p4), [#allocation24], 4294967264 }
 0x24e   : > { %9189 = dma.done.wait (%p10979_p0), [#allocation27], 16   ;;  %p10980_p1 = pmov %p10979_p0 }
 0x24f   : > { %p1191_p6 = scmp.lt.s32.totalorder %s10965_s1, 5  ;;  %s10981_s6 = sld [smem:[#allocation51_spill]] }
 0x250   : > { %9191 = vsyncadd (%p10980_p1), [#allocation27], 4294967280  ;;  %p10982_p9 = scmp.ne.s32.totalorder %s10965_s1, 0 }
 0x251   : > { %s1192_s5 = scalar_select %p1191_p6, %s10965_s1, 5 }
 0x252   : > { %1199 = sbr.rel (%p10982_p9) target bundleno = 601 (0x259), region = 188  ;;  %v1200_v0 = vld [vmem:[#allocation3] sm:$0xff] (!%p10982_p9)  ;;  %v1201_v1 = vld [vmem:[#allocation3 + $0x8] sm:$0xff] (!%p10982_p9) }
 0x253   : > { %s7881_s3 = smul.u32 3, %s1192_s5  ;;  %1202 = vst [vmem:[#allocation2] sm:$0xff] (!%p10982_p9), %v1200_v0  ;;  %1203 = vst [vmem:[#allocation2 + $0x8] sm:$0xff] (!%p10982_p9), %v1201_v1 }
 0x255   : > { %s10011_s21 = scalar_lea.vmem %s10981_s6, %s7881_s3 }
 0x259 PF: > { %v8175_v2 = vld [vmem:[%s9967_s23 + $0x4] ss:$12 sps:$4 sm:$0xff]   ;;  %v8177_v3 = vld [vmem:[%s9967_s23] ss:$12 sps:$4 sm:$0xff]   ;;  %v9243_v4 = vmov 0   ;;  %v1204_v22 = vlaneseq  ;;  %vm1532_vm0 = vcmask 130048  }
 0x25a   : > { %1478 = vmatprep.mubr.bf16.mxu0 %v9243_v4  ;;  %1446 = vmatprep.subr.bf16.mxu0 %v8175_v2  ;;  %v8178_v5 = vld [vmem:[%s9967_s23 + $0x1c] ss:$12 sps:$4 sm:$0xff]   ;;  %v8180_v6 = vld [vmem:[%s9967_s23 + $0x18] ss:$12 sps:$4 sm:$0xff]   ;;  %v8181_v7 = vld [vmem:[%s9967_s23 + $0x34] ss:$12 sps:$4 sm:$0xff]  }
 0x25b   : > { %1447 = vmatpush1.bf16.msra.mxu0 %v8177_v3  ;;  %v8183_v8 = vld [vmem:[%s9967_s23 + $0x30] ss:$12 sps:$4 sm:$0xff]   ;;  %v8184_v9 = vld [vmem:[%s9967_s23 + $0x4c] ss:$12 sps:$4 sm:$0xff]   ;;  %v8186_v10 = vld [vmem:[%s9967_s23 + $0x48] ss:$12 sps:$4 sm:$0xff]  }
 0x25c   : > { %1448 = vmatprep.subr.bf16.mxu0 %v8178_v5  ;;  %v8187_v11 = vld [vmem:[%s9967_s23 + $0x64] ss:$12 sps:$4 sm:$0xff]   ;;  %v8189_v12 = vld [vmem:[%s9967_s23 + $0x60] ss:$12 sps:$4 sm:$0xff]   ;;  %v8190_v13 = vld [vmem:[%s9967_s23 + $0x7c] ss:$12 sps:$4 sm:$0xff]  }
 0x25d   : > { %v8192_v14 = vld [vmem:[%s9967_s23 + $0x78] ss:$12 sps:$4 sm:$0xff]   ;;  %v8193_v15 = vld [vmem:[%s9967_s23 + $0x94] ss:$12 sps:$4 sm:$0xff]   ;;  %v8195_v16 = vld [vmem:[%s9967_s23 + $0x90] ss:$12 sps:$4 sm:$0xff]  }
 0x25e   : > { %v8196_v17 = vld [vmem:[%s9967_s23 + $0xac] ss:$12 sps:$4 sm:$0xff]   ;;  %v8198_v18 = vld [vmem:[%s9967_s23 + $0xa8] ss:$12 sps:$4 sm:$0xff]   ;;  %v10036_v23 = vshrl.u32 %v1204_v22, 7  ;;  %vm10059_vm1 = vmpackc.low %vm1532_vm0, %vm1532_vm0  ;;  %s9244_s1 = smov 112  }
 0x25f   : > { %1449 = vmatpush1.bf16.msra.mxu0 %v8180_v6  ;;  %v1249_v19 = vld [vmem:[#allocation2] sm:$0xff]  ;;  %v1250_v20 = vld [vmem:[#allocation2 + $0x8] sm:$0xff]  ;;  %v9245_v43 = vmov 0.0   ;;  %vm9246_vm2 = vmmov 0   ;;  %v8200_v44 = vld [vmem:[%s9967_s23 + $0x20] ss:$12 sps:$4 sm:$0xff]  }
 0x260   : > { %1450 = vmatprep.subr.bf16.mxu0 %v8181_v7  ;;  %v10032_v21 = vpack.c.bf16 %v1250_v20, %v1249_v19  ;;  %v10039_v24 = vsub.s32 0, %v10036_v23  ;;  %v10042_v25 = vld [vmem:[%s10011_s21] sm:$0x7]  ;;  %v10045_v26 = vsub.s32 1, %v10036_v23  ;;  %v8199_v42 = vld [vmem:[%s9967_s23 + $0x8] ss:$12 sps:$4 sm:$0xff]   ;;  %7422 = vmatprep.subr.bf16.mxu1 %v9245_v43 }
 0x261   : > { %7438 = vmatprep.mubr.msk.bf16.mxu1 %vm9246_vm2, %v9245_v43  ;;  %7423 = vmatpush3.bf16.msra.mxu1 %v8199_v42  ;;  %v8201_v45 = vld [vmem:[%s9967_s23 + $0x38] ss:$12 sps:$4 sm:$0xff]   ;;  %v8202_v46 = vld [vmem:[%s9967_s23 + $0x50] ss:$12 sps:$4 sm:$0xff]   ;;  %v8203_v47 = vld [vmem:[%s9967_s23 + $0x68] ss:$12 sps:$4 sm:$0xff]  }
 0x262   : > { %v1306_v27 = vrot.slane %v10042_v25, %v10039_v24  ;;  %v1310_v29 = vrot.slane %v10042_v25, %v10045_v26  ;;  %7424 = vmatprep.subr.bf16.mxu1 %v9245_v43  ;;  %v8204_v49 = vld [vmem:[%s9967_s23 + $0x80] ss:$12 sps:$4 sm:$0xff]   ;;  %v8205_v54 = vld [vmem:[%s9967_s23 + $0x98] ss:$12 sps:$4 sm:$0xff]   ;;  %v8206_v55 = vld [vmem:[%s9967_s23 + $0xb0] ss:$12 sps:$4 sm:$0xff]  }
 0x263   : > { %1451 = vmatpush1.bf16.msra.mxu0 %v8183_v8  ;;  %v1206_v57 = vadd.s32 8, %v10036_v23  ;;  %v1232_v58 = vand.u32 127, %v1204_v22  ;;  %v1211_v61 = vand.u32 1, %v10036_v23  ;;  %v9247_v62 = vmov -1e+30   ;;  %s9248_s23 = smov 96  }
 0x264   : > { %1452 = vmatprep.subr.bf16.mxu0 %v8184_v9  ;;  %s9249_s7 = smov 80   ;;  %s9250_s17 = smov 64  }
 0x265   : > { %7425 = vmatpush3.bf16.msra.mxu1 %v8200_v44  ;;  %v1218_v59 = vand.u32 1, %v1206_v57  ;;  %v1237_v60 = vand.u32 1, %v1232_v58  ;;  %v8208_v58 = vld [vmem:[%s9976_s4] sm:$0xff]   ;;  %s9251_s24 = smov 48   ;;  %s9252_s5 = smov 32  }
 0x266   : > { %7426 = vmatprep.subr.bf16.mxu1 %v9245_v43  ;;  %s9253_s3 = smov 16  }
 0x267   : > { %1453 = vmatpush1.bf16.msra.mxu0 %v8186_v10  ;;  %vm1246_vm3 = vcmp.eq.s32.totalorder %v1218_v59, %v1237_v60  ;;  %vm1245_vm4 = vcmp.eq.s32.totalorder %v1211_v61, %v1237_v60 }
 0x268   : > { %1454 = vmatprep.subr.bf16.mxu0 %v8187_v11  ;;  %v10108_v63 = vsel %vm1246_vm3, 0.0, %v9247_v62  ;;  %v10110_v0 = vsel %vm1245_vm4, 0.0, %v9247_v62 }
 0x269   : > { %7427 = vmatpush3.bf16.msra.mxu1 %v8201_v45 }
 0x26a   : > { %7428 = vmatprep.subr.bf16.mxu1 %v9245_v43 }
 0x26b   : > { %1455 = vmatpush1.bf16.msra.mxu0 %v8189_v12 }
 0x26c   : > { %1456 = vmatprep.subr.bf16.mxu0 %v8190_v13 }
 0x26d   : > { %7429 = vmatpush3.bf16.msra.mxu1 %v8202_v46 }
 0x26e   : > { %7430 = vmatprep.subr.bf16.mxu1 %v9245_v43 }
 0x26f   : > { %1457 = vmatpush1.bf16.msra.mxu0 %v8192_v14 }
 0x270   : > { %1458 = vmatprep.subr.bf16.mxu0 %v8193_v15 }
 0x271   : > { %7431 = vmatpush3.bf16.msra.mxu1 %v8203_v47 }
 0x272   : > { %7432 = vmatprep.subr.bf16.mxu1 %v9245_v43 }
 0x273   : > { %1459 = vmatpush1.bf16.msra.mxu0 %v8195_v16 }
 0x274   : > { %1460 = vmatprep.subr.bf16.mxu0 %v8196_v17 }
 0x275   : > { %7433 = vmatpush3.bf16.msra.mxu1 %v8204_v49 }
 0x276   : > { %7434 = vmatprep.subr.bf16.mxu1 %v9245_v43 }
 0x277   : > { %1461 = vmatpush1.bf16.msra.mxu0 %v8198_v18 }
 0x279   : > { %7435 = vmatpush3.bf16.msra.mxu1 %v8205_v54 }
 0x27a   : > { %1479 = vmatmul.mubr.bf16.vlgmr.msra.gmra.mrb[0].mxu0 %v10032_v21  ;;  %7436 = vmatprep.subr.bf16.mxu1 %v9245_v43 }
 0x27d   : > { %7437 = vmatpush3.bf16.msra.mxu1 %v8206_v55 }
 0x280   : > { %7439 = vmatmul.mubr.bf16.vlgmr.msra.gmra.mrb[0].mxu1 %v10032_v21 }
 0x34d   : > { %v1480_v28 = vpop.f32.mrb[0].mxu0 }
 0x34e   : > { %v1481_v30 = vadd.f32 %v1480_v28, %v1306_v27  ;;  %v1482_v31 = vpop.f32.mrb[1].mxu0 }
 0x34f   : > { %v1484_v32 = vpop.f32.mrb[2].mxu0  ;;  %v1483_v36 = vadd.f32 %v1482_v31, %v1310_v29 }
 0x350   : > { %v10051_v33 = vmul.f32 0.25, %v1481_v30  ;;  %v1485_v34 = vadd.f32 %v1484_v32, %v1306_v27  ;;  %v1486_v35 = vpop.f32.mrb[3].mxu0  ;;  %v1313_v30 = vsub.s32 2, %v10036_v23 }
 0x351   : > { %v1487_v37 = vadd.f32 %v1486_v35, %v1310_v29 }
 0x352   : > { %v10053_v38 = vmul.f32 0.25, %v1485_v34  ;;  %7446 = vmatprep.mubr.msk.f32.mxu0 %vm1532_vm0, %v10051_v33  ;;  %v1314_v31 = vrot.slane %v10042_v25, %v1313_v30 }
 0x353   : > { %v10063_v40 = vpack.i.bf16 %v1487_v37, %v1483_v36  ;;  %v7734_v41 = vpack.c.bf16 %v1487_v37, %v1483_v36  ;;  %v1523_v20 = vpop.f32.mrb[0].mxu1 }
 0x354   : > { %1726 = vrot.lane.b32.xlu1 %v10053_v38, %s9244_s1  ;;  %v7440_v21 = vpop.f32.mrb[1].mxu1  ;;  %v1524_v32 = vadd.f32 %v1523_v20, %v1314_v31 }
 0x355   : > { %8106 = vrot.lane.b32.xlu0 %v10063_v40, %s9244_s1  ;;  %7736 = vmatprep.subr.msk.bf16.mxu0 %vm10059_vm1, %v7734_v41  ;;  %v1526_v34 = vpop.f32.mrb[2].mxu1 }
 0x356   : > { %7739 = vmatpush3.bf16.xpose.msk.msra.mxu0 %vm10059_vm1, %v7734_v41  ;;  %v1527_v35 = vadd.f32 %v1526_v34, %v1314_v31  ;;  %v7441_v36 = vpop.f32.mrb[3].mxu1 }
 0x358   : > { %v10126_v37 = vpack.i.bf16 %v1527_v35, %v1524_v32  ;;  %v7740_v41 = vpack.c.bf16 %v1527_v35, %v1524_v32 }
 0x359   : > { %1724 = vrot.lane.b32.xlu0 %v10051_v33, %s9244_s1 }
 0x35a   : > { %7741 = vmatprep.subr.bf16.mxu1 %v7740_v41 }
 0x35b   : > { %7743 = vmatpush3.bf16.msra.mxu1 %v7740_v41 }
 0x35d   : > { %7447 = vmatmul.mubr.msk.f32.vlgmr.msra.gmra.mrb[4].mxu0 %vm1532_vm0, %v10053_v38 }
 0x3c6   : > { %v1727_v56 = vpop.permute.xlu1 %1726 }
 0x3c7   : > { %v8107_v48 = vpop.permute.xlu0 %8106 }
 0x3c8   : > { %v8109_v50 = vunpack.i.h.bf16 %v8107_v48  ;;  %v8108_v51 = vunpack.i.l.bf16 %v8107_v48 }
 0x3ca   : > { %v7744_v52 = vpack.c.bf16 %v8109_v50, %v8108_v51 }
 0x3cb   : > { %v1725_v53 = vpop.permute.xlu0 %1724 }
 0x3cc   : > { %7746 = vmatprep.subr.msk.bf16.mxu0 %vm10059_vm1, %v7744_v52  ;;  %7460 = vmatprep.mubr.msk.f32.mxu0 %vm1532_vm0, %v1725_v53 }
 0x3cd   : > { %7749 = vmatpush3.bf16.xpose.msk.msra.mxu0 %vm10059_vm1, %v7744_v52 }
 0x3ce   : > { %7476 = vmatprep.subr.bf16.mxu0 %v9245_v43 }
 0x3d4   : > { %7461 = vmatmul.mubr.msk.f32.vlgmr.msra.gmra.mrb[6].mxu0 %vm1532_vm0, %v1727_v56 }
 0x3d5   : > { %7478 = vmatprep.mubr.msk.bf16.mxu0 %vm9246_vm2, %v9245_v43  ;;  %7477 = vmatpush3.bf16.msra.mxu0 %v8208_v58 }
 0x430   : > { %v7448_v1 = vpop.f32.mrb[4].mxu0 }
 0x431   : > { %v1617_v2 = vadd.f32 %v7448_v1, %v10108_v63  ;;  %v1611_v3 = vpop.f32.mrb[5].mxu0 }
 0x432   : > { %v1612_v5 = vadd.f32 %v1611_v3, %v10110_v0 }
 0x433   : > { %v1623_v6 = vsel %vm1532_vm0, %v1617_v2, -inf }
 0x434   : > { %1624 = vmax.xlane.f32.xlu0 %v1623_v6  ;;  %v1620_v7 = vsel %vm1532_vm0, %v1612_v5, -inf }
 0x435   : > { %1621 = vmax.xlane.f32.xlu1 %v1620_v7 }
 0x4a7   : > { %v7462_v8 = vpop.f32.mrb[6].mxu0 }
 0x4a8   : > { %v1812_v9 = vadd.f32 %v7462_v8, %v10108_v63  ;;  %v1806_v10 = vpop.f32.mrb[7].mxu0 }
 0x4a9   : > { %v1807_v11 = vadd.f32 %v1806_v10, %v10110_v0  ;;  %v8207_v10 = vld [vmem:[%s9976_s4 + $0x8] sm:$0xff]  }
 0x4aa   : > { %v1818_v12 = vsel %vm1532_vm0, %v1812_v9, -inf }
 0x4ab   : > { %1819 = vmax.xlane.f32.xlu1 %v1818_v12  ;;  %v1815_v13 = vsel %vm1532_vm0, %v1807_v11, -inf }
 0x4ac   : > { %1816 = vmax.xlane.f32.xlu0 %v1815_v13 }
 0x4c1   : > { %v1625_v14 = vpop.xlane.xlu0 %1624 }
 0x4c2   : > { %v1627_v15 = vsub.f32 %v1617_v2, %v1625_v14  ;;  %v1622_v16 = vpop.xlane.xlu1 %1621 }
 0x4c3   : > { %v1626_v17 = vsub.f32 %v1612_v5, %v1622_v16 }
 0x4c4   : > { %v1630_v18 = vmul.f32 1.442695, %v1627_v15 }
 0x4c5   : > { %v1628_v19 = vmul.f32 1.442695, %v1626_v17 }
 0x4c6   : > { %8295 = vpow2.f32 %v1630_v18 }
 0x4c7   : > { %8297 = vpow2.f32 %v1628_v19 }
 0x4d0   : > { %v8296_v22 = vpop.eup %8295 }
 0x4d1   : > { %v8298_v27 = vpop.eup %8297  ;;  %v1635_v28 = vsel %vm1532_vm0, %v8296_v22, 0.0 }
 0x4d2   : > { %1636 = vadd.xlane.f32.xlu1 %v1635_v28  ;;  %v1632_v29 = vsel %vm1532_vm0, %v8298_v27, 0.0 }
 0x4d3   : > { %1633 = vadd.xlane.f32.xlu0 %v1632_v29 }
 0x538   : > { %v1820_v42 = vpop.xlane.xlu1 %1819 }
 0x539   : > { %v1822_v44 = vsub.f32 %v1812_v9, %v1820_v42  ;;  %v1817_v45 = vpop.xlane.xlu0 %1816 }
 0x53a   : > { %v1821_v46 = vsub.f32 %v1807_v11, %v1817_v45 }
 0x53b   : > { %v1825_v47 = vmul.f32 1.442695, %v1822_v44 }
 0x53c   : > { %v1823_v48 = vmul.f32 1.442695, %v1821_v46 }
 0x53d   : > { %8299 = vpow2.f32 %v1825_v47 }
 0x53e   : > { %8301 = vpow2.f32 %v1823_v48 }
 0x547   : > { %v8300_v49 = vpop.eup %8299 }
 0x548   : > { %v8302_v50 = vpop.eup %8301  ;;  %v1830_v25 = vsel %vm1532_vm0, %v8300_v49, 0.0 }
 0x549   : > { %1831 = vadd.xlane.f32.xlu1 %v1830_v25  ;;  %v1827_v51 = vsel %vm1532_vm0, %v8302_v50, 0.0 }
 0x54a   : > { %1828 = vadd.xlane.f32.xlu0 %v1827_v51 }
 0x55a   : > { %8116 = vrot.lane.b32.xlu1 %v10063_v40, %s9248_s23 }
 0x55e   : > { %2027 = vrot.lane.b32.xlu1 %v10051_v33, %s9248_s23 }
 0x55f   : > { %v1637_v52 = vpop.xlane.xlu1 %1636 }
 0x560   : > { %8303 = vrcp.f32 %v1637_v52  ;;  %8111 = vrot.lane.b32.xlu0 %v10126_v37, %s9244_s1  ;;  %v1634_v53 = vpop.xlane.xlu0 %1633 }
 0x561   : > { %8305 = vrcp.f32 %v1634_v53 }
 0x564   : > { %2029 = vrot.lane.b32.xlu0 %v10053_v38, %s9248_s23 }
 0x56a   : > { %v8304_v54 = vpop.eup %8303 }
 0x56b   : > { %v8306_v55 = vpop.eup %8305  ;;  %v1641_v57 = vmul.f32 %v8304_v54, %v8296_v22 }
 0x56c   : > { %v1639_v56 = vmul.f32 %v8306_v55, %v8298_v27 }
 0x56e   : > { %7453 = vmatprep.mubr.msk.f32.mxu1 %vm1532_vm0, %v1639_v56 }
 0x56f   : > { %7454 = vmatmul.mubr.msk.f32.vlgmr.msra.gmra.mrb[4].mxu1 %vm1532_vm0, %v1641_v57 }
 0x5d6   : > { %v1832_v59 = vpop.xlane.xlu1 %1831 }
 0x5d7   : > { %8307 = vrcp.f32 %v1832_v59  ;;  %v1829_v60 = vpop.xlane.xlu0 %1828 }
 0x5d8   : > { %8309 = vrcp.f32 %v1829_v60 }
 0x5da   : > { %v8117_v3 = vpop.permute.xlu1 %8116 }
 0x5db   : > { %v8112_v61 = vpop.permute.xlu0 %8111  ;;  %v8119_v7 = vunpack.i.h.bf16 %v8117_v3  ;;  %v8118_v8 = vunpack.i.l.bf16 %v8117_v3 }
 0x5dc   : > { %v8114_v62 = vunpack.i.h.bf16 %v8112_v61  ;;  %v8113_v1 = vunpack.i.l.bf16 %v8112_v61 }
 0x5dd   : > { %v7754_v12 = vpack.c.bf16 %v8119_v7, %v8118_v8 }
 0x5de   : > { %v7750_v2 = vpack.c.bf16 %v8114_v62, %v8113_v1  ;;  %v2028_v19 = vpop.permute.xlu1 %2027 }
 0x5df   : > { %v2030_v20 = vpop.permute.xlu0 %2029 }
 0x5e0   : > { %7751 = vmatprep.subr.bf16.mxu1 %v7750_v2 }
 0x5e1   : > { %v8308_v5 = vpop.eup %8307  ;;  %7753 = vmatpush3.bf16.msra.mxu1 %v7750_v2 }
 0x5e2   : > { %v8310_v6 = vpop.eup %8309  ;;  %7470 = vmatprep.subr.bf16.mxu1 %v9245_v43  ;;  %v1836_v11 = vmul.f32 %v8308_v5, %v8300_v49 }
 0x5e3   : > { %v1834_v9 = vmul.f32 %v8310_v6, %v8302_v50 }
 0x5e5   : > { %7467 = vmatprep.mubr.msk.f32.mxu1 %vm1532_vm0, %v1834_v9 }
 0x5e6   : > { %7468 = vmatmul.mubr.msk.f32.vlgmr.msra.gmra.mrb[6].mxu1 %vm1532_vm0, %v1836_v11 }
 0x5e7   : > { %7471 = vmatpush3.bf16.msra.mxu1 %v8207_v10  ;;  %7472 = vmatprep.mubr.msk.bf16.mxu1 %vm9246_vm2, %v9245_v43 }
 0x5e8   : > { %7756 = vmatprep.subr.msk.bf16.mxu1 %vm10059_vm1, %v7754_v12 }
 0x642   : > { %v7455_v13 = vpop.f32.mrb[4].mxu1 }
 0x643   : > { %v1714_v14 = vpop.f32.mrb[5].mxu1 }
 0x644   : > { %v1723_v15 = vpack.c.bf16 %v7455_v13, %v1714_v14 }
 0x646   : > { %7479 = vmatmul.mubr.msk.bf16.vlgmr.msra.gmra.mrb[8].mxu0 %vm1532_vm0, %v1723_v15 }
 0x6b9   : > { %v7469_v16 = vpop.f32.mrb[6].mxu1 }
 0x6ba   : > { %v1917_v17 = vpop.f32.mrb[7].mxu1 }
 0x6bb   : > { %v1926_v18 = vpack.c.bf16 %v7469_v16, %v1917_v17 }
 0x6bd   : > { %7473 = vmatmul.mubr.msk.bf16.vlgmr.msra.gmra.mrb[8].mxu1 %vm1532_vm0, %v1926_v18 }
 0x6be   : > { %7759 = vmatpush3.bf16.xpose.msk.msra.mxu1 %vm10059_vm1, %v7754_v12  ;;  %7486 = vmatprep.mubr.msk.f32.mxu1 %vm1532_vm0, %v2028_v19  ;;  %v8209_v12 = vld [vmem:[%s9976_s4 + $0x10] sm:$0xff]  }
 0x6bf   : > { %7496 = vmatprep.subr.bf16.mxu1 %v9245_v43 }
 0x6c5   : > { %7487 = vmatmul.mubr.msk.f32.vlgmr.msra.gmra.mrb[12].mxu1 %vm1532_vm0, %v2030_v20 }
 0x6c6   : > { %7498 = vmatprep.mubr.msk.bf16.mxu1 %vm9246_vm2, %v9245_v43  ;;  %7497 = vmatpush3.bf16.msra.mxu1 %v8209_v12 }
 0x719   : > { %v2020_v21 = vpop.f32.mrb[8].mxu0 }
 0x71a   : > { %v7480_v22 = vpop.f32.mrb[9].mxu0 }
 0x71b   : > { %v2023_v27 = vpop.f32.mrb[10].mxu0 }
 0x71c   : > { %v7481_v28 = vpop.f32.mrb[11].mxu0 }
 0x790   : > { %v1970_v29 = vpop.f32.mrb[8].mxu1 }
 0x791   : > { %v10158_v31 = vadd.f32 %v2020_v21, %v1970_v29  ;;  %v7474_v32 = vpop.f32.mrb[9].mxu1 }
 0x792   : > { %v1973_v34 = vpop.f32.mrb[10].mxu1 }
 0x793   : > { %v10160_v35 = vadd.f32 %v2023_v27, %v1973_v34  ;;  %v7475_v36 = vpop.f32.mrb[11].mxu1 }
 0x798   : > { %v7488_v41 = vpop.f32.mrb[12].mxu1 }
 0x799   : > { %v2115_v42 = vadd.f32 %v7488_v41, %v10108_v63  ;;  %v2109_v44 = vpop.f32.mrb[13].mxu1 }
 0x79a   : > { %v2110_v45 = vadd.f32 %v2109_v44, %v10110_v0 }
 0x79b   : > { %v2121_v46 = vsel %vm1532_vm0, %v2115_v42, -inf }
 0x79c   : > { %2122 = vmax.xlane.f32.xlu0 %v2121_v46  ;;  %v2118_v47 = vsel %vm1532_vm0, %v2110_v45, -inf }
 0x79d   : > { %2119 = vmax.xlane.f32.xlu1 %v2118_v47 }
 0x829   : > { %v2123_v48 = vpop.xlane.xlu0 %2122 }
 0x82a   : > { %v2125_v49 = vsub.f32 %v2115_v42, %v2123_v48  ;;  %v2120_v50 = vpop.xlane.xlu1 %2119 }
 0x82b   : > { %v2124_v25 = vsub.f32 %v2110_v45, %v2120_v50 }
 0x82c   : > { %v2128_v51 = vmul.f32 1.442695, %v2125_v49 }
 0x82d   : > { %v2126_v52 = vmul.f32 1.442695, %v2124_v25 }
 0x82e   : > { %8311 = vpow2.f32 %v2128_v51 }
 0x82f   : > { %8313 = vpow2.f32 %v2126_v52 }
 0x838   : > { %v8312_v53 = vpop.eup %8311 }
 0x839   : > { %v8314_v54 = vpop.eup %8313  ;;  %v2133_v55 = vsel %vm1532_vm0, %v8312_v53, 0.0 }
 0x83a   : > { %2134 = vadd.xlane.f32.xlu1 %v2133_v55  ;;  %v2130_v56 = vsel %vm1532_vm0, %v8314_v54, 0.0 }
 0x83b   : > { %2131 = vadd.xlane.f32.xlu0 %v2130_v56 }
 0x84b   : > { %8126 = vrot.lane.b32.xlu1 %v10063_v40, %s9249_s7 }
 0x84f   : > { %2280 = vrot.lane.b32.xlu1 %v10051_v33, %s9249_s7 }
 0x851   : > { %8121 = vrot.lane.b32.xlu0 %v10126_v37, %s9248_s23 }
 0x855   : > { %2282 = vrot.lane.b32.xlu0 %v10053_v38, %s9249_s7 }
 0x8c7   : > { %v2135_v57 = vpop.xlane.xlu1 %2134 }
 0x8c8   : > { %8315 = vrcp.f32 %v2135_v57  ;;  %v2132_v58 = vpop.xlane.xlu0 %2131 }
 0x8c9   : > { %8317 = vrcp.f32 %v2132_v58 }
 0x8cb   : > { %v8127_v59 = vpop.permute.xlu1 %8126 }
 0x8cc   : > { %v8122_v60 = vpop.permute.xlu0 %8121  ;;  %v8129_v61 = vunpack.i.h.bf16 %v8127_v59  ;;  %v8128_v62 = vunpack.i.l.bf16 %v8127_v59 }
 0x8cd   : > { %v8124_v1 = vunpack.i.h.bf16 %v8122_v60  ;;  %v8123_v2 = vunpack.i.l.bf16 %v8122_v60 }
 0x8ce   : > { %v7764_v5 = vpack.c.bf16 %v8129_v61, %v8128_v62 }
 0x8cf   : > { %v7760_v3 = vpack.c.bf16 %v8124_v1, %v8123_v2  ;;  %v2281_v10 = vpop.permute.xlu1 %2280  ;;  %v8210_v2 = vld [vmem:[%s9976_s4 + $0x18] sm:$0xff]  }
 0x8d0   : > { %v2283_v11 = vpop.permute.xlu0 %2282 }
 0x8d1   : > { %7761 = vmatprep.subr.bf16.mxu0 %v7760_v3 }
 0x8d2   : > { %v8316_v6 = vpop.eup %8315  ;;  %7763 = vmatpush3.bf16.msra.mxu0 %v7760_v3 }
 0x8d3   : > { %v8318_v7 = vpop.eup %8317  ;;  %7766 = vmatprep.subr.msk.bf16.mxu0 %vm10059_vm1, %v7764_v5  ;;  %v2139_v9 = vmul.f32 %v8316_v6, %v8312_v53 }
 0x8d4   : > { %v2137_v8 = vmul.f32 %v8318_v7, %v8314_v54 }
 0x8d6   : > { %7493 = vmatprep.mubr.msk.f32.mxu0 %vm1532_vm0, %v2137_v8 }
 0x8d7   : > { %7494 = vmatmul.mubr.msk.f32.vlgmr.msra.gmra.mrb[12].mxu0 %vm1532_vm0, %v2139_v9 }
 0x8d8   : > { %7506 = vmatprep.mubr.msk.f32.mxu0 %vm1532_vm0, %v2281_v10 }
 0x8db   : > { %7769 = vmatpush3.bf16.xpose.msk.msra.mxu0 %vm10059_vm1, %v7764_v5 }
 0x8dc   : > { %7516 = vmatprep.subr.bf16.mxu0 %v9245_v43 }
 0x8e2   : > { %7507 = vmatmul.mubr.msk.f32.vlgmr.msra.gmra.mrb[14].mxu0 %vm1532_vm0, %v2283_v11 }
 0x8e3   : > { %7518 = vmatprep.mubr.msk.bf16.mxu0 %vm9246_vm2, %v9245_v43  ;;  %7517 = vmatpush3.bf16.msra.mxu0 %v8210_v2 }
 0x9aa   : > { %v7495_v13 = vpop.f32.mrb[12].mxu0 }
 0x9ab   : > { %v2218_v14 = vpop.f32.mrb[13].mxu0 }
 0x9ac   : > { %v2227_v15 = vpack.c.bf16 %v7495_v13, %v2218_v14 }
 0x9ae   : > { %7499 = vmatmul.mubr.msk.bf16.vlgmr.msra.gmra.mrb[16].mxu1 %vm1532_vm0, %v2227_v15 }
 0x9b5   : > { %v7508_v16 = vpop.f32.mrb[14].mxu0 }
 0x9b6   : > { %v2368_v17 = vadd.f32 %v7508_v16, %v10108_v63  ;;  %v2362_v18 = vpop.f32.mrb[15].mxu0 }
 0x9b7   : > { %v2363_v19 = vadd.f32 %v2362_v18, %v10110_v0 }
 0x9b8   : > { %v2374_v20 = vsel %vm1532_vm0, %v2368_v17, -inf }
 0x9b9   : > { %2375 = vmax.xlane.f32.xlu0 %v2374_v20  ;;  %v2371_v21 = vsel %vm1532_vm0, %v2363_v19, -inf }
 0x9ba   : > { %2372 = vmax.xlane.f32.xlu1 %v2371_v21 }
 0xa46   : > { %v2376_v22 = vpop.xlane.xlu0 %2375 }
 0xa47   : > { %v2378_v27 = vsub.f32 %v2368_v17, %v2376_v22  ;;  %v2373_v28 = vpop.xlane.xlu1 %2372 }
 0xa48   : > { %v2377_v29 = vsub.f32 %v2363_v19, %v2373_v28 }
 0xa49   : > { %v2381_v32 = vmul.f32 1.442695, %v2378_v27 }
 0xa4a   : > { %v2379_v34 = vmul.f32 1.442695, %v2377_v29 }
 0xa4b   : > { %8319 = vpow2.f32 %v2381_v32 }
 0xa4c   : > { %8321 = vpow2.f32 %v2379_v34 }
 0xa55   : > { %v8320_v36 = vpop.eup %8319 }
 0xa56   : > { %v8322_v41 = vpop.eup %8321  ;;  %v2386_v42 = vsel %vm1532_vm0, %v8320_v36, 0.0 }
 0xa57   : > { %2387 = vadd.xlane.f32.xlu1 %v2386_v42  ;;  %v2383_v44 = vsel %vm1532_vm0, %v8322_v41, 0.0 }
 0xa58   : > { %2384 = vadd.xlane.f32.xlu0 %v2383_v44 }
 0xa68   : > { %8136 = vrot.lane.b32.xlu1 %v10063_v40, %s9250_s17 }
 0xa6c   : > { %2533 = vrot.lane.b32.xlu1 %v10051_v33, %s9250_s17 }
 0xa6e   : > { %8131 = vrot.lane.b32.xlu0 %v10126_v37, %s9249_s7 }
 0xa72   : > { %2535 = vrot.lane.b32.xlu0 %v10053_v38, %s9250_s17 }
 0xa81   : > { %v2271_v45 = vpop.f32.mrb[16].mxu1 }
 0xa82   : > { %v10204_v46 = vadd.f32 %v2271_v45, %v10158_v31  ;;  %v7500_v47 = vpop.f32.mrb[17].mxu1 }
 0xa83   : > { %v2274_v48 = vpop.f32.mrb[18].mxu1 }
 0xa84   : > { %v10207_v49 = vadd.f32 %v2274_v48, %v10160_v35  ;;  %v7501_v50 = vpop.f32.mrb[19].mxu1 }
 0xae4   : > { %v2388_v25 = vpop.xlane.xlu1 %2387 }
 0xae5   : > { %8323 = vrcp.f32 %v2388_v25  ;;  %v2385_v51 = vpop.xlane.xlu0 %2384 }
 0xae6   : > { %8325 = vrcp.f32 %v2385_v51 }
 0xae8   : > { %v8137_v52 = vpop.permute.xlu1 %8136 }
 0xae9   : > { %v8132_v53 = vpop.permute.xlu0 %8131  ;;  %v8139_v54 = vunpack.i.h.bf16 %v8137_v52  ;;  %v8138_v55 = vunpack.i.l.bf16 %v8137_v52 }
 0xaea   : > { %v8134_v56 = vunpack.i.h.bf16 %v8132_v53  ;;  %v8133_v57 = vunpack.i.l.bf16 %v8132_v53 }
 0xaeb   : > { %v7774_v59 = vpack.c.bf16 %v8139_v54, %v8138_v55 }
 0xaec   : > { %v7770_v58 = vpack.c.bf16 %v8134_v56, %v8133_v57  ;;  %v2534_v62 = vpop.permute.xlu1 %2533  ;;  %v8211_v57 = vld [vmem:[%s9976_s4 + $0x20] sm:$0xff]  }
 0xaed   : > { %v2536_v1 = vpop.permute.xlu0 %2535 }
 0xaee   : > { %7771 = vmatprep.subr.bf16.mxu1 %v7770_v58 }
 0xaef   : > { %v8324_v31 = vpop.eup %8323  ;;  %7773 = vmatpush3.bf16.msra.mxu1 %v7770_v58 }
 0xaf0   : > { %v8326_v60 = vpop.eup %8325  ;;  %7776 = vmatprep.subr.msk.bf16.mxu1 %vm10059_vm1, %v7774_v59  ;;  %v2392_v61 = vmul.f32 %v8324_v31, %v8320_v36 }
 0xaf1   : > { %v2390_v35 = vmul.f32 %v8326_v60, %v8322_v41 }
 0xaf3   : > { %7513 = vmatprep.mubr.msk.f32.mxu1 %vm1532_vm0, %v2390_v35 }
 0xaf4   : > { %7514 = vmatmul.mubr.msk.f32.vlgmr.msra.gmra.mrb[14].mxu1 %vm1532_vm0, %v2392_v61 }
 0xaf5   : > { %7526 = vmatprep.mubr.msk.f32.mxu1 %vm1532_vm0, %v2534_v62 }
 0xaf8   : > { %7779 = vmatpush3.bf16.xpose.msk.msra.mxu1 %vm10059_vm1, %v7774_v59 }
 0xaf9   : > { %7536 = vmatprep.subr.bf16.mxu1 %v9245_v43 }
 0xaff   : > { %7527 = vmatmul.mubr.msk.f32.vlgmr.msra.gmra.mrb[20].mxu1 %vm1532_vm0, %v2536_v1 }
 0xb00   : > { %7538 = vmatprep.mubr.msk.bf16.mxu1 %vm9246_vm2, %v9245_v43  ;;  %7537 = vmatpush3.bf16.msra.mxu1 %v8211_v57 }
 0xbc7   : > { %v7515_v3 = vpop.f32.mrb[14].mxu1 }
 0xbc8   : > { %v2471_v5 = vpop.f32.mrb[15].mxu1 }
 0xbc9   : > { %v2480_v6 = vpack.c.bf16 %v7515_v3, %v2471_v5 }
 0xbcb   : > { %7519 = vmatmul.mubr.msk.bf16.vlgmr.msra.gmra.mrb[16].mxu0 %vm1532_vm0, %v2480_v6 }
 0xbd2   : > { %v7528_v7 = vpop.f32.mrb[20].mxu1 }
 0xbd3   : > { %v2621_v8 = vadd.f32 %v7528_v7, %v10108_v63  ;;  %v2615_v9 = vpop.f32.mrb[21].mxu1 }
 0xbd4   : > { %v2616_v10 = vadd.f32 %v2615_v9, %v10110_v0 }
 0xbd5   : > { %v2627_v11 = vsel %vm1532_vm0, %v2621_v8, -inf }
 0xbd6   : > { %2628 = vmax.xlane.f32.xlu0 %v2627_v11  ;;  %v2624_v12 = vsel %vm1532_vm0, %v2616_v10, -inf }
 0xbd7   : > { %2625 = vmax.xlane.f32.xlu1 %v2624_v12 }
 0xc63   : > { %v2629_v13 = vpop.xlane.xlu0 %2628 }
 0xc64   : > { %v2631_v14 = vsub.f32 %v2621_v8, %v2629_v13  ;;  %v2626_v15 = vpop.xlane.xlu1 %2625 }
 0xc65   : > { %v2630_v16 = vsub.f32 %v2616_v10, %v2626_v15 }
 0xc66   : > { %v2634_v17 = vmul.f32 1.442695, %v2631_v14 }
 0xc67   : > { %v2632_v18 = vmul.f32 1.442695, %v2630_v16 }
 0xc68   : > { %8327 = vpow2.f32 %v2634_v17 }
 0xc69   : > { %8329 = vpow2.f32 %v2632_v18 }
 0xc72   : > { %v8328_v19 = vpop.eup %8327 }
 0xc73   : > { %v8330_v20 = vpop.eup %8329  ;;  %v2639_v21 = vsel %vm1532_vm0, %v8328_v19, 0.0 }
 0xc74   : > { %2640 = vadd.xlane.f32.xlu1 %v2639_v21  ;;  %v2636_v22 = vsel %vm1532_vm0, %v8330_v20, 0.0 }
 0xc75   : > { %2637 = vadd.xlane.f32.xlu0 %v2636_v22 }
 0xc85   : > { %8146 = vrot.lane.b32.xlu1 %v10063_v40, %s9251_s24 }
 0xc89   : > { %2786 = vrot.lane.b32.xlu1 %v10051_v33, %s9251_s24 }
 0xc8b   : > { %8141 = vrot.lane.b32.xlu0 %v10126_v37, %s9250_s17 }
 0xc8f   : > { %2788 = vrot.lane.b32.xlu0 %v10053_v38, %s9251_s24 }
 0xc9e   : > { %v2524_v27 = vpop.f32.mrb[16].mxu0 }
 0xc9f   : > { %v10237_v28 = vadd.f32 %v2524_v27, %v10204_v46  ;;  %v7520_v29 = vpop.f32.mrb[17].mxu0 }
 0xca0   : > { %v2527_v32 = vpop.f32.mrb[18].mxu0 }
 0xca1   : > { %v10240_v34 = vadd.f32 %v2527_v32, %v10207_v49  ;;  %v7521_v36 = vpop.f32.mrb[19].mxu0 }
 0xd01   : > { %v2641_v41 = vpop.xlane.xlu1 %2640 }
 0xd02   : > { %8331 = vrcp.f32 %v2641_v41  ;;  %v2638_v42 = vpop.xlane.xlu0 %2637 }
 0xd03   : > { %8333 = vrcp.f32 %v2638_v42 }
 0xd05   : > { %v8147_v44 = vpop.permute.xlu1 %8146 }
 0xd06   : > { %v8142_v45 = vpop.permute.xlu0 %8141  ;;  %v8149_v47 = vunpack.i.h.bf16 %v8147_v44  ;;  %v8148_v48 = vunpack.i.l.bf16 %v8147_v44 }
 0xd07   : > { %v8144_v50 = vunpack.i.h.bf16 %v8142_v45  ;;  %v8143_v25 = vunpack.i.l.bf16 %v8142_v45 }
 0xd08   : > { %v7784_v52 = vpack.c.bf16 %v8149_v47, %v8148_v48 }
 0xd09   : > { %v7780_v51 = vpack.c.bf16 %v8144_v50, %v8143_v25  ;;  %v2787_v55 = vpop.permute.xlu1 %2786  ;;  %v8212_v25 = vld [vmem:[%s9976_s4 + $0x28] sm:$0xff]  }
 0xd0a   : > { %v2789_v56 = vpop.permute.xlu0 %2788 }
 0xd0b   : > { %7781 = vmatprep.subr.bf16.mxu0 %v7780_v51 }
 0xd0c   : > { %v8332_v46 = vpop.eup %8331  ;;  %7783 = vmatpush3.bf16.msra.mxu0 %v7780_v51 }
 0xd0d   : > { %v8334_v53 = vpop.eup %8333  ;;  %7786 = vmatprep.subr.msk.bf16.mxu0 %vm10059_vm1, %v7784_v52  ;;  %v2645_v54 = vmul.f32 %v8332_v46, %v8328_v19 }
 0xd0e   : > { %v2643_v49 = vmul.f32 %v8334_v53, %v8330_v20 }
 0xd10   : > { %7533 = vmatprep.mubr.msk.f32.mxu0 %vm1532_vm0, %v2643_v49 }
 0xd11   : > { %7534 = vmatmul.mubr.msk.f32.vlgmr.msra.gmra.mrb[20].mxu0 %vm1532_vm0, %v2645_v54 }
 0xd12   : > { %7546 = vmatprep.mubr.msk.f32.mxu0 %vm1532_vm0, %v2787_v55 }
 0xd15   : > { %7789 = vmatpush3.bf16.xpose.msk.msra.mxu0 %vm10059_vm1, %v7784_v52 }
 0xd16   : > { %7556 = vmatprep.subr.bf16.mxu0 %v9245_v43 }
 0xd1c   : > { %7547 = vmatmul.mubr.msk.f32.vlgmr.msra.gmra.mrb[22].mxu0 %vm1532_vm0, %v2789_v56 }
 0xd1d   : > { %7558 = vmatprep.mubr.msk.bf16.mxu0 %vm9246_vm2, %v9245_v43  ;;  %7557 = vmatpush3.bf16.msra.mxu0 %v8212_v25 }
 0xde4   : > { %v7535_v58 = vpop.f32.mrb[20].mxu0 }
 0xde5   : > { %v2724_v59 = vpop.f32.mrb[21].mxu0 }
 0xde6   : > { %v2733_v31 = vpack.c.bf16 %v7535_v58, %v2724_v59 }
 0xde8   : > { %7539 = vmatmul.mubr.msk.bf16.vlgmr.msra.gmra.mrb[24].mxu1 %vm1532_vm0, %v2733_v31 }
 0xdef   : > { %v7548_v60 = vpop.f32.mrb[22].mxu0 }
 0xdf0   : > { %v2874_v35 = vadd.f32 %v7548_v60, %v10108_v63  ;;  %v2868_v61 = vpop.f32.mrb[23].mxu0 }
 0xdf1   : > { %v2869_v62 = vadd.f32 %v2868_v61, %v10110_v0 }
 0xdf2   : > { %v2880_v1 = vsel %vm1532_vm0, %v2874_v35, -inf }
 0xdf3   : > { %2881 = vmax.xlane.f32.xlu0 %v2880_v1  ;;  %v2877_v2 = vsel %vm1532_vm0, %v2869_v62, -inf }
 0xdf4   : > { %2878 = vmax.xlane.f32.xlu1 %v2877_v2 }
 0xe80   : > { %v2882_v3 = vpop.xlane.xlu0 %2881 }
 0xe81   : > { %v2884_v5 = vsub.f32 %v2874_v35, %v2882_v3  ;;  %v2879_v6 = vpop.xlane.xlu1 %2878 }
 0xe82   : > { %v2883_v7 = vsub.f32 %v2869_v62, %v2879_v6 }
 0xe83   : > { %v2887_v8 = vmul.f32 1.442695, %v2884_v5 }
 0xe84   : > { %v2885_v9 = vmul.f32 1.442695, %v2883_v7 }
 0xe85   : > { %8335 = vpow2.f32 %v2887_v8 }
 0xe86   : > { %8337 = vpow2.f32 %v2885_v9 }
 0xe8f   : > { %v8336_v10 = vpop.eup %8335 }
 0xe90   : > { %v8338_v11 = vpop.eup %8337  ;;  %v2892_v12 = vsel %vm1532_vm0, %v8336_v10, 0.0 }
 0xe91   : > { %2893 = vadd.xlane.f32.xlu1 %v2892_v12  ;;  %v2889_v13 = vsel %vm1532_vm0, %v8338_v11, 0.0 }
 0xe92   : > { %2890 = vadd.xlane.f32.xlu0 %v2889_v13 }
 0xea2   : > { %8156 = vrot.lane.b32.xlu1 %v10063_v40, %s9252_s5 }
 0xea6   : > { %3039 = vrot.lane.b32.xlu1 %v10051_v33, %s9252_s5 }
 0xea8   : > { %8151 = vrot.lane.b32.xlu0 %v10126_v37, %s9251_s24 }
 0xeac   : > { %3041 = vrot.lane.b32.xlu0 %v10053_v38, %s9252_s5 }
 0xebb   : > { %v2777_v14 = vpop.f32.mrb[24].mxu1 }
 0xebc   : > { %v10270_v15 = vadd.f32 %v2777_v14, %v10237_v28  ;;  %v7540_v16 = vpop.f32.mrb[25].mxu1 }
 0xebd   : > { %v2780_v17 = vpop.f32.mrb[26].mxu1 }
 0xebe   : > { %v10273_v18 = vadd.f32 %v2780_v17, %v10240_v34  ;;  %v7541_v19 = vpop.f32.mrb[27].mxu1 }
 0xf1e   : > { %v2894_v20 = vpop.xlane.xlu1 %2893 }
 0xf1f   : > { %8339 = vrcp.f32 %v2894_v20  ;;  %v2891_v21 = vpop.xlane.xlu0 %2890 }
 0xf20   : > { %8341 = vrcp.f32 %v2891_v21 }
 0xf22   : > { %v8157_v22 = vpop.permute.xlu1 %8156 }
 0xf23   : > { %v8152_v27 = vpop.permute.xlu0 %8151  ;;  %v8159_v29 = vunpack.i.h.bf16 %v8157_v22  ;;  %v8158_v32 = vunpack.i.l.bf16 %v8157_v22 }
 0xf24   : > { %v8154_v36 = vunpack.i.h.bf16 %v8152_v27  ;;  %v8153_v41 = vunpack.i.l.bf16 %v8152_v27 }
 0xf25   : > { %v7794_v44 = vpack.c.bf16 %v8159_v29, %v8158_v32  ;;  %v8213_v29 = vld [vmem:[%s9976_s4 + $0x30] sm:$0xff]  }
 0xf26   : > { %v7790_v42 = vpack.c.bf16 %v8154_v36, %v8153_v41  ;;  %v3040_v48 = vpop.permute.xlu1 %3039 }
 0xf27   : > { %v3042_v50 = vpop.permute.xlu0 %3041 }
 0xf28   : > { %7791 = vmatprep.subr.bf16.mxu1 %v7790_v42 }
 0xf29   : > { %v8340_v28 = vpop.eup %8339  ;;  %7793 = vmatpush3.bf16.msra.mxu1 %v7790_v42 }
 0xf2a   : > { %v8342_v45 = vpop.eup %8341  ;;  %7796 = vmatprep.subr.msk.bf16.mxu1 %vm10059_vm1, %v7794_v44  ;;  %v2898_v47 = vmul.f32 %v8340_v28, %v8336_v10 }
 0xf2b   : > { %v2896_v34 = vmul.f32 %v8342_v45, %v8338_v11 }
 0xf2d   : > { %7553 = vmatprep.mubr.msk.f32.mxu1 %vm1532_vm0, %v2896_v34 }
 0xf2e   : > { %7554 = vmatmul.mubr.msk.f32.vlgmr.msra.gmra.mrb[22].mxu1 %vm1532_vm0, %v2898_v47 }
 0xf2f   : > { %7566 = vmatprep.mubr.msk.f32.mxu1 %vm1532_vm0, %v3040_v48 }
 0xf32   : > { %7799 = vmatpush3.bf16.xpose.msk.msra.mxu1 %vm10059_vm1, %v7794_v44 }
 0xf33   : > { %7576 = vmatprep.subr.bf16.mxu1 %v9245_v43 }
 0xf39   : > { %7567 = vmatmul.mubr.msk.f32.vlgmr.msra.gmra.mrb[28].mxu1 %vm1532_vm0, %v3042_v50 }
 0xf3a   : > { %7578 = vmatprep.mubr.msk.bf16.mxu1 %vm9246_vm2, %v9245_v43  ;;  %7577 = vmatpush3.bf16.msra.mxu1 %v8213_v29  ;;  %v8221_v29 = vld [vmem:[%s9981_s11 + $0x20] ss:$16 sps:$4 sm:$0xff]  }
0x1001   : > { %v7555_v51 = vpop.f32.mrb[22].mxu1 }
0x1002   : > { %v2977_v52 = vpop.f32.mrb[23].mxu1 }
0x1003   : > { %v2986_v46 = vpack.c.bf16 %v7555_v51, %v2977_v52 }
0x1005   : > { %7559 = vmatmul.mubr.msk.bf16.vlgmr.msra.gmra.mrb[24].mxu0 %vm1532_vm0, %v2986_v46 }
0x100c   : > { %v7568_v53 = vpop.f32.mrb[28].mxu1 }
0x100d   : > { %v3127_v49 = vadd.f32 %v7568_v53, %v10108_v63  ;;  %v3121_v54 = vpop.f32.mrb[29].mxu1 }
0x100e   : > { %v3122_v55 = vadd.f32 %v3121_v54, %v10110_v0 }
0x100f   : > { %v3133_v56 = vsel %vm1532_vm0, %v3127_v49, -inf }
0x1010   : > { %3134 = vmax.xlane.f32.xlu0 %v3133_v56  ;;  %v3130_v57 = vsel %vm1532_vm0, %v3122_v55, -inf }
0x1011   : > { %3131 = vmax.xlane.f32.xlu1 %v3130_v57 }
0x109d   : > { %v3135_v58 = vpop.xlane.xlu0 %3134 }
0x109e   : > { %v3137_v59 = vsub.f32 %v3127_v49, %v3135_v58  ;;  %v3132_v31 = vpop.xlane.xlu1 %3131 }
0x109f   : > { %v3136_v60 = vsub.f32 %v3122_v55, %v3132_v31 }
0x10a0   : > { %v3140_v35 = vmul.f32 1.442695, %v3137_v59 }
0x10a1   : > { %v3138_v61 = vmul.f32 1.442695, %v3136_v60 }
0x10a2   : > { %8343 = vpow2.f32 %v3140_v35 }
0x10a3   : > { %8345 = vpow2.f32 %v3138_v61 }
0x10ac   : > { %v8344_v62 = vpop.eup %8343 }
0x10ad   : > { %v8346_v1 = vpop.eup %8345  ;;  %v3145_v2 = vsel %vm1532_vm0, %v8344_v62, 0.0 }
0x10ae   : > { %3146 = vadd.xlane.f32.xlu1 %v3145_v2  ;;  %v3142_v3 = vsel %vm1532_vm0, %v8346_v1, 0.0 }
0x10af   : > { %3143 = vadd.xlane.f32.xlu0 %v3142_v3 }
0x10bf   : > { %8166 = vrot.lane.b32.xlu1 %v10063_v40, %s9253_s3 }
0x10c3   : > { %3292 = vrot.lane.b32.xlu1 %v10051_v33, %s9253_s3 }
0x10c5   : > { %8161 = vrot.lane.b32.xlu0 %v10126_v37, %s9252_s5 }
0x10c9   : > { %3294 = vrot.lane.b32.xlu0 %v10053_v38, %s9253_s3 }
0x10d8   : > { %v3030_v5 = vpop.f32.mrb[24].mxu0 }
0x10d9   : > { %v10303_v6 = vadd.f32 %v3030_v5, %v10270_v15  ;;  %v7560_v7 = vpop.f32.mrb[25].mxu0  ;;  %v8214_v5 = vld [vmem:[%s9976_s4 + $0x38] sm:$0xff]   ;;  %s10985_s4 = sld [smem:[#allocation43_spill]] }
0x10da   : > { %v3033_v8 = vpop.f32.mrb[26].mxu0 }
0x10db   : > { %v10306_v9 = vadd.f32 %v3033_v8, %v10273_v18  ;;  %v7561_v10 = vpop.f32.mrb[27].mxu0 }
0x10df   : > { %p7106_p12 = scmp.ne.s32.totalorder %s10985_s4, 5 }
0x10e0   : > { %vm9256_vm5 = vmmov (!%p7106_p12), 0   ;;  %s10987_s5 = sld [smem:[#allocation61_spill]] (!%p7106_p12)  ;;  %s9259_s4 = smov (!%p7106_p12), 80  }
0x10e1   : > { %s9260_s18 = smov (!%p7106_p12), 96  }
0x113b   : > { %v3147_v40 = vpop.xlane.xlu1 %3146 }
0x113c   : > { %8347 = vrcp.f32 %v3147_v40  ;;  %v3144_v11 = vpop.xlane.xlu0 %3143 }
0x113d   : > { %8349 = vrcp.f32 %v3144_v11 }
0x113f   : > { %v8167_v33 = vpop.permute.xlu1 %8166 }
0x1140   : > { %v8162_v12 = vpop.permute.xlu0 %8161  ;;  %v8169_v13 = vunpack.i.h.bf16 %v8167_v33  ;;  %v8168_v14 = vunpack.i.l.bf16 %v8167_v33 }
0x1141   : > { %v8164_v16 = vunpack.i.h.bf16 %v8162_v12  ;;  %v8163_v38 = vunpack.i.l.bf16 %v8162_v12 }
0x1142   : > { %v7804_v19 = vpack.c.bf16 %v8169_v13, %v8168_v14 }
0x1143   : > { %v7800_v17 = vpack.c.bf16 %v8164_v16, %v8163_v38  ;;  %v3293_v22 = vpop.permute.xlu1 %3292  ;;  %v8367_v38 = vld [vmem:[#allocation2] sm:$0xff] }
0x1144   : > { %v3295_v27 = vpop.permute.xlu0 %3294 }
0x1145   : > { %7801 = vmatprep.subr.bf16.mxu0 %v7800_v17 }
0x1146   : > { %v8348_v15 = vpop.eup %8347  ;;  %7803 = vmatpush3.bf16.msra.mxu0 %v7800_v17 }
0x1147   : > { %v8350_v20 = vpop.eup %8349  ;;  %7806 = vmatprep.subr.msk.bf16.mxu0 %vm10059_vm1, %v7804_v19  ;;  %v3151_v21 = vmul.f32 %v8348_v15, %v8344_v62  ;;  %v8215_v15 = vld [vmem:[%s9981_s11] ss:$16 sps:$4 sm:$0xff]  }
0x1148   : > { %v3149_v18 = vmul.f32 %v8350_v20, %v8346_v1  ;;  %v8217_v20 = vld [vmem:[%s9981_s11 + $0x4] ss:$16 sps:$4 sm:$0xff]  }
0x114a   : > { %7573 = vmatprep.mubr.msk.f32.mxu0 %vm1532_vm0, %v3149_v18  ;;  %v8218_v18 = vld [vmem:[%s9981_s11 + $0x8] ss:$16 sps:$4 sm:$0xff]  }
0x114b   : > { %7574 = vmatmul.mubr.msk.f32.vlgmr.msra.gmra.mrb[28].mxu0 %vm1532_vm0, %v3151_v21  ;;  %v8220_v21 = vld [vmem:[%s9981_s11 + $0xc] ss:$16 sps:$4 sm:$0xff]  }
0x114c   : > { %7586 = vmatprep.mubr.msk.f32.mxu0 %vm1532_vm0, %v3293_v22  ;;  %v8223_v22 = vld [vmem:[%s9981_s11 + $0x24] ss:$16 sps:$4 sm:$0xff]  }
0x114f   : > { %7809 = vmatpush3.bf16.xpose.msk.msra.mxu0 %vm10059_vm1, %v7804_v19 }
0x1150   : > { %7596 = vmatprep.subr.bf16.mxu0 %v9245_v43 }
0x1156   : > { %7587 = vmatmul.mubr.msk.f32.vlgmr.msra.gmra.mrb[30].mxu0 %vm1532_vm0, %v3295_v27  ;;  %v8226_v27 = vld [vmem:[%s9981_s11 + $0x2c] ss:$16 sps:$4 sm:$0xff]  }
0x1157   : > { %7598 = vmatprep.mubr.msk.bf16.mxu0 %vm9246_vm2, %v9245_v43  ;;  %7597 = vmatpush3.bf16.msra.mxu0 %v8214_v5 }
0x1158   : > { %3854 = vmatprep.subr.bf16.mxu0 %v8220_v21  ;;  %v8268_v21 = vld [vmem:[%s9985_s0 + $0xc8] sm:$0xff]  }
0x121e   : > { %v7575_v32 = vpop.f32.mrb[28].mxu0 }
0x121f   : > { %v3230_v36 = vpop.f32.mrb[29].mxu0 }
0x1220   : > { %v3239_v41 = vpack.c.bf16 %v7575_v32, %v3230_v36  ;;  %v8224_v32 = vld [vmem:[%s9981_s11 + $0x28] ss:$16 sps:$4 sm:$0xff]  }
0x1222   : > { %7579 = vmatmul.mubr.msk.bf16.vlgmr.msra.gmra.mrb[32].mxu1 %vm1532_vm0, %v3239_v41 }
0x1229   : > { %v7588_v42 = vpop.f32.mrb[30].mxu0 }
0x122a   : > { %v3380_v44 = vadd.f32 %v7588_v42, %v10108_v63  ;;  %v3374_v28 = vpop.f32.mrb[31].mxu0 }
0x122b   : > { %v3375_v45 = vadd.f32 %v3374_v28, %v10110_v0 }
0x122c   : > { %v3386_v34 = vsel %vm1532_vm0, %v3380_v44, -inf }
0x122d   : > { %3387 = vmax.xlane.f32.xlu0 %v3386_v34  ;;  %v3383_v47 = vsel %vm1532_vm0, %v3375_v45, -inf }
0x122e   : > { %3384 = vmax.xlane.f32.xlu1 %v3383_v47 }
0x12ba   : > { %v3388_v43 = vpop.xlane.xlu0 %3387 }
0x12bb   : > { %v3390_v48 = vsub.f32 %v3380_v44, %v3388_v43  ;;  %v3385_v50 = vpop.xlane.xlu1 %3384  ;;  %v8229_v43 = vld [vmem:[%s9981_s11 + $0x44] ss:$16 sps:$4 sm:$0xff]  }
0x12bc   : > { %v3389_v25 = vsub.f32 %v3375_v45, %v3385_v50  ;;  %v8227_v50 = vld [vmem:[%s9981_s11 + $0x40] ss:$16 sps:$4 sm:$0xff]  }
0x12bd   : > { %v3393_v51 = vmul.f32 1.442695, %v3390_v48  ;;  %v8232_v48 = vld [vmem:[%s9981_s11 + $0x4c] ss:$16 sps:$4 sm:$0xff]  }
0x12be   : > { %v3391_v52 = vmul.f32 1.442695, %v3389_v25  ;;  %v8230_v25 = vld [vmem:[%s9981_s11 + $0x48] ss:$16 sps:$4 sm:$0xff]  }
0x12bf   : > { %8351 = vpow2.f32 %v3393_v51  ;;  %v8235_v51 = vld [vmem:[%s9981_s11 + $0x64] ss:$16 sps:$4 sm:$0xff]  }
0x12c0   : > { %8353 = vpow2.f32 %v3391_v52  ;;  %v8238_v52 = vld [vmem:[%s9981_s11 + $0x6c] ss:$16 sps:$4 sm:$0xff]  }
0x12c9   : > { %v8352_v46 = vpop.eup %8351 }
0x12ca   : > { %v8354_v53 = vpop.eup %8353  ;;  %v3398_v63 = vsel %vm1532_vm0, %v8352_v46, 0.0 }
0x12cb   : > { %3399 = vadd.xlane.f32.xlu1 %v3398_v63  ;;  %v3395_v0 = vsel %vm1532_vm0, %v8354_v53, 0.0  ;;  %v8241_v63 = vld [vmem:[%s9981_s11 + $0x84] ss:$16 sps:$4 sm:$0xff]  }
0x12cc   : > { %3396 = vadd.xlane.f32.xlu0 %v3395_v0  ;;  %v8244_v0 = vld [vmem:[%s9981_s11 + $0x8c] ss:$16 sps:$4 sm:$0xff]  }
0x12e2   : > { %8171 = vrot.lane.b32.xlu0 %v10126_v37, %s9253_s3  ;;  %s9258_s3 = smov (!%p7106_p12), 112  }
0x12f5   : > { %v3283_v49 = vpop.f32.mrb[32].mxu1 }
0x12f6   : > { %v3290_v54 = vadd.f32 %v3283_v49, %v10303_v6  ;;  %v7580_v55 = vpop.f32.mrb[33].mxu1  ;;  %v8239_v49 = vld [vmem:[%s9981_s11 + $0x80] ss:$16 sps:$4 sm:$0xff]  }
0x12f7   : > { %v3286_v56 = vpop.f32.mrb[34].mxu1  ;;  %v8247_v55 = vld [vmem:[%s9981_s11 + $0xa4] ss:$16 sps:$4 sm:$0xff]  }
0x12f8   : > { %v3291_v57 = vadd.f32 %v3286_v56, %v10306_v9  ;;  %v7581_v58 = vpop.f32.mrb[35].mxu1  ;;  %v7036_v9 = vld [vmem:[%s992_s2] ss:$0 sm:$0xff]  ;;  %v8250_v56 = vld [vmem:[%s9981_s11 + $0xac] ss:$16 sps:$4 sm:$0xff]   ;;  %s9261_s2 = smov (!%p7106_p12), 64  }
0x12f9   : > { %v8248_v58 = vld [vmem:[%s9981_s11 + $0xa8] ss:$16 sps:$4 sm:$0xff]  }
0x1358   : > { %v3400_v59 = vpop.xlane.xlu1 %3399 }
0x1359   : > { %8355 = vrcp.f32 %v3400_v59  ;;  %v3397_v31 = vpop.xlane.xlu0 %3396  ;;  %v8251_v59 = vld [vmem:[%s9981_s11 + $0xc0] ss:$16 sps:$4 sm:$0xff]  }
0x135a   : > { %8357 = vrcp.f32 %v3397_v31  ;;  %v8253_v31 = vld [vmem:[%s9981_s11 + $0xc4] ss:$16 sps:$4 sm:$0xff]  }
0x135d   : > { %v8172_v60 = vpop.permute.xlu0 %8171 }
0x135e   : > { %v8174_v35 = vunpack.i.h.bf16 %v8172_v60  ;;  %v8173_v61 = vunpack.i.l.bf16 %v8172_v60  ;;  %v8254_v60 = vld [vmem:[%s9981_s11 + $0xc8] ss:$16 sps:$4 sm:$0xff]  }
0x1360   : > { %v7810_v62 = vpack.c.bf16 %v8174_v35, %v8173_v61  ;;  %v8256_v35 = vld [vmem:[%s9981_s11 + $0xcc] ss:$16 sps:$4 sm:$0xff]   ;;  %v8259_v61 = vld [vmem:[%s9981_s11 + $0xe4] ss:$16 sps:$4 sm:$0xff]  }
0x1362   : > { %7811 = vmatprep.subr.bf16.mxu1 %v7810_v62 }
0x1363   : > { %v8356_v37 = vpop.eup %8355  ;;  %7813 = vmatpush3.bf16.msra.mxu1 %v7810_v62  ;;  %v8262_v62 = vld [vmem:[%s9981_s11 + $0xec] ss:$16 sps:$4 sm:$0xff]  }
0x1364   : > { %v8358_v1 = vpop.eup %8357  ;;  %v3404_v3 = vmul.f32 %v8356_v37, %v8352_v46  ;;  %3811 = vmatprep.subr.bf16.mxu1 %v8217_v20  ;;  %v8233_v46 = vld [vmem:[%s9981_s11 + $0x60] ss:$16 sps:$4 sm:$0xff]  }
0x1365   : > { %v3402_v2 = vmul.f32 %v8358_v1, %v8354_v53  ;;  %v8236_v53 = vld [vmem:[%s9981_s11 + $0x68] ss:$16 sps:$4 sm:$0xff]   ;;  %v8257_v37 = vld [vmem:[%s9981_s11 + $0xe0] ss:$16 sps:$4 sm:$0xff]  }
0x1366   : > { %v8260_v1 = vld [vmem:[%s9981_s11 + $0xe8] ss:$16 sps:$4 sm:$0xff]  }
0x1367   : > { %7593 = vmatprep.mubr.msk.f32.mxu1 %vm1532_vm0, %v3402_v2  ;;  %v8263_v2 = vld [vmem:[%s9985_s0 + $0x40] sm:$0xff]  }
0x1368   : > { %7594 = vmatmul.mubr.msk.f32.vlgmr.msra.gmra.mrb[30].mxu1 %vm1532_vm0, %v3404_v3  ;;  %v8264_v3 = vld [vmem:[%s9985_s0 + $0xc0] sm:$0xff]  }
0x1369   : > { %3843 = vmatprep.mubr.bf16.mxu1 %v9243_v4  ;;  %3812 = vmatpush1.bf16.msra.mxu1 %v8215_v15  ;;  %v8266_v15 = vld [vmem:[%s9985_s0 + $0x80] sm:$0xff]  }
0x136a   : > { %3813 = vmatprep.subr.bf16.mxu1 %v8223_v22  ;;  %v8269_v22 = vld [vmem:[%s9985_s0 + $0x8] sm:$0xff]  }
0x136d   : > { %3814 = vmatpush1.bf16.msra.mxu1 %v8221_v29  ;;  %v8271_v29 = vld [vmem:[%s9985_s0 + $0x50] sm:$0xff]  }
0x136e   : > { %3815 = vmatprep.subr.bf16.mxu1 %v8229_v43  ;;  %v8281_v43 = vld [vmem:[%s9985_s0 + $0x20] sm:$0xff]  }
0x1371   : > { %3816 = vmatpush1.bf16.msra.mxu1 %v8227_v50  ;;  %v8283_v50 = vld [vmem:[%s9985_s0 + $0x68] sm:$0xff]  }
0x1372   : > { %3817 = vmatprep.subr.bf16.mxu1 %v8235_v51  ;;  %v8285_v51 = vld [vmem:[%s9985_s0 + $0x28] sm:$0xff]  }
0x1375   : > { %3818 = vmatpush1.bf16.msra.mxu1 %v8233_v46  ;;  %v8287_v46 = vld [vmem:[%s9985_s0 + $0x70] sm:$0xff]  }
0x1376   : > { %3819 = vmatprep.subr.bf16.mxu1 %v8241_v63  ;;  %v8289_v63 = vld [vmem:[%s9985_s0 + $0x30] sm:$0xff]  }
0x1379   : > { %3820 = vmatpush1.bf16.msra.mxu1 %v8239_v49  ;;  %v8291_v49 = vld [vmem:[%s9985_s0 + $0x78] sm:$0xff]  }
0x137a   : > { %3821 = vmatprep.subr.bf16.mxu1 %v8247_v55  ;;  %v8293_v55 = vld [vmem:[%s9985_s0 + $0x38] sm:$0xff]  }
0x143b   : > { %v7595_v6 = vpop.f32.mrb[30].mxu1 }
0x143c   : > { %v3483_v7 = vpop.f32.mrb[31].mxu1 }
0x143d   : > { %v3492_v8 = vpack.c.bf16 %v7595_v6, %v3483_v7 }
0x143f   : > { %7599 = vmatmul.mubr.msk.bf16.vlgmr.msra.gmra.mrb[32].mxu0 %vm1532_vm0, %v3492_v8 }
0x1440   : > { %3886 = vmatprep.mubr.bf16.mxu0 %v9243_v4  ;;  %v8368_v4 = vld [vmem:[#allocation2 + $0x8] sm:$0xff]  ;;  %3855 = vmatpush1.bf16.msra.mxu0 %v8218_v18 }
0x1441   : > { %3856 = vmatprep.subr.bf16.mxu0 %v8226_v27  ;;  %v8267_v18 = vld [vmem:[%s9985_s0 + $0x48] sm:$0xff]  }
0x1442   : > { %v8270_v27 = vld [vmem:[%s9985_s0 + $0x88] sm:$0xff]  }
0x1444   : > { %3857 = vmatpush1.bf16.msra.mxu0 %v8224_v32  ;;  %v8272_v32 = vld [vmem:[%s9985_s0 + $0xd0] sm:$0xff]  }
0x1445   : > { %3858 = vmatprep.subr.bf16.mxu0 %v8232_v48  ;;  %v8282_v48 = vld [vmem:[%s9985_s0 + $0xa0] sm:$0xff]  }
0x1448   : > { %3859 = vmatpush1.bf16.msra.mxu0 %v8230_v25  ;;  %v8284_v25 = vld [vmem:[%s9985_s0 + $0xe8] sm:$0xff]  }
0x1449   : > { %3860 = vmatprep.subr.bf16.mxu0 %v8238_v52  ;;  %v8286_v52 = vld [vmem:[%s9985_s0 + $0xa8] sm:$0xff]  }
0x144c   : > { %3861 = vmatpush1.bf16.msra.mxu0 %v8236_v53  ;;  %v8288_v53 = vld [vmem:[%s9985_s0 + $0xf0] sm:$0xff]  }
0x144d   : > { %3862 = vmatprep.subr.bf16.mxu0 %v8244_v0  ;;  %v8290_v0 = vld [vmem:[%s9985_s0 + $0xb0] sm:$0xff]  }
0x1512   : > { %v3536_v10 = vpop.f32.mrb[32].mxu0 }
0x1513   : > { %v3543_v40 = vadd.f32 %v3536_v10, %v3290_v54  ;;  %v7600_v11 = vpop.f32.mrb[33].mxu0  ;;  %v8242_v54 = vld [vmem:[%s9981_s11 + $0x88] ss:$16 sps:$4 sm:$0xff]  }
0x1514   : > { %v3539_v33 = vpop.f32.mrb[34].mxu0  ;;  %3863 = vmatpush1.bf16.msra.mxu0 %v8242_v54  ;;  %v8292_v54 = vld [vmem:[%s9985_s0 + $0xf8] sm:$0xff]  }
0x1515   : > { %v3551_v12 = vadd.f32 %v7036_v9, %v3543_v40  ;;  %v3544_v13 = vadd.f32 %v3539_v33, %v3291_v57  ;;  %v7601_v14 = vpop.f32.mrb[35].mxu0  ;;  %v8245_v57 = vld [vmem:[%s9981_s11 + $0xa0] ss:$16 sps:$4 sm:$0xff]   ;;  %3864 = vmatprep.subr.bf16.mxu0 %v8250_v56  ;;  %v7037_v33 = vld [vmem:[%s1000_s30] ss:$0 sm:$0xff]  ;;  %s10986_s30 = sld [smem:[#allocation62_spill]] (!%p7106_p12) }
0x1516   : > { %3822 = vmatpush1.bf16.msra.mxu1 %v8245_v57  ;;  %v8294_v56 = vld [vmem:[%s9985_s0 + $0xb8] sm:$0xff]   ;;  %s9263_s11 = smov (!%p7106_p12), 32  }
0x1517   : > { %v3552_v16 = vadd.f32 %v7036_v9, %v3544_v13  ;;  %v3553_v17 = vadd.f32 %v8367_v38, %v3551_v12  ;;  %3823 = vmatprep.subr.bf16.mxu1 %v8253_v31  ;;  %v3629_v57 = vld [vmem:[%s9983_s10] sm:$0xf]  ;;  %s9264_s10 = smov (!%p7106_p12), 16  }
0x1518   : > { %3865 = vmatpush1.bf16.msra.mxu0 %v8248_v58  ;;  %v3645_v58 = vsub.s32 3, %v10036_v23  ;;  %v3642_v31 = vrot.slane %v3629_v57, %v1313_v30 }
0x1519   : > { %3557 = vadd.xlane.f32.xlu1 %v3553_v17  ;;  %v3554_v19 = vadd.f32 %v8368_v4, %v3552_v16  ;;  %3866 = vmatprep.subr.bf16.mxu0 %v8256_v35  ;;  %v7038_v16 = vld [vmem:[%s1008_s26] ss:$0 sm:$0xff]  ;;  %s9262_s26 = smov (!%p7106_p12), 48  }
0x151a   : > { %3824 = vmatpush1.bf16.msra.mxu1 %v8251_v59  ;;  %v3634_v59 = vrot.slane %v3629_v57, %v10039_v24  ;;  %v3646_v35 = vrot.slane %v3629_v57, %v3645_v58 }
0x151b   : > { %3825 = vmatprep.subr.bf16.mxu1 %v8259_v61 }
0x151c   : > { %3867 = vmatpush1.bf16.msra.mxu0 %v8254_v60  ;;  %v3638_v60 = vrot.slane %v3629_v57, %v10045_v26 }
0x151d   : > { %3559 = vadd.xlane.f32.xlu1 %v3554_v19  ;;  %3868 = vmatprep.subr.bf16.mxu0 %v8262_v62 }
0x151e   : > { %3826 = vmatpush1.bf16.msra.mxu1 %v8257_v37 }
0x151f   : > { %7291 = vmatprep.subr.bf16.mxu1 %v8263_v2 }
0x1520   : > { %3869 = vmatpush1.bf16.msra.mxu0 %v8260_v1 }
0x1521   : > { %7313 = vmatprep.subr.bf16.mxu0 %v8264_v3 }
0x15a6   : > { %v3558_v36 = vpop.xlane.xlu1 %3557 }
0x15a7   : > { %v3562_v41 = vmul.f32 0.0078125, %v3558_v36  ;;  %v8273_v36 = vld [vmem:[%s9985_s0 + $0x10] sm:$0xff]  }
0x15a9   : > { %v10347_v42 = vsub.f32 %v3553_v17, %v3562_v41  ;;  %v8274_v41 = vld [vmem:[%s9985_s0 + $0x90] sm:$0xff]  }
0x15aa   : > { %v3560_v44 = vpop.xlane.xlu1 %3559 }
0x15ab   : > { %v3563_v28 = vmul.f32 0.0078125, %v3560_v44  ;;  %v3566_v45 = vmul.f32 %v10347_v42, %v10347_v42  ;;  %v8276_v44 = vld [vmem:[%s9985_s0 + $0xd8] sm:$0xff]  }
0x15ad   : > { %v10351_v34 = vsub.f32 %v3554_v19, %v3563_v28  ;;  %3568 = vadd.xlane.f32.xlu1 %v3566_v45  ;;  %v8265_v19 = vld [vmem:[%s9985_s0] sm:$0xff]   ;;  %v8277_v28 = vld [vmem:[%s9985_s0 + $0x18] sm:$0xff]  }
0x15ae   : > { %v8278_v45 = vld [vmem:[%s9985_s0 + $0x98] sm:$0xff]  }
0x15af   : > { %v3567_v47 = vmul.f32 %v10351_v34, %v10351_v34 }
0x15b1   : > { %3570 = vadd.xlane.f32.xlu1 %v3567_v47  ;;  %v8280_v47 = vld [vmem:[%s9985_s0 + $0xe0] sm:$0xff]  }
0x163a   : > { %v3569_v5 = vpop.xlane.xlu1 %3568 }
0x163b   : > { %v3572_v6 = vmul.f32 0.0078125, %v3569_v5 }
0x163d   : > { %v3574_v7 = vadd.f32 1e-05, %v3572_v6 }
0x163e   : > { %v3571_v8 = vpop.xlane.xlu1 %3570 }
0x163f   : > { %8359 = vrsqrt.f32 %v3574_v7  ;;  %v3573_v9 = vmul.f32 0.0078125, %v3571_v8 }
0x1641   : > { %v3575_v10 = vadd.f32 1e-05, %v3573_v9 }
0x1643   : > { %8361 = vrsqrt.f32 %v3575_v10 }
0x1649   : > { %v8360_v40 = vpop.eup %8359 }
0x164a   : > { %v3578_v11 = vmul.f32 %v8360_v40, %v10347_v42  ;;  %v8275_v42 = vld [vmem:[%s9985_s0 + $0x58] sm:$0xff]  }
0x164c   : > { %v3586_v14 = vmul.f32 %v7037_v33, %v3578_v11 }
0x164d   : > { %v8362_v12 = vpop.eup %8361 }
0x164e   : > { %v3579_v13 = vmul.f32 %v8362_v12, %v10351_v34  ;;  %v10387_v17 = vadd.f32 %v7038_v16, %v3586_v14  ;;  %v8279_v34 = vld [vmem:[%s9985_s0 + $0x60] sm:$0xff]  }
0x1650   : > { %v3587_v38 = vmul.f32 %v7037_v33, %v3579_v13 }
0x1652   : > { %v10389_v4 = vadd.f32 %v7038_v16, %v3587_v38 }
0x1654   : > { %v3628_v20 = vpack.c.bf16 %v10389_v4, %v10387_v17 }
0x1656   : > { %3844 = vmatmul.mubr.bf16.vlgmr.msra.gmra.mrb[36].mxu1 %v3628_v20  ;;  %3887 = vmatmul.mubr.bf16.vlgmr.msra.gmra.mrb[36].mxu0 %v3628_v20 }
0x1657   : > { %7292 = vmatpush3.bf16.msra.mxu1 %v8265_v19  ;;  %7314 = vmatpush3.bf16.msra.mxu0 %v8266_v15 }
0x1658   : > { %7293 = vmatprep.subr.bf16.mxu1 %v8267_v18  ;;  %7315 = vmatprep.subr.bf16.mxu0 %v8268_v21 }
0x165b   : > { %7294 = vmatpush3.bf16.msra.mxu1 %v8269_v22  ;;  %7316 = vmatpush3.bf16.msra.mxu0 %v8270_v27 }
0x165c   : > { %7295 = vmatprep.subr.bf16.mxu1 %v8271_v29  ;;  %7317 = vmatprep.subr.bf16.mxu0 %v8272_v32  ;;  %v7071_v32 = vld [vmem:[%s1043_s28] ss:$0 sm:$0xff] }
0x165f   : > { %7296 = vmatpush3.bf16.msra.mxu1 %v8273_v36  ;;  %7318 = vmatpush3.bf16.msra.mxu0 %v8274_v41 }
0x1660   : > { %7297 = vmatprep.subr.bf16.mxu1 %v8275_v42  ;;  %7319 = vmatprep.subr.bf16.mxu0 %v8276_v44 }
0x1663   : > { %7298 = vmatpush3.bf16.msra.mxu1 %v8277_v28  ;;  %7320 = vmatpush3.bf16.msra.mxu0 %v8278_v45 }
0x1664   : > { %7299 = vmatprep.subr.bf16.mxu1 %v8279_v34  ;;  %7321 = vmatprep.subr.bf16.mxu0 %v8280_v47 }
0x1667   : > { %7300 = vmatpush3.bf16.msra.mxu1 %v8281_v43  ;;  %7322 = vmatpush3.bf16.msra.mxu0 %v8282_v48 }
0x1668   : > { %7301 = vmatprep.subr.bf16.mxu1 %v8283_v50  ;;  %7323 = vmatprep.subr.bf16.mxu0 %v8284_v25 }
0x166b   : > { %7302 = vmatpush3.bf16.msra.mxu1 %v8285_v51  ;;  %7324 = vmatpush3.bf16.msra.mxu0 %v8286_v52 }
0x166c   : > { %7303 = vmatprep.subr.bf16.mxu1 %v8287_v46  ;;  %7325 = vmatprep.subr.bf16.mxu0 %v8288_v53 }
0x166f   : > { %7304 = vmatpush3.bf16.msra.mxu1 %v8289_v63  ;;  %7326 = vmatpush3.bf16.msra.mxu0 %v8290_v0 }
0x1670   : > { %7305 = vmatprep.subr.bf16.mxu1 %v8291_v49  ;;  %7327 = vmatprep.subr.bf16.mxu0 %v8292_v54 }
0x1673   : > { %7306 = vmatpush3.bf16.msra.mxu1 %v8293_v55  ;;  %7328 = vmatpush3.bf16.msra.mxu0 %v8294_v56 }
0x1729   : > { %v3845_v61 = vpop.f32.mrb[36].mxu1  ;;  %v3888_v62 = vpop.f32.mrb[36].mxu0 }
0x172a   : > { %v3846_v37 = vadd.f32 %v3845_v61, %v3634_v59  ;;  %v3889_v1 = vadd.f32 %v3888_v62, %v3642_v31  ;;  %v3847_v2 = vpop.f32.mrb[37].mxu1  ;;  %v3890_v3 = vpop.f32.mrb[37].mxu0  ;;  %v7104_v62 = vld [vmem:[%s1051_s8] ss:$0 sm:$0xff] }
0x172b   : > { %v3848_v5 = vadd.f32 %v3847_v2, %v3638_v60  ;;  %v3891_v6 = vadd.f32 %v3890_v3, %v3646_v35  ;;  %v3849_v7 = vpop.f32.mrb[38].mxu1  ;;  %v3892_v8 = vpop.f32.mrb[38].mxu0 }
0x172c   : > { %v3850_v9 = vadd.f32 %v3849_v7, %v3634_v59  ;;  %v3893_v10 = vadd.f32 %v3892_v8, %v3642_v31  ;;  %v3851_v40 = vpop.f32.mrb[39].mxu1  ;;  %v3894_v11 = vpop.f32.mrb[39].mxu0  ;;  %v3897_v30 = vmax.f32 %v3846_v37, 0.0  ;;  %v3899_v12 = vmax.f32 %v3889_v1, 0.0  ;;  %v7105_v1 = vld [vmem:[%s1059_s9] ss:$0 sm:$0xff] }
0x172d   : > { %v3852_v33 = vadd.f32 %v3851_v40, %v3638_v60  ;;  %v3895_v23 = vadd.f32 %v3894_v11, %v3646_v35  ;;  %v3898_v16 = vmax.f32 %v3848_v5, 0.0  ;;  %v3900_v38 = vmax.f32 %v3891_v6, 0.0  ;;  %v8407_v11 = vld [vmem:[#allocation19 + $0x14] ss:$8 sps:$4 sm:$0xff] (!%p7106_p12)  }
0x172e   : > { %v3901_v13 = vmax.f32 %v3850_v9, 0.0  ;;  %v3903_v14 = vmax.f32 %v3893_v10, 0.0  ;;  %v8404_v9 = vld [vmem:[#allocation19 + $0x4] ss:$8 sps:$4 sm:$0xff] (!%p7106_p12)   ;;  %v8406_v10 = vld [vmem:[#allocation19] ss:$8 sps:$4 sm:$0xff] (!%p7106_p12)  }
0x172f   : > { %v3902_v19 = vmax.f32 %v3852_v33, 0.0  ;;  %v3904_v15 = vmax.f32 %v3895_v23, 0.0  ;;  %v9254_v40 = vmov (!%p7106_p12), 0   ;;  %4413 = vmatprep.subr.bf16.mxu0 (!%p7106_p12), %v8404_v9  ;;  %v8409_v33 = vld [vmem:[#allocation19 + $0x10] ss:$8 sps:$4 sm:$0xff] (!%p7106_p12)  }
0x1730   : > { %v3969_v20 = vpack.c.bf16 %v3901_v13, %v3897_v30  ;;  %v3971_v18 = vpack.c.bf16 %v3903_v14, %v3899_v12  ;;  %v8410_v23 = vld [vmem:[#allocation19 + $0x24] ss:$8 sps:$4 sm:$0xff] (!%p7106_p12)   ;;  %v8412_v30 = vld [vmem:[#allocation19 + $0x20] ss:$8 sps:$4 sm:$0xff] (!%p7106_p12)   ;;  %v8413_v12 = vld [vmem:[#allocation19 + $0x34] ss:$8 sps:$4 sm:$0xff] (!%p7106_p12)  }
0x1731   : > { %v3970_v21 = vpack.c.bf16 %v3902_v19, %v3898_v16  ;;  %v3972_v22 = vpack.c.bf16 %v3904_v15, %v3900_v38  ;;  %v8415_v13 = vld [vmem:[#allocation19 + $0x30] ss:$8 sps:$4 sm:$0xff] (!%p7106_p12)   ;;  %v8416_v14 = vld [vmem:[#allocation19 + $0x44] ss:$8 sps:$4 sm:$0xff] (!%p7106_p12)   ;;  %v8418_v16 = vld [vmem:[#allocation19 + $0x40] ss:$8 sps:$4 sm:$0xff] (!%p7106_p12)  }
0x1732   : > { %v8419_v38 = vld [vmem:[#allocation19 + $0x54] ss:$8 sps:$4 sm:$0xff] (!%p7106_p12)   ;;  %v8421_v19 = vld [vmem:[#allocation19 + $0x50] ss:$8 sps:$4 sm:$0xff] (!%p7106_p12)   ;;  %v8422_v15 = vld [vmem:[#allocation19 + $0x64] ss:$8 sps:$4 sm:$0xff] (!%p7106_p12)  }
0x1733   : > { %4204 = vmatprep.mubr.bf16.mxu1 %v3970_v21  ;;  %4245 = vmatprep.mubr.bf16.mxu0 %v3972_v22  ;;  %v8437_v21 = vld [vmem:[#allocation22] sm:$0xff] (!%p7106_p12)   ;;  %v8425_v22 = vld [vmem:[#allocation19 + $0x74] ss:$8 sps:$4 sm:$0xff] (!%p7106_p12)  }
0x1734   : > { %4205 = vmatmul.mubr.bf16.vlgmr.msra.gmra.mrb[40].mxu1 %v3969_v20  ;;  %4246 = vmatmul.mubr.bf16.vlgmr.msra.gmra.mrb[40].mxu0 %v3971_v18  ;;  %v8436_v20 = vld [vmem:[#allocation22 + $0x40] sm:$0xff] (!%p7106_p12)  }
0x1735   : > { %4445 = vmatprep.mubr.bf16.mxu0 (!%p7106_p12), %v9254_v40  ;;  %4414 = vmatpush1.bf16.msra.mxu0 (!%p7106_p12), %v8406_v10  ;;  %v8424_v18 = vld [vmem:[#allocation19 + $0x60] ss:$8 sps:$4 sm:$0xff] (!%p7106_p12)  }
0x1736   : > { %4415 = vmatprep.subr.bf16.mxu0 (!%p7106_p12), %v8407_v11  ;;  %7335 = vmatprep.subr.bf16.mxu1 (!%p7106_p12), %v8436_v20 }
0x1737   : > { %7336 = vmatpush3.bf16.msra.mxu1 (!%p7106_p12), %v8437_v21 }
0x1739   : > { %4416 = vmatpush1.bf16.msra.mxu0 (!%p7106_p12), %v8409_v33 }
0x173a   : > { %4417 = vmatprep.subr.bf16.mxu0 (!%p7106_p12), %v8410_v23 }
0x173d   : > { %4418 = vmatpush1.bf16.msra.mxu0 (!%p7106_p12), %v8412_v30 }
0x173e   : > { %4419 = vmatprep.subr.bf16.mxu0 (!%p7106_p12), %v8413_v12 }
0x1741   : > { %4420 = vmatpush1.bf16.msra.mxu0 (!%p7106_p12), %v8415_v13 }
0x1742   : > { %4421 = vmatprep.subr.bf16.mxu0 (!%p7106_p12), %v8416_v14 }
0x1745   : > { %4422 = vmatpush1.bf16.msra.mxu0 (!%p7106_p12), %v8418_v16 }
0x1746   : > { %4423 = vmatprep.subr.bf16.mxu0 (!%p7106_p12), %v8419_v38 }
0x1749   : > { %4424 = vmatpush1.bf16.msra.mxu0 (!%p7106_p12), %v8421_v19 }
0x174a   : > { %4425 = vmatprep.subr.bf16.mxu0 (!%p7106_p12), %v8422_v15  ;;  %v4659_v15 = vld [vmem:[#allocation25] sm:$0x1] (!%p7106_p12) }
0x174d   : > { %4426 = vmatpush1.bf16.msra.mxu0 (!%p7106_p12), %v8424_v18  ;;  %v7123_v18 = vld [vmem:[%s10987_s5] ss:$0 sm:$0xff] (!%p7106_p12) }
0x174e   : > { %4427 = vmatprep.subr.bf16.mxu0 (!%p7106_p12), %v8425_v22 }
0x1807   : > { %v7307_v27 = vpop.f32.mrb[40].mxu1  ;;  %v7329_v29 = vpop.f32.mrb[40].mxu0 }
0x1808   : > { %v7308_v36 = vpop.f32.mrb[41].mxu1  ;;  %v7330_v41 = vpop.f32.mrb[41].mxu0 }
0x1809   : > { %v7309_v42 = vadd.f32 %v7308_v36, %v7307_v27  ;;  %v7331_v44 = vadd.f32 %v7330_v41, %v7329_v29  ;;  %v7310_v28 = vpop.f32.mrb[42].mxu1  ;;  %v7332_v45 = vpop.f32.mrb[42].mxu0  ;;  %v8438_v27 = vld [vmem:[#allocation22 + $0x48] sm:$0xff] (!%p7106_p12)   ;;  %v8441_v41 = vld [vmem:[#allocation22 + $0x10] sm:$0xff] (!%p7106_p12)  }
0x180a   : > { %v7311_v34 = vpop.f32.mrb[43].mxu1  ;;  %v7333_v47 = vpop.f32.mrb[43].mxu0  ;;  %v8439_v29 = vld [vmem:[#allocation22 + $0x8] sm:$0xff] (!%p7106_p12)   ;;  %7337 = vmatprep.subr.bf16.mxu1 (!%p7106_p12), %v8438_v27 }
0x180b   : > { %v4207_v43 = vadd.f32 %v7309_v42, %v7071_v32  ;;  %v7312_v48 = vadd.f32 %v7311_v34, %v7310_v28  ;;  %v7334_v50 = vadd.f32 %v7333_v47, %v7332_v45  ;;  %v8427_v36 = vld [vmem:[#allocation19 + $0x70] ss:$8 sps:$4 sm:$0xff] (!%p7106_p12)   ;;  %7338 = vmatpush3.bf16.msra.mxu1 (!%p7106_p12), %v8439_v29  ;;  %v8428_v28 = vld [vmem:[%s10986_s30] sm:$0xff] (!%p7106_p12)   ;;  %v9255_v47 = vmov (!%p7106_p12), 0.0  }
0x180c   : > { %v8442_v42 = vld [vmem:[#allocation22 + $0x58] sm:$0xff] (!%p7106_p12)   ;;  %4428 = vmatpush1.bf16.msra.mxu0 (!%p7106_p12), %v8427_v36  ;;  %v8444_v34 = vld [vmem:[#allocation22 + $0x60] sm:$0xff] (!%p7106_p12)  }
0x180d   : > { %v4248_v25 = vadd.f32 %v7331_v44, %v4207_v43  ;;  %v4210_v51 = vadd.f32 %v7312_v48, %v7071_v32  ;;  %v8440_v32 = vld [vmem:[#allocation22 + $0x50] sm:$0xff] (!%p7106_p12)   ;;  %v8443_v45 = vld [vmem:[#allocation22 + $0x18] sm:$0xff] (!%p7106_p12)   ;;  %7602 = vmatprep.subr.bf16.mxu0 (!%p7106_p12), %v9255_v47  ;;  %v8429_v43 = vld [vmem:[%s10986_s30 + $0x8] sm:$0xff] (!%p7106_p12)  }
0x180e   : > { %7339 = vmatprep.subr.bf16.mxu1 (!%p7106_p12), %v8440_v32  ;;  %v8445_v48 = vld [vmem:[#allocation22 + $0x20] sm:$0xff] (!%p7106_p12)  }
0x180f   : > { %v4251_v52 = vadd.f32 %v7334_v50, %v4210_v51  ;;  %v4254_v46 = vadd.f32 %v4248_v25, %v10387_v17  ;;  %7340 = vmatpush3.bf16.msra.mxu1 (!%p7106_p12), %v8441_v41  ;;  %v8446_v50 = vld [vmem:[#allocation22 + $0x68] sm:$0xff] (!%p7106_p12)   ;;  %v8431_v51 = vld [vmem:[%s10986_s30 + $0x18] sm:$0xff] (!%p7106_p12)  }
0x1810   : > { %7341 = vmatprep.subr.bf16.mxu1 (!%p7106_p12), %v8442_v42  ;;  %v8430_v25 = vld [vmem:[%s10986_s30 + $0x10] sm:$0xff] (!%p7106_p12)  }
0x1811   : > { %4258 = vadd.xlane.f32.xlu1 %v4254_v46  ;;  %v4255_v53 = vadd.f32 %v4251_v52, %v10389_v4  ;;  %v8432_v52 = vld [vmem:[%s10986_s30 + $0x20] sm:$0xff] (!%p7106_p12)  }
0x1813   : > { %7342 = vmatpush3.bf16.msra.mxu1 (!%p7106_p12), %v8443_v45 }
0x1814   : > { %7343 = vmatprep.subr.bf16.mxu1 (!%p7106_p12), %v8444_v34 }
0x1815   : > { %4260 = vadd.xlane.f32.xlu1 %v4255_v53 }
0x1817   : > { %7344 = vmatpush3.bf16.msra.mxu1 (!%p7106_p12), %v8445_v48 }
0x1818   : > { %7345 = vmatprep.subr.bf16.mxu1 (!%p7106_p12), %v8446_v50 }
0x189e   : > { %v4259_v63 = vpop.xlane.xlu1 %4258 }
0x189f   : > { %v4262_v0 = vmul.f32 0.0078125, %v4259_v63  ;;  %v8435_v63 = vld [vmem:[%s10986_s30 + $0x38] sm:$0xff] (!%p7106_p12)  }
0x18a1   : > { %v4264_v49 = vsub.f32 %v4254_v46, %v4262_v0  ;;  %v8433_v46 = vld [vmem:[%s10986_s30 + $0x28] sm:$0xff] (!%p7106_p12)   ;;  %v4640_v0 = vld [vmem:[#allocation6] sm:$0xff] (!%p7106_p12) }
0x18a2   : > { %v4261_v54 = vpop.xlane.xlu1 %4260 }
0x18a3   : > { %v4263_v55 = vmul.f32 0.0078125, %v4261_v54  ;;  %v4266_v56 = vmul.f32 %v4264_v49, %v4264_v49 }
0x18a5   : > { %v4265_v57 = vsub.f32 %v4255_v53, %v4263_v55  ;;  %4268 = vadd.xlane.f32.xlu0 %v4266_v56  ;;  %v8434_v53 = vld [vmem:[%s10986_s30 + $0x30] sm:$0xff] (!%p7106_p12)  }
0x18a6   : > { %v8447_v55 = vld [vmem:[#allocation22 + $0x28] sm:$0xff] (!%p7106_p12)   ;;  %v8448_v56 = vld [vmem:[#allocation22 + $0x70] sm:$0xff] (!%p7106_p12)  }
0x18a7   : > { %v4267_v58 = vmul.f32 %v4265_v57, %v4265_v57  ;;  %7346 = vmatpush3.bf16.msra.mxu1 (!%p7106_p12), %v8447_v55 }
0x18a8   : > { %7347 = vmatprep.subr.bf16.mxu1 (!%p7106_p12), %v8448_v56 }
0x18a9   : > { %4270 = vadd.xlane.f32.xlu1 %v4267_v58  ;;  %v8450_v58 = vld [vmem:[#allocation22 + $0x78] sm:$0xff] (!%p7106_p12)  }
0x1932   : > { %v4269_v59 = vpop.xlane.xlu0 %4268 }
0x1933   : > { %v4272_v31 = vmul.f32 0.0078125, %v4269_v59  ;;  %v8451_v59 = vld [vmem:[#allocation22 + $0x38] sm:$0xff] (!%p7106_p12)  }
0x1935   : > { %v4274_v60 = vadd.f32 1e-05, %v4272_v31  ;;  %v9257_v31 = vmov (!%p7106_p12), 0.0|0.0  }
0x1936   : > { %v4271_v17 = vpop.xlane.xlu1 %4270 }
0x1937   : > { %8363 = vrsqrt.f32 %v4274_v60  ;;  %v4273_v35 = vmul.f32 0.0078125, %v4271_v17  ;;  %v4321_v60 = vld [vmem:[#allocation20] sm:$0x3] (!%p7106_p12) }
0x1938   : > { %v4326_v17 = vrot.slane (!%p7106_p12), %v4321_v60, %v10039_v24 }
0x1939   : > { %v4275_v4 = vadd.f32 1e-05, %v4273_v35  ;;  %v4330_v35 = vrot.slane (!%p7106_p12), %v4321_v60, %v10045_v26  ;;  %v7148_v26 = vld [vmem:[#allocation23] ss:$0 sm:$0xff] (!%p7106_p12) }
0x193b   : > { %8365 = vrsqrt.f32 %v4275_v4 }
0x1941   : > { %v8364_v61 = vpop.eup %8363 }
0x1942   : > { %v4278_v37 = vmul.f32 %v8364_v61, %v4264_v49  ;;  %v4641_v49 = vld [vmem:[#allocation6 + $0x8] sm:$0xff] (!%p7106_p12) }
0x1943   : > { %v4661_v54 = vpack.c.bf16 (!%p7106_p12), %v4641_v49, %v4640_v0 }
0x1944   : > { %v4286_v2 = vmul.f32 %v7104_v62, %v4278_v37 }
0x1945   : > { %v8366_v3 = vpop.eup %8365 }
0x1946   : > { %v10437_v5 = vadd.f32 %v7105_v1, %v4286_v2  ;;  %v4279_v6 = vmul.f32 %v8366_v3, %v4265_v57  ;;  %4301 = sbr.rel (%p7106_p12) target bundleno = 10338 (0x2862), region = 192  ;;  %v8449_v57 = vld [vmem:[#allocation22 + $0x30] sm:$0xff] (!%p7106_p12)  }
0x1947   : > { %7348 = vmatpush3.bf16.msra.mxu1 (!%p7106_p12), %v8449_v57 }
0x1948   : > { %4296 = vst [vmem:[#allocation2] sm:$0xff] %v10437_v5  ;;  %v4287_v7 = vmul.f32 %v7104_v62, %v4279_v6  ;;  %4302 = vst [vmem:[#allocation28] sm:$0xff] (!%p7106_p12), %v10437_v5  ;;  %7349 = vmatprep.subr.bf16.mxu1 (!%p7106_p12), %v8450_v58 }
0x194a   : > { %v4295_v8 = vadd.f32 %v7105_v1, %v4287_v7 }
0x194b   : > { %7350 = vmatpush3.bf16.msra.mxu1 (!%p7106_p12), %v8451_v59 }
0x194c   : > { %4297 = vst [vmem:[#allocation2 + $0x8] sm:$0xff] %v4295_v8  ;;  %4303 = vst [vmem:[#allocation28 + $0x8] sm:$0xff] (!%p7106_p12), %v4295_v8  ;;  %v4320_v44 = vpack.c.bf16 (!%p7106_p12), %v4295_v8, %v10437_v5  ;;  %7814 = vmatprep.subr.bf16.mxu1 (!%p7106_p12), %v9257_v31 }
0x194e   : > { %4446 = vmatmul.mubr.bf16.vlgmr.msra.gmra.mrb[0].mxu0 %v4320_v44 }
0x194f   : > { %7603 = vmatpush3.bf16.msra.mxu0 %v8428_v28  ;;  %7618 = vmatprep.mubr.msk.bf16.mxu0 %vm9256_vm5, %v9255_v47 }
0x1950   : > { %7604 = vmatprep.subr.bf16.mxu0 %v9255_v47 }
0x1953   : > { %7605 = vmatpush3.bf16.msra.mxu0 %v8429_v43 }
0x1954   : > { %7606 = vmatprep.subr.bf16.mxu0 %v9255_v47 }
0x1957   : > { %7607 = vmatpush3.bf16.msra.mxu0 %v8430_v25 }
0x1958   : > { %7608 = vmatprep.subr.bf16.mxu0 %v9255_v47 }
0x195b   : > { %7609 = vmatpush3.bf16.msra.mxu0 %v8431_v51 }
0x195c   : > { %7610 = vmatprep.subr.bf16.mxu0 %v9255_v47 }
0x195f   : > { %7611 = vmatpush3.bf16.msra.mxu0 %v8432_v52 }
0x1960   : > { %7612 = vmatprep.subr.bf16.mxu0 %v9255_v47 }
0x1963   : > { %7613 = vmatpush3.bf16.msra.mxu0 %v8433_v46 }
0x1964   : > { %7614 = vmatprep.subr.bf16.mxu0 %v9255_v47 }
0x1967   : > { %7615 = vmatpush3.bf16.msra.mxu0 %v8434_v53 }
0x1968   : > { %7616 = vmatprep.subr.bf16.mxu0 %v9255_v47 }
0x196b   : > { %7617 = vmatpush3.bf16.msra.mxu0 %v8435_v63 }
0x196c   : > { %7838 = vmatprep.subr.bf16.mxu0 %v9257_v31 }
0x196e   : > { %7619 = vmatmul.mubr.bf16.vlgmr.msra.gmra.mrb[4].mxu0 %v4661_v54 }
0x196f   : > { %7668 = vmatprep.mubr.msk.f32.mxu0 %vm9256_vm5, %v9255_v47 }
0x1a21   : > { %v4447_v4 = vpop.f32.mrb[0].mxu0 }
0x1a22   : > { %v4448_v61 = vadd.f32 %v4447_v4, %v4326_v17  ;;  %v4449_v62 = vpop.f32.mrb[1].mxu0 }
0x1a23   : > { %v4450_v37 = vadd.f32 %v4449_v62, %v4330_v35  ;;  %v4451_v1 = vpop.f32.mrb[2].mxu0 }
0x1a24   : > { %v4456_v2 = vmax.f32 %v4448_v61, 0.0  ;;  %v4452_v3 = vadd.f32 %v4451_v1, %v4326_v17  ;;  %v4453_v5 = vpop.f32.mrb[3].mxu0  ;;  %v10508_v17 = vrot.slane %v4659_v15, %v10039_v24 }
0x1a25   : > { %v4454_v6 = vadd.f32 %v4453_v5, %v4330_v35  ;;  %v4457_v8 = vmax.f32 %v4450_v37, 0.0 }
0x1a26   : > { %v4458_v7 = vmax.f32 %v4452_v3, 0.0 }
0x1a27   : > { %v4459_v9 = vmax.f32 %v4454_v6, 0.0 }
0x1a28   : > { %v4492_v10 = vpack.c.bf16 %v4458_v7, %v4456_v2 }
0x1a29   : > { %v4493_v40 = vpack.c.bf16 %v4459_v9, %v4457_v8 }
0x1a2b   : > { %4629 = vmatprep.mubr.bf16.mxu1 %v4493_v40 }
0x1a2c   : > { %4630 = vmatmul.mubr.bf16.vlgmr.msra.gmra.mrb[0].mxu1 %v4492_v10 }
0x1a2d   : > { %7626 = vmatprep.mubr.msk.f32.mxu1 %vm9256_vm5, %v9255_v47 }
0x1a41   : > { %v4744_v11 = vpop.f32.mrb[4].mxu0 }
0x1a42   : > { %v10485_v33 = vmul.f32 %v7148_v26, %v4744_v11  ;;  %v7620_v23 = vpop.f32.mrb[5].mxu0 }
0x1a43   : > { %v4747_v30 = vpop.f32.mrb[6].mxu0 }
0x1a44   : > { %v10487_v12 = vmul.f32 %v7148_v26, %v4747_v30  ;;  %v7621_v13 = vpop.f32.mrb[7].mxu0  ;;  %v4759_v14 = vsel %vm1532_vm0, %v10485_v33, 0.0  ;;  %v7815_v16 = vpack.c.bf16 %v4747_v30, %v4744_v11  ;;  %v10491_v38 = vpack.i.bf16 %v4747_v30, %v4744_v11 }
0x1a45   : > { %4760 = vadd.xlane.f32.xlu0 %v4759_v14 }
0x1a46   : > { %7817 = vmatpush3.bf16.xpose.msk.msra.mxu1 %vm10059_vm1, %v7815_v16  ;;  %v4762_v19 = vsel %vm1532_vm0, %v10487_v12, 0.0 }
0x1a47   : > { %7819 = vmatprep.subr.bf16.mxu1 %v7815_v16 }
0x1a49   : > { %4763 = vadd.xlane.f32.xlu0 %v4762_v19 }
0x1a4d   : > { %7627 = vmatmul.mubr.msk.f32.vlgmr.msra.gmra.mrb[4].mxu1 %vm1532_vm0, %v4659_v15 }
0x1a4e   : > { %7821 = vmatpush3.bf16.msra.mxu1 %v7815_v16 }
0x1a4f   : > { %7822 = vmatprep.subr.bf16.mxu1 %v9257_v31 }
0x1ad2   : > { %v4761_v42 = vpop.xlane.xlu0 %4760 }
0x1ad6   : > { %v4764_v34 = vpop.xlane.xlu0 %4763 }
0x1aff   : > { %v7351_v20 = vpop.f32.mrb[0].mxu1 }
0x1b00   : > { %v7352_v21 = vpop.f32.mrb[1].mxu1 }
0x1b01   : > { %v7353_v22 = vadd.f32 %v7352_v21, %v7351_v20  ;;  %v7354_v27 = vpop.f32.mrb[2].mxu1 }
0x1b02   : > { %v7355_v29 = vpop.f32.mrb[3].mxu1 }
0x1b03   : > { %v4632_v32 = vadd.f32 %v7353_v22, %v7123_v18  ;;  %v7356_v36 = vadd.f32 %v7355_v29, %v7354_v27 }
0x1b05   : > { %4638 = vst [vmem:[#allocation29] sm:$0xff] %v4632_v32  ;;  %v4635_v41 = vadd.f32 %v7356_v36, %v7123_v18 }
0x1b07   : > { %4639 = vst [vmem:[#allocation29 + $0x8] sm:$0xff] %v4635_v41 }
0x1b20   : > { %v4840_v44 = vpop.f32.mrb[4].mxu1 }
0x1b21   : > { %v4847_v28 = vrot.slane %v4840_v44, %v10039_v24  ;;  %v7628_v45 = vpop.f32.mrb[5].mxu1 }
0x1b23   : > { %v4848_v43 = vadd.f32 %v4847_v28, %v4761_v42  ;;  %v4849_v48 = vadd.f32 %v4847_v28, %v4764_v34 }
0x1b25   : > { %vm4850_vm6 = vcmp.gt.f32.partialorder %v4848_v43, 0.0  ;;  %v4852_v50 = vmul.f32 0.2, %v4848_v43  ;;  %v4853_v25 = vmul.f32 0.2, %v4849_v48  ;;  %vm4851_vm7 = vcmp.gt.f32.partialorder %v4849_v48, 0.0 }
0x1b27   : > { %v4854_v51 = vsel %vm4850_vm6, %v4848_v43, %v4852_v50  ;;  %v4855_v46 = vsel %vm4851_vm7, %v4849_v48, %v4853_v25 }
0x1b28   : > { %v4856_v52 = vsel %vm1532_vm0, %v4854_v51, -inf  ;;  %v4859_v53 = vsel %vm1532_vm0, %v4855_v46, -inf }
0x1b29   : > { %4857 = vmax.xlane.f32.xlu1 %v4856_v52 }
0x1b2d   : > { %4860 = vmax.xlane.f32.xlu1 %v4859_v53 }
0x1bb6   : > { %v4858_v63 = vpop.xlane.xlu1 %4857 }
0x1bb7   : > { %v4862_v0 = vsub.f32 %v4854_v51, %v4858_v63 }
0x1bb9   : > { %v4864_v49 = vmul.f32 1.442695, %v4862_v0 }
0x1bba   : > { %v4861_v54 = vpop.xlane.xlu1 %4860 }
0x1bbb   : > { %8452 = vpow2.f32 %v4864_v49  ;;  %v4863_v55 = vsub.f32 %v4855_v46, %v4861_v54 }
0x1bbd   : > { %v4866_v56 = vmul.f32 1.442695, %v4863_v55 }
0x1bbf   : > { %8454 = vpow2.f32 %v4866_v56 }
0x1bc5   : > { %v8453_v57 = vpop.eup %8452 }
0x1bc6   : > { %v4868_v58 = vsel %vm1532_vm0, %v8453_v57, 0.0 }
0x1bc7   : > { %4869 = vadd.xlane.f32.xlu0 %v4868_v58 }
0x1bc9   : > { %v8455_v59 = vpop.eup %8454 }
0x1bca   : > { %v4871_v60 = vsel %vm1532_vm0, %v8455_v59, 0.0 }
0x1bcb   : > { %4872 = vadd.xlane.f32.xlu1 %v4871_v60 }
0x1bdc   : > { %4977 = vrot.lane.b32.xlu1 %v10508_v17, %s9258_s3 }
0x1bdd   : > { %8370 = vrot.lane.b32.xlu0 %v10491_v38, %s9258_s3 }
0x1be0   : > { %4961 = vrot.lane.b32.xlu1 %v10485_v33, %s9258_s3 }
0x1be4   : > { %4963 = vrot.lane.b32.xlu1 %v10487_v12, %s9258_s3 }
0x1c54   : > { %v4870_v35 = vpop.xlane.xlu0 %4869 }
0x1c55   : > { %8456 = vrcp.f32 %v4870_v35 }
0x1c58   : > { %v4873_v4 = vpop.xlane.xlu1 %4872  ;;  %v8371_v62 = vpop.permute.xlu0 %8370 }
0x1c59   : > { %8458 = vrcp.f32 %v4873_v4  ;;  %v8373_v3 = vunpack.i.h.bf16 %v8371_v62  ;;  %v8372_v5 = vunpack.i.l.bf16 %v8371_v62 }
0x1c5b   : > { %v7823_v10 = vpack.c.bf16 %v8373_v3, %v8372_v5 }
0x1c5c   : > { %v4978_v61 = vpop.permute.xlu1 %4977 }
0x1c5f   : > { %v8457_v37 = vpop.eup %8456 }
0x1c60   : > { %v4962_v1 = vpop.permute.xlu1 %4961  ;;  %v4875_v2 = vmul.f32 %v8457_v37, %v8453_v57 }
0x1c61   : > { %v4967_v6 = vsel %vm1532_vm0, %v4962_v1, 0.0 }
0x1c62   : > { %7633 = vmatprep.mubr.msk.f32.mxu1 %vm1532_vm0, %v4875_v2  ;;  %4968 = vadd.xlane.f32.xlu0 %v4967_v6 }
0x1c63   : > { %v8459_v7 = vpop.eup %8458 }
0x1c64   : > { %v4964_v8 = vpop.permute.xlu1 %4963  ;;  %v4877_v9 = vmul.f32 %v8459_v7, %v8455_v59 }
0x1c65   : > { %v4970_v40 = vsel %vm1532_vm0, %v4964_v8, 0.0 }
0x1c66   : > { %7634 = vmatmul.mubr.msk.f32.vlgmr.msra.gmra.mrb[6].mxu1 %vm1532_vm0, %v4877_v9  ;;  %4971 = vadd.xlane.f32.xlu1 %v4970_v40 }
0x1c67   : > { %7825 = vmatpush3.bf16.xpose.msk.msra.mxu1 %vm10059_vm1, %v7823_v10  ;;  %7640 = vmatprep.mubr.msk.f32.mxu1 %vm9256_vm5, %v9255_v47 }
0x1c68   : > { %7827 = vmatprep.subr.bf16.mxu1 %v7823_v10 }
0x1c6e   : > { %7641 = vmatmul.mubr.msk.f32.vlgmr.msra.gmra.mrb[8].mxu1 %vm1532_vm0, %v4978_v61 }
0x1c6f   : > { %7829 = vmatpush3.bf16.msra.mxu1 %v7823_v10 }
0x1c70   : > { %7830 = vmatprep.subr.bf16.mxu1 %v9257_v31 }
0x1c77   : > { %8380 = vrot.lane.b32.xlu1 %v10491_v38, %s9259_s4 }
0x1cef   : > { %v4969_v18 = vpop.xlane.xlu0 %4968 }
0x1cf3   : > { %v4972_v26 = vpop.xlane.xlu1 %4971 }
0x1cf7   : > { %v8381_v11 = vpop.permute.xlu1 %8380 }
0x1cf8   : > { %v8383_v23 = vunpack.i.h.bf16 %v8381_v11  ;;  %v8382_v30 = vunpack.i.l.bf16 %v8381_v11 }
0x1cfa   : > { %v10530_v13 = vpack.c.bf16 %v8383_v23, %v8382_v30 }
0x1cfc   : > { %7841 = vmatpush3.bf16.xpose.msk.msra.mxu0 %vm10059_vm1, %v10530_v13 }
0x1cfd   : > { %7846 = vmatprep.subr.bf16.mxu0 %v9257_v31 }
0x1d39   : > { %v10536_v14 = vpop.f32.mrb[6].mxu1 }
0x1d3a   : > { %v10538_v16 = vpop.f32.mrb[7].mxu1 }
0x1d41   : > { %v5055_v19 = vpop.f32.mrb[8].mxu1 }
0x1d42   : > { %v5062_v15 = vrot.slane %v5055_v19, %v10039_v24  ;;  %v7642_v20 = vpop.f32.mrb[9].mxu1 }
0x1d44   : > { %v5063_v21 = vadd.f32 %v5062_v15, %v4969_v18  ;;  %v5064_v22 = vadd.f32 %v5062_v15, %v4972_v26 }
0x1d46   : > { %vm5065_vm8 = vcmp.gt.f32.partialorder %v5063_v21, 0.0  ;;  %v5067_v27 = vmul.f32 0.2, %v5063_v21  ;;  %v5068_v29 = vmul.f32 0.2, %v5064_v22  ;;  %vm5066_vm9 = vcmp.gt.f32.partialorder %v5064_v22, 0.0 }
0x1d48   : > { %v5069_v32 = vsel %vm5065_vm8, %v5063_v21, %v5067_v27  ;;  %v5070_v41 = vsel %vm5066_vm9, %v5064_v22, %v5068_v29  ;;  %vm6506_vm9 = vcmask 523264  }
0x1d49   : > { %v5071_v36 = vsel %vm1532_vm0, %v5069_v32, -inf  ;;  %v5074_v42 = vsel %vm1532_vm0, %v5070_v41, -inf }
0x1d4a   : > { %5072 = vmax.xlane.f32.xlu0 %v5071_v36 }
0x1d4e   : > { %5075 = vmax.xlane.f32.xlu0 %v5074_v42 }
0x1dd7   : > { %v5073_v44 = vpop.xlane.xlu0 %5072 }
0x1dd8   : > { %v5077_v28 = vsub.f32 %v5069_v32, %v5073_v44 }
0x1dda   : > { %v5079_v45 = vmul.f32 1.442695, %v5077_v28 }
0x1ddb   : > { %v5076_v34 = vpop.xlane.xlu0 %5075 }
0x1ddc   : > { %8460 = vpow2.f32 %v5079_v45  ;;  %v5078_v43 = vsub.f32 %v5070_v41, %v5076_v34 }
0x1dde   : > { %v5081_v48 = vmul.f32 1.442695, %v5078_v43 }
0x1de0   : > { %8462 = vpow2.f32 %v5081_v48 }
0x1de6   : > { %v8461_v50 = vpop.eup %8460 }
0x1de7   : > { %v5083_v25 = vsel %vm1532_vm0, %v8461_v50, 0.0 }
0x1de8   : > { %5084 = vadd.xlane.f32.xlu0 %v5083_v25 }
0x1dea   : > { %v8463_v51 = vpop.eup %8462 }
0x1deb   : > { %v5086_v52 = vsel %vm1532_vm0, %v8463_v51, 0.0 }
0x1dec   : > { %5087 = vadd.xlane.f32.xlu1 %v5086_v52 }
0x1dfd   : > { %5188 = vrot.lane.b32.xlu1 %v10508_v17, %s9260_s18 }
0x1dfe   : > { %8375 = vrot.lane.b32.xlu0 %v10491_v38, %s9260_s18 }
0x1e01   : > { %5399 = vrot.lane.b32.xlu1 %v10508_v17, %s9259_s4 }
0x1e02   : > { %8385 = vrot.lane.b32.xlu0 %v10491_v38, %s9261_s2 }
0x1e05   : > { %5610 = vrot.lane.b32.xlu1 %v10508_v17, %s9261_s2 }
0x1e06   : > { %5176 = vrot.lane.b32.xlu0 %v10485_v33, %s9260_s18 }
0x1e09   : > { %5178 = vrot.lane.b32.xlu1 %v10487_v12, %s9260_s18 }
0x1e0a   : > { %5387 = vrot.lane.b32.xlu0 %v10485_v33, %s9259_s4 }
0x1e0d   : > { %5389 = vrot.lane.b32.xlu1 %v10487_v12, %s9259_s4 }
0x1e0e   : > { %5598 = vrot.lane.b32.xlu0 %v10485_v33, %s9261_s2 }
0x1e11   : > { %5600 = vrot.lane.b32.xlu1 %v10487_v12, %s9261_s2 }
0x1e75   : > { %v5085_v46 = vpop.xlane.xlu0 %5084 }
0x1e76   : > { %8464 = vrcp.f32 %v5085_v46 }
0x1e79   : > { %v5088_v53 = vpop.xlane.xlu1 %5087  ;;  %v8376_v63 = vpop.permute.xlu0 %8375 }
0x1e7a   : > { %8466 = vrcp.f32 %v5088_v53  ;;  %v8378_v35 = vunpack.i.h.bf16 %v8376_v63  ;;  %v8377_v4 = vunpack.i.l.bf16 %v8376_v63 }
0x1e7c   : > { %v7831_v3 = vpack.c.bf16 %v8378_v35, %v8377_v4 }
0x1e7d   : > { %v5189_v0 = vpop.permute.xlu1 %5188  ;;  %v8386_v49 = vpop.permute.xlu0 %8385 }
0x1e7e   : > { %v8388_v54 = vunpack.i.h.bf16 %v8386_v49  ;;  %v8387_v55 = vunpack.i.l.bf16 %v8386_v49 }
0x1e80   : > { %v8465_v56 = vpop.eup %8464  ;;  %v10567_v57 = vpack.c.bf16 %v8388_v54, %v8387_v55 }
0x1e81   : > { %v5400_v58 = vpop.permute.xlu1 %5399  ;;  %v5177_v59 = vpop.permute.xlu0 %5176  ;;  %v5090_v60 = vmul.f32 %v8465_v56, %v8461_v50 }
0x1e82   : > { %7669 = vmatmul.mubr.msk.f32.vlgmr.msra.gmra.mrb[8].mxu0 %vm1532_vm0, %v5400_v58  ;;  %v5182_v61 = vsel %vm1532_vm0, %v5177_v59, 0.0 }
0x1e83   : > { %7849 = vmatpush3.bf16.xpose.msk.msra.mxu0 %vm10059_vm1, %v10567_v57  ;;  %7647 = vmatprep.mubr.msk.f32.mxu1 %vm1532_vm0, %v5090_v60 }
0x1e84   : > { %v8467_v62 = vpop.eup %8466  ;;  %5183 = vadd.xlane.f32.xlu0 %v5182_v61  ;;  %7682 = vmatprep.mubr.msk.f32.mxu0 %vm9256_vm5, %v9255_v47 }
0x1e85   : > { %v5611_v37 = vpop.permute.xlu1 %5610  ;;  %v5388_v1 = vpop.permute.xlu0 %5387  ;;  %v5092_v2 = vmul.f32 %v8467_v62, %v8463_v51 }
0x1e86   : > { %v5393_v5 = vsel %vm1532_vm0, %v5388_v1, 0.0 }
0x1e87   : > { %7648 = vmatmul.mubr.msk.f32.vlgmr.msra.gmra.mrb[10].mxu1 %vm1532_vm0, %v5092_v2 }
0x1e88   : > { %5394 = vadd.xlane.f32.xlu0 %v5393_v5  ;;  %7833 = vmatpush3.bf16.xpose.msk.msra.mxu1 %vm10059_vm1, %v7831_v3 }
0x1e89   : > { %7835 = vmatprep.subr.bf16.mxu1 %v7831_v3  ;;  %v5179_v6 = vpop.permute.xlu1 %5178  ;;  %7654 = vmatprep.mubr.msk.f32.mxu1 %vm9256_vm5, %v9255_v47  ;;  %v5599_v10 = vpop.permute.xlu0 %5598 }
0x1e8a   : > { %7683 = vmatmul.mubr.msk.f32.vlgmr.msra.gmra.mrb[10].mxu0 %vm1532_vm0, %v5611_v37  ;;  %v5185_v7 = vsel %vm1532_vm0, %v5179_v6, 0.0  ;;  %v5604_v11 = vsel %vm1532_vm0, %v5599_v10, 0.0 }
0x1e8b   : > { %5186 = vadd.xlane.f32.xlu1 %v5185_v7 }
0x1e8d   : > { %v5390_v8 = vpop.permute.xlu1 %5389 }
0x1e8e   : > { %v5396_v9 = vsel %vm1532_vm0, %v5390_v8, 0.0 }
0x1e8f   : > { %7655 = vmatmul.mubr.msk.f32.vlgmr.msra.gmra.mrb[12].mxu1 %vm1532_vm0, %v5189_v0  ;;  %5397 = vadd.xlane.f32.xlu0 %v5396_v9 }
0x1e90   : > { %7837 = vmatpush3.bf16.msra.mxu1 %v7831_v3 }
0x1e91   : > { %7843 = vmatprep.subr.bf16.mxu1 %v10530_v13  ;;  %v5601_v40 = vpop.permute.xlu1 %5600 }
0x1e92   : > { %v5607_v26 = vsel %vm1532_vm0, %v5601_v40, 0.0 }
0x1e93   : > { %5608 = vadd.xlane.f32.xlu1 %v5607_v26  ;;  %5605 = vadd.xlane.f32.xlu0 %v5604_v11 }
0x1f11   : > { %v5184_v23 = vpop.xlane.xlu0 %5183 }
0x1f15   : > { %v5395_v20 = vpop.xlane.xlu0 %5394 }
0x1f18   : > { %v5187_v32 = vpop.xlane.xlu1 %5186 }
0x1f1c   : > { %v5398_v29 = vpop.xlane.xlu0 %5397 }
0x1f20   : > { %v5609_v34 = vpop.xlane.xlu1 %5608  ;;  %v5606_v43 = vpop.xlane.xlu0 %5605 }
0x1f55   : > { %v5477_v30 = vpop.f32.mrb[8].mxu0 }
0x1f56   : > { %v7670_v19 = vpop.f32.mrb[9].mxu0  ;;  %v5484_v22 = vrot.slane %v5477_v30, %v10039_v24 }
0x1f58   : > { %v5485_v36 = vadd.f32 %v5484_v22, %v5395_v20  ;;  %v5486_v41 = vadd.f32 %v5484_v22, %v5398_v29 }
0x1f5a   : > { %v10590_v15 = vpop.f32.mrb[10].mxu1  ;;  %v5490_v52 = vmul.f32 0.2, %v5486_v41  ;;  %v5489_v46 = vmul.f32 0.2, %v5485_v36  ;;  %vm5488_vm12 = vcmp.gt.f32.partialorder %v5486_v41, 0.0 }
0x1f5b   : > { %v10592_v18 = vpop.f32.mrb[11].mxu1  ;;  %vm5487_vm13 = vcmp.gt.f32.partialorder %v5485_v36, 0.0 }
0x1f5c   : > { %v5492_v56 = vsel %vm5488_vm12, %v5486_v41, %v5490_v52  ;;  %v5491_v58 = vsel %vm5487_vm13, %v5485_v36, %v5489_v46  ;;  %vm6515_vm12 = vcmask 916480  }
0x1f5d   : > { %v5688_v21 = vpop.f32.mrb[10].mxu0  ;;  %v5496_v35 = vsel %vm1532_vm0, %v5492_v56, -inf  ;;  %v5493_v4 = vsel %vm1532_vm0, %v5491_v58, -inf }
0x1f5e   : > { %v7684_v27 = vpop.f32.mrb[11].mxu0  ;;  %v5695_v42 = vrot.slane %v5688_v21, %v10039_v24 }
0x1f60   : > { %v5696_v25 = vadd.f32 %v5695_v42, %v5606_v43  ;;  %v5697_v51 = vadd.f32 %v5695_v42, %v5609_v34 }
0x1f62   : > { %v5266_v44 = vpop.f32.mrb[12].mxu1  ;;  %v5701_v59 = vmul.f32 0.2, %v5697_v51  ;;  %v5700_v60 = vmul.f32 0.2, %v5696_v25  ;;  %vm5699_vm14 = vcmp.gt.f32.partialorder %v5697_v51, 0.0 }
0x1f63   : > { %v5273_v28 = vrot.slane %v5266_v44, %v10039_v24  ;;  %v7656_v45 = vpop.f32.mrb[13].mxu1  ;;  %vm5698_vm15 = vcmp.gt.f32.partialorder %v5696_v25, 0.0 }
0x1f64   : > { %v5703_v61 = vsel %vm5699_vm14, %v5697_v51, %v5701_v59  ;;  %v5702_v62 = vsel %vm5698_vm15, %v5696_v25, %v5700_v60 }
0x1f65   : > { %v5274_v48 = vadd.f32 %v5273_v28, %v5184_v23  ;;  %v5275_v50 = vadd.f32 %v5273_v28, %v5187_v32  ;;  %v5707_v37 = vsel %vm1532_vm0, %v5703_v61, -inf  ;;  %v5704_v1 = vsel %vm1532_vm0, %v5702_v62, -inf }
0x1f67   : > { %vm5277_vm10 = vcmp.gt.f32.partialorder %v5275_v50, 0.0  ;;  %v5279_v53 = vmul.f32 0.2, %v5275_v50  ;;  %vm5276_vm11 = vcmp.gt.f32.partialorder %v5274_v48, 0.0  ;;  %v5278_v63 = vmul.f32 0.2, %v5274_v48 }
0x1f69   : > { %v5281_v0 = vsel %vm5277_vm10, %v5275_v50, %v5279_v53  ;;  %v5280_v49 = vsel %vm5276_vm11, %v5274_v48, %v5278_v63  ;;  %vm6509_vm10 = vcmask 654336   ;;  %vm6512_vm11 = vcmask 785408  }
0x1f6a   : > { %v5285_v54 = vsel %vm1532_vm0, %v5281_v0, -inf  ;;  %v5282_v55 = vsel %vm1532_vm0, %v5280_v49, -inf }
0x1f6b   : > { %5286 = vmax.xlane.f32.xlu1 %v5285_v54  ;;  %5283 = vmax.xlane.f32.xlu0 %v5282_v55 }
0x1f6f   : > { %5497 = vmax.xlane.f32.xlu1 %v5496_v35  ;;  %5494 = vmax.xlane.f32.xlu0 %v5493_v4 }
0x1f73   : > { %5708 = vmax.xlane.f32.xlu1 %v5707_v37  ;;  %5705 = vmax.xlane.f32.xlu0 %v5704_v1 }
0x1ff8   : > { %v5287_v2 = vpop.xlane.xlu1 %5286  ;;  %v5284_v3 = vpop.xlane.xlu0 %5283 }
0x1ff9   : > { %v5289_v5 = vsub.f32 %v5281_v0, %v5287_v2  ;;  %v5288_v6 = vsub.f32 %v5280_v49, %v5284_v3 }
0x1ffb   : > { %v5292_v7 = vmul.f32 1.442695, %v5289_v5  ;;  %v5290_v8 = vmul.f32 1.442695, %v5288_v6 }
0x1ffc   : > { %v5498_v9 = vpop.xlane.xlu1 %5497  ;;  %v5495_v10 = vpop.xlane.xlu0 %5494 }
0x1ffd   : > { %8468 = vpow2.f32 %v5292_v7  ;;  %v5500_v40 = vsub.f32 %v5492_v56, %v5498_v9  ;;  %v5499_v26 = vsub.f32 %v5491_v58, %v5495_v10 }
0x1ffe   : > { %8470 = vpow2.f32 %v5290_v8 }
0x1fff   : > { %v5503_v11 = vmul.f32 1.442695, %v5500_v40  ;;  %v5501_v23 = vmul.f32 1.442695, %v5499_v26 }
0x2000   : > { %v5709_v30 = vpop.xlane.xlu1 %5708  ;;  %v5706_v19 = vpop.xlane.xlu0 %5705 }
0x2001   : > { %8472 = vpow2.f32 %v5503_v11  ;;  %v5711_v20 = vsub.f32 %v5703_v61, %v5709_v30  ;;  %v5710_v21 = vsub.f32 %v5702_v62, %v5706_v19 }
0x2002   : > { %8474 = vpow2.f32 %v5501_v23 }
0x2003   : > { %v5714_v22 = vmul.f32 1.442695, %v5711_v20  ;;  %v5712_v27 = vmul.f32 1.442695, %v5710_v21 }
0x2005   : > { %8476 = vpow2.f32 %v5714_v22 }
0x2006   : > { %8478 = vpow2.f32 %v5712_v27 }
0x2007   : > { %v8469_v29 = vpop.eup %8468 }
0x2008   : > { %v8471_v32 = vpop.eup %8470  ;;  %v5297_v36 = vsel %vm1532_vm0, %v8469_v29, 0.0 }
0x2009   : > { %5298 = vadd.xlane.f32.xlu1 %v5297_v36  ;;  %v5294_v41 = vsel %vm1532_vm0, %v8471_v32, 0.0 }
0x200a   : > { %5295 = vadd.xlane.f32.xlu0 %v5294_v41 }
0x200b   : > { %v8473_v42 = vpop.eup %8472 }
0x200c   : > { %v8475_v44 = vpop.eup %8474  ;;  %v5508_v28 = vsel %vm1532_vm0, %v8473_v42, 0.0 }
0x200d   : > { %5509 = vadd.xlane.f32.xlu1 %v5508_v28  ;;  %v5505_v45 = vsel %vm1532_vm0, %v8475_v44, 0.0 }
0x200e   : > { %5506 = vadd.xlane.f32.xlu0 %v5505_v45 }
0x200f   : > { %v8477_v34 = vpop.eup %8476 }
0x2010   : > { %v8479_v43 = vpop.eup %8478  ;;  %v5719_v48 = vsel %vm1532_vm0, %v8477_v34, 0.0 }
0x2011   : > { %5720 = vadd.xlane.f32.xlu1 %v5719_v48  ;;  %v5716_v50 = vsel %vm1532_vm0, %v8479_v43, 0.0 }
0x2012   : > { %5717 = vadd.xlane.f32.xlu0 %v5716_v50 }
0x2022   : > { %5821 = vrot.lane.b32.xlu1 %v10508_v17, %s9262_s26 }
0x2026   : > { %5809 = vrot.lane.b32.xlu1 %v10485_v33, %s9262_s26 }
0x2028   : > { %8390 = vrot.lane.b32.xlu0 %v10491_v38, %s9262_s26 }
0x202a   : > { %5811 = vrot.lane.b32.xlu1 %v10487_v12, %s9262_s26 }
0x2096   : > { %v5299_v25 = vpop.xlane.xlu1 %5298 }
0x2097   : > { %8480 = vrcp.f32 %v5299_v25  ;;  %v5296_v51 = vpop.xlane.xlu0 %5295 }
0x2098   : > { %8482 = vrcp.f32 %v5296_v51 }
0x209a   : > { %v5510_v52 = vpop.xlane.xlu1 %5509 }
0x209b   : > { %8484 = vrcp.f32 %v5510_v52  ;;  %v5507_v46 = vpop.xlane.xlu0 %5506 }
0x209c   : > { %8486 = vrcp.f32 %v5507_v46 }
0x209e   : > { %v5721_v53 = vpop.xlane.xlu1 %5720 }
0x209f   : > { %8488 = vrcp.f32 %v5721_v53  ;;  %v5718_v63 = vpop.xlane.xlu0 %5717 }
0x20a0   : > { %8490 = vrcp.f32 %v5718_v63 }
0x20a1   : > { %v8481_v0 = vpop.eup %8480 }
0x20a2   : > { %v8483_v49 = vpop.eup %8482  ;;  %v5822_v54 = vpop.permute.xlu1 %5821  ;;  %v5303_v55 = vmul.f32 %v8481_v0, %v8469_v29 }
0x20a3   : > { %v8391_v56 = vpop.permute.xlu0 %8390  ;;  %v5301_v58 = vmul.f32 %v8483_v49, %v8471_v32 }
0x20a4   : > { %v8393_v59 = vunpack.i.h.bf16 %v8391_v56  ;;  %v8392_v60 = vunpack.i.l.bf16 %v8391_v56 }
0x20a5   : > { %v8485_v35 = vpop.eup %8484  ;;  %7661 = vmatprep.mubr.msk.f32.mxu1 %vm1532_vm0, %v5301_v58 }
0x20a6   : > { %v8487_v4 = vpop.eup %8486  ;;  %v7855_v61 = vpack.c.bf16 %v8393_v59, %v8392_v60  ;;  %7662 = vmatmul.mubr.msk.f32.vlgmr.msra.gmra.mrb[14].mxu1 %vm1532_vm0, %v5303_v55  ;;  %v5810_v62 = vpop.permute.xlu1 %5809  ;;  %v5514_v37 = vmul.f32 %v8485_v35, %v8473_v42 }
0x20a7   : > { %7845 = vmatpush3.bf16.msra.mxu1 %v10530_v13  ;;  %v5815_v1 = vsel %vm1532_vm0, %v5810_v62, 0.0  ;;  %v5512_v2 = vmul.f32 %v8487_v4, %v8475_v44 }
0x20a8   : > { %7851 = vmatprep.subr.bf16.mxu1 %v10567_v57  ;;  %7859 = vmatprep.subr.bf16.mxu0 %v7855_v61 }
0x20a9   : > { %v8489_v3 = vpop.eup %8488  ;;  %5816 = vadd.xlane.f32.xlu0 %v5815_v1  ;;  %7675 = vmatprep.mubr.msk.f32.mxu1 %vm1532_vm0, %v5512_v2 }
0x20aa   : > { %v8491_v5 = vpop.eup %8490  ;;  %7861 = vmatpush3.bf16.msra.mxu0 %v7855_v61  ;;  %7676 = vmatmul.mubr.msk.f32.vlgmr.msra.gmra.mrb[16].mxu1 %vm1532_vm0, %v5514_v37  ;;  %v5812_v6 = vpop.permute.xlu1 %5811  ;;  %v5725_v7 = vmul.f32 %v8489_v3, %v8477_v34 }
0x20ab   : > { %7853 = vmatpush3.bf16.msra.mxu1 %v10567_v57  ;;  %v5818_v13 = vsel %vm1532_vm0, %v5812_v6, 0.0  ;;  %v5723_v8 = vmul.f32 %v8491_v5, %v8479_v43  ;;  %7862 = vmatprep.subr.bf16.mxu0 %v9257_v31 }
0x20ac   : > { %5819 = vadd.xlane.f32.xlu1 %v5818_v13  ;;  %7854 = vmatprep.subr.bf16.mxu1 %v9257_v31 }
0x20ad   : > { %7689 = vmatprep.mubr.msk.f32.mxu1 %vm1532_vm0, %v5723_v8 }
0x20ae   : > { %7690 = vmatmul.mubr.msk.f32.vlgmr.msra.gmra.mrb[18].mxu1 %vm1532_vm0, %v5725_v7 }
0x20af   : > { %7696 = vmatprep.mubr.msk.f32.mxu1 %vm9256_vm5, %v9255_v47 }
0x20b4   : > { %7857 = vmatpush3.bf16.xpose.msk.msra.mxu1 %vm10059_vm1, %v7855_v61 }
0x20bb   : > { %7697 = vmatmul.mubr.msk.f32.vlgmr.msra.gmra.mrb[20].mxu1 %vm1532_vm0, %v5822_v54 }
0x2136   : > { %v5817_v20 = vpop.xlane.xlu0 %5816 }
0x2139   : > { %v5820_v21 = vpop.xlane.xlu1 %5819 }
0x2179   : > { %v10635_v57 = vpop.f32.mrb[14].mxu1 }
0x217a   : > { %v10637_v9 = vpop.f32.mrb[15].mxu1 }
0x217d   : > { %v10639_v10 = vpop.f32.mrb[16].mxu1 }
0x217e   : > { %v10641_v40 = vpop.f32.mrb[17].mxu1 }
0x2181   : > { %v10643_v26 = vpop.f32.mrb[18].mxu1 }
0x2182   : > { %v10645_v11 = vpop.f32.mrb[19].mxu1 }
0x218e   : > { %v5899_v23 = vpop.f32.mrb[20].mxu1 }
0x218f   : > { %v5906_v30 = vrot.slane %v5899_v23, %v10039_v24  ;;  %v7698_v19 = vpop.f32.mrb[21].mxu1 }
0x2191   : > { %v5907_v22 = vadd.f32 %v5906_v30, %v5817_v20  ;;  %v5908_v27 = vadd.f32 %v5906_v30, %v5820_v21 }
0x2193   : > { %vm5909_vm2 = vcmp.gt.f32.partialorder %v5907_v22, 0.0  ;;  %v5911_v29 = vmul.f32 0.2, %v5907_v22  ;;  %v5912_v32 = vmul.f32 0.2, %v5908_v27  ;;  %vm5910_vm3 = vcmp.gt.f32.partialorder %v5908_v27, 0.0 }
0x2195   : > { %v5913_v36 = vsel %vm5909_vm2, %v5907_v22, %v5911_v29  ;;  %v5914_v42 = vsel %vm5910_vm3, %v5908_v27, %v5912_v32 }
0x2196   : > { %v5915_v41 = vsel %vm1532_vm0, %v5913_v36, -inf  ;;  %v5918_v44 = vsel %vm1532_vm0, %v5914_v42, -inf }
0x2197   : > { %5916 = vmax.xlane.f32.xlu0 %v5915_v41 }
0x219b   : > { %5919 = vmax.xlane.f32.xlu0 %v5918_v44 }
0x2224   : > { %v5917_v28 = vpop.xlane.xlu0 %5916 }
0x2225   : > { %v5921_v45 = vsub.f32 %v5913_v36, %v5917_v28 }
0x2227   : > { %v5923_v34 = vmul.f32 1.442695, %v5921_v45 }
0x2228   : > { %v5920_v43 = vpop.xlane.xlu0 %5919 }
0x2229   : > { %8492 = vpow2.f32 %v5923_v34  ;;  %v5922_v48 = vsub.f32 %v5914_v42, %v5920_v43 }
0x222b   : > { %v5925_v50 = vmul.f32 1.442695, %v5922_v48 }
0x222d   : > { %8494 = vpow2.f32 %v5925_v50 }
0x2233   : > { %v8493_v25 = vpop.eup %8492 }
0x2234   : > { %v5927_v51 = vsel %vm1532_vm0, %v8493_v25, 0.0 }
0x2235   : > { %5928 = vadd.xlane.f32.xlu0 %v5927_v51 }
0x2237   : > { %v8495_v52 = vpop.eup %8494 }
0x2238   : > { %v5930_v46 = vsel %vm1532_vm0, %v8495_v52, 0.0 }
0x2239   : > { %5931 = vadd.xlane.f32.xlu1 %v5930_v46 }
0x224a   : > { %6032 = vrot.lane.b32.xlu1 %v10508_v17, %s9263_s11 }
0x224b   : > { %8395 = vrot.lane.b32.xlu0 %v10491_v38, %s9263_s11 }
0x224e   : > { %6020 = vrot.lane.b32.xlu1 %v10485_v33, %s9263_s11 }
0x2252   : > { %6022 = vrot.lane.b32.xlu1 %v10487_v12, %s9263_s11 }
0x22c2   : > { %v5929_v53 = vpop.xlane.xlu0 %5928 }
0x22c3   : > { %8496 = vrcp.f32 %v5929_v53 }
0x22c6   : > { %v5932_v63 = vpop.xlane.xlu1 %5931  ;;  %v8396_v0 = vpop.permute.xlu0 %8395 }
0x22c7   : > { %8498 = vrcp.f32 %v5932_v63  ;;  %v8398_v49 = vunpack.i.h.bf16 %v8396_v0  ;;  %v8397_v54 = vunpack.i.l.bf16 %v8396_v0 }
0x22c9   : > { %v7863_v55 = vpack.c.bf16 %v8398_v49, %v8397_v54 }
0x22ca   : > { %v6033_v56 = vpop.permute.xlu1 %6032 }
0x22cb   : > { %7867 = vmatprep.subr.bf16.mxu1 %v7863_v55 }
0x22cc   : > { %7869 = vmatpush3.bf16.msra.mxu1 %v7863_v55 }
0x22cd   : > { %v8497_v58 = vpop.eup %8496  ;;  %7870 = vmatprep.subr.bf16.mxu1 %v9257_v31 }
0x22ce   : > { %v6021_v59 = vpop.permute.xlu1 %6020  ;;  %v5934_v60 = vmul.f32 %v8497_v58, %v8493_v25 }
0x22cf   : > { %v6026_v35 = vsel %vm1532_vm0, %v6021_v59, 0.0 }
0x22d0   : > { %6027 = vadd.xlane.f32.xlu0 %v6026_v35  ;;  %7703 = vmatprep.mubr.msk.f32.mxu0 %vm1532_vm0, %v5934_v60 }
0x22d1   : > { %v8499_v4 = vpop.eup %8498 }
0x22d2   : > { %v6023_v61 = vpop.permute.xlu1 %6022  ;;  %v5936_v62 = vmul.f32 %v8499_v4, %v8495_v52 }
0x22d3   : > { %v6029_v37 = vsel %vm1532_vm0, %v6023_v61, 0.0 }
0x22d4   : > { %6030 = vadd.xlane.f32.xlu1 %v6029_v37  ;;  %7704 = vmatmul.mubr.msk.f32.vlgmr.msra.gmra.mrb[12].mxu0 %vm1532_vm0, %v5936_v62 }
0x22d5   : > { %7865 = vmatpush3.bf16.xpose.msk.msra.mxu0 %vm10059_vm1, %v7863_v55  ;;  %7710 = vmatprep.mubr.msk.f32.mxu0 %vm9256_vm5, %v9255_v47 }
0x22dc   : > { %7711 = vmatmul.mubr.msk.f32.vlgmr.msra.gmra.mrb[14].mxu0 %vm1532_vm0, %v6033_v56 }
0x235d   : > { %v6028_v6 = vpop.xlane.xlu0 %6027 }
0x2361   : > { %v6031_v7 = vpop.xlane.xlu1 %6030 }
0x23a7   : > { %v10670_v31 = vpop.f32.mrb[12].mxu0 }
0x23a8   : > { %v10672_v1 = vpop.f32.mrb[13].mxu0 }
0x23af   : > { %v6110_v2 = vpop.f32.mrb[14].mxu0 }
0x23b0   : > { %v6117_v3 = vrot.slane %v6110_v2, %v10039_v24  ;;  %v7712_v5 = vpop.f32.mrb[15].mxu0 }
0x23b2   : > { %v6118_v13 = vadd.f32 %v6117_v3, %v6028_v6  ;;  %v6119_v8 = vadd.f32 %v6117_v3, %v6031_v7 }
0x23b4   : > { %vm6120_vm4 = vcmp.gt.f32.partialorder %v6118_v13, 0.0  ;;  %v6122_v23 = vmul.f32 0.2, %v6118_v13  ;;  %v6123_v30 = vmul.f32 0.2, %v6119_v8  ;;  %vm6121_vm6 = vcmp.gt.f32.partialorder %v6119_v8, 0.0 }
0x23b6   : > { %v6124_v19 = vsel %vm6120_vm4, %v6118_v13, %v6122_v23  ;;  %v6125_v21 = vsel %vm6121_vm6, %v6119_v8, %v6123_v30 }
0x23b7   : > { %v6126_v20 = vsel %vm1532_vm0, %v6124_v19, -inf  ;;  %v6129_v22 = vsel %vm1532_vm0, %v6125_v21, -inf }
0x23b8   : > { %6127 = vmax.xlane.f32.xlu0 %v6126_v20 }
0x23bc   : > { %6130 = vmax.xlane.f32.xlu0 %v6129_v22 }
0x2445   : > { %v6128_v27 = vpop.xlane.xlu0 %6127 }
0x2446   : > { %v6132_v29 = vsub.f32 %v6124_v19, %v6128_v27 }
0x2448   : > { %v6134_v32 = vmul.f32 1.442695, %v6132_v29 }
0x2449   : > { %v6131_v36 = vpop.xlane.xlu0 %6130 }
0x244a   : > { %8500 = vpow2.f32 %v6134_v32  ;;  %v6133_v41 = vsub.f32 %v6125_v21, %v6131_v36 }
0x244c   : > { %v6136_v42 = vmul.f32 1.442695, %v6133_v41 }
0x244e   : > { %8502 = vpow2.f32 %v6136_v42 }
0x2454   : > { %v8501_v44 = vpop.eup %8500 }
0x2455   : > { %v6138_v28 = vsel %vm1532_vm0, %v8501_v44, 0.0 }
0x2456   : > { %6139 = vadd.xlane.f32.xlu0 %v6138_v28 }
0x2458   : > { %v8503_v45 = vpop.eup %8502 }
0x2459   : > { %v6141_v34 = vsel %vm1532_vm0, %v8503_v45, 0.0 }
0x245a   : > { %6142 = vadd.xlane.f32.xlu1 %v6141_v34 }
0x246b   : > { %6243 = vrot.lane.b32.xlu1 %v10508_v17, %s9264_s10 }
0x246c   : > { %8400 = vrot.lane.b32.xlu0 %v10491_v38, %s9264_s10 }
0x246f   : > { %6231 = vrot.lane.b32.xlu1 %v10485_v33, %s9264_s10 }
0x2473   : > { %6233 = vrot.lane.b32.xlu1 %v10487_v12, %s9264_s10 }
0x24e3   : > { %v6140_v43 = vpop.xlane.xlu0 %6139 }
0x24e4   : > { %8504 = vrcp.f32 %v6140_v43 }
0x24e7   : > { %v6143_v48 = vpop.xlane.xlu1 %6142  ;;  %v8401_v50 = vpop.permute.xlu0 %8400 }
0x24e8   : > { %8506 = vrcp.f32 %v6143_v48  ;;  %v8403_v25 = vunpack.i.h.bf16 %v8401_v50  ;;  %v8402_v51 = vunpack.i.l.bf16 %v8401_v50 }
0x24ea   : > { %v7871_v52 = vpack.c.bf16 %v8403_v25, %v8402_v51 }
0x24eb   : > { %v6244_v46 = vpop.permute.xlu1 %6243 }
0x24ec   : > { %7875 = vmatprep.subr.bf16.mxu0 %v7871_v52 }
0x24ed   : > { %7877 = vmatpush3.bf16.msra.mxu0 %v7871_v52 }
0x24ee   : > { %v8505_v17 = vpop.eup %8504 }
0x24ef   : > { %v6232_v53 = vpop.permute.xlu1 %6231  ;;  %v6145_v38 = vmul.f32 %v8505_v17, %v8501_v44 }
0x24f0   : > { %v6237_v63 = vsel %vm1532_vm0, %v6232_v53, 0.0 }
0x24f1   : > { %6238 = vadd.xlane.f32.xlu0 %v6237_v63  ;;  %7717 = vmatprep.mubr.msk.f32.mxu1 %vm1532_vm0, %v6145_v38 }
0x24f2   : > { %v8507_v33 = vpop.eup %8506 }
0x24f3   : > { %v6234_v12 = vpop.permute.xlu1 %6233  ;;  %v6147_v0 = vmul.f32 %v8507_v33, %v8503_v45 }
0x24f4   : > { %v6240_v49 = vsel %vm1532_vm0, %v6234_v12, 0.0 }
0x24f5   : > { %6241 = vadd.xlane.f32.xlu1 %v6240_v49  ;;  %7718 = vmatmul.mubr.msk.f32.vlgmr.msra.gmra.mrb[22].mxu1 %vm1532_vm0, %v6147_v0 }
0x24f6   : > { %7873 = vmatpush3.bf16.xpose.msk.msra.mxu1 %vm10059_vm1, %v7871_v52  ;;  %7724 = vmatprep.mubr.msk.f32.mxu1 %vm9256_vm5, %v9255_v47  ;;  %vm6500_vm1 = vcmask 261120   ;;  %vm6503_vm5 = vcmask 392192  }
0x24fd   : > { %7725 = vmatmul.mubr.msk.f32.vlgmr.msra.gmra.mrb[24].mxu1 %vm1532_vm0, %v6244_v46 }
0x257e   : > { %v6239_v60 = vpop.xlane.xlu0 %6238 }
0x2582   : > { %v6242_v35 = vpop.xlane.xlu1 %6241 }
0x25c8   : > { %v7719_v54 = vpop.f32.mrb[22].mxu1 }
0x25c9   : > { %v6222_v55 = vpop.f32.mrb[23].mxu1 }
0x25d0   : > { %v6321_v56 = vpop.f32.mrb[24].mxu1 }
0x25d1   : > { %v6328_v58 = vrot.slane %v6321_v56, %v10039_v24  ;;  %v7726_v59 = vpop.f32.mrb[25].mxu1 }
0x25d3   : > { %v6329_v4 = vadd.f32 %v6328_v58, %v6239_v60  ;;  %v6330_v61 = vadd.f32 %v6328_v58, %v6242_v35 }
0x25d5   : > { %vm6331_vm7 = vcmp.gt.f32.partialorder %v6329_v4, 0.0  ;;  %v6333_v62 = vmul.f32 0.2, %v6329_v4  ;;  %v6334_v37 = vmul.f32 0.2, %v6330_v61  ;;  %vm6332_vm8 = vcmp.gt.f32.partialorder %v6330_v61, 0.0 }
0x25d7   : > { %v6335_v39 = vsel %vm6331_vm7, %v6329_v4, %v6333_v62  ;;  %v6336_v47 = vsel %vm6332_vm8, %v6330_v61, %v6334_v37 }
0x25d8   : > { %v6337_v2 = vsel %vm1532_vm0, %v6335_v39, -inf  ;;  %v6340_v3 = vsel %vm1532_vm0, %v6336_v47, -inf }
0x25d9   : > { %6338 = vmax.xlane.f32.xlu0 %v6337_v2 }
0x25dd   : > { %6341 = vmax.xlane.f32.xlu0 %v6340_v3 }
0x2666   : > { %v6339_v5 = vpop.xlane.xlu0 %6338 }
0x2667   : > { %v6343_v6 = vsub.f32 %v6335_v39, %v6339_v5 }
0x2669   : > { %v6345_v24 = vmul.f32 1.442695, %v6343_v6 }
0x266a   : > { %v6342_v7 = vpop.xlane.xlu0 %6341 }
0x266b   : > { %8508 = vpow2.f32 %v6345_v24  ;;  %v6344_v13 = vsub.f32 %v6336_v47, %v6342_v7 }
0x266d   : > { %v6347_v8 = vmul.f32 1.442695, %v6344_v13 }
0x266f   : > { %8510 = vpow2.f32 %v6347_v8 }
0x2675   : > { %v8509_v23 = vpop.eup %8508 }
0x2676   : > { %v6349_v30 = vsel %vm1532_vm0, %v8509_v23, 0.0 }
0x2677   : > { %6350 = vadd.xlane.f32.xlu0 %v6349_v30 }
0x2679   : > { %v8511_v19 = vpop.eup %8510 }
0x267a   : > { %v6352_v20 = vsel %vm1532_vm0, %v8511_v19, 0.0 }
0x267b   : > { %6353 = vadd.xlane.f32.xlu1 %v6352_v20 }
0x268c   : > { %6446 = vrot.lane.b32.xlu1 %v10590_v15, %s9264_s10 }
0x268d   : > { %6444 = vrot.lane.b32.xlu0 %v10592_v18, %s9264_s10 }
0x2690   : > { %6452 = vrot.lane.b32.xlu1 %v10637_v9, %s9263_s11 }
0x2691   : > { %6460 = vrot.lane.b32.xlu0 %v10641_v40, %s9262_s26 }
0x2694   : > { %6454 = vrot.lane.b32.xlu1 %v10635_v57, %s9263_s11 }
0x2695   : > { %6468 = vrot.lane.b32.xlu0 %v10645_v11, %s9261_s2 }
0x2698   : > { %6462 = vrot.lane.b32.xlu1 %v10639_v10, %s9262_s26 }
0x2699   : > { %6476 = vrot.lane.b32.xlu0 %v10672_v1, %s9259_s4 }
0x269c   : > { %6470 = vrot.lane.b32.xlu1 %v10643_v26, %s9261_s2 }
0x269d   : > { %6484 = vrot.lane.b32.xlu0 %v6222_v55, %s9260_s18 }
0x26a0   : > { %6478 = vrot.lane.b32.xlu1 %v10670_v31, %s9259_s4 }
0x26a4   : > { %6486 = vrot.lane.b32.xlu1 %v7719_v54, %s9260_s18 }
0x2704   : > { %v6351_v15 = vpop.xlane.xlu0 %6350 }
0x2705   : > { %8512 = vrcp.f32 %v6351_v15 }
0x2708   : > { %v6354_v18 = vpop.xlane.xlu1 %6353  ;;  %v6445_v22 = vpop.permute.xlu0 %6444 }
0x2709   : > { %8514 = vrcp.f32 %v6354_v18  ;;  %v6498_v41 = vsel %vm1532_vm0, %v10538_v16, %v6445_v22  ;;  %v7189_v16 = vld [vmem:[#allocation26] ss:$0 sm:$0xff] }
0x270c   : > { %v6447_v31 = vpop.permute.xlu1 %6446  ;;  %v6461_v29 = vpop.permute.xlu0 %6460 }
0x270d   : > { %v6499_v34 = vsel %vm1532_vm0, %v10536_v14, %v6447_v31 }
0x270f   : > { %v8513_v57 = vpop.eup %8512 }
0x2710   : > { %v6356_v9 = vmul.f32 %v8513_v57, %v8509_v23  ;;  %v6453_v1 = vpop.permute.xlu1 %6452  ;;  %v6469_v36 = vpop.permute.xlu0 %6468 }
0x2711   : > { %v6501_v44 = vsel %vm6500_vm1, %v6498_v41, %v6453_v1 }
0x2712   : > { %7731 = vmatprep.mubr.msk.f32.mxu0 %vm1532_vm0, %v6356_v9  ;;  %v6504_v45 = vsel %vm6503_vm5, %v6501_v44, %v6461_v29 }
0x2713   : > { %v8515_v10 = vpop.eup %8514  ;;  %v6507_v50 = vsel %vm6506_vm9, %v6504_v45, %v6469_v36 }
0x2714   : > { %v6358_v40 = vmul.f32 %v8515_v10, %v8511_v19  ;;  %v6455_v21 = vpop.permute.xlu1 %6454  ;;  %v6477_v28 = vpop.permute.xlu0 %6476 }
0x2715   : > { %v6502_v43 = vsel %vm6500_vm1, %v6499_v34, %v6455_v21  ;;  %v6510_v17 = vsel %vm6509_vm10, %v6507_v50, %v6477_v28 }
0x2716   : > { %7732 = vmatmul.mubr.msk.f32.vlgmr.msra.gmra.mrb[16].mxu0 %vm1532_vm0, %v6358_v40 }
0x2718   : > { %v6463_v27 = vpop.permute.xlu1 %6462  ;;  %v6485_v51 = vpop.permute.xlu0 %6484 }
0x2719   : > { %v6505_v25 = vsel %vm6503_vm5, %v6502_v43, %v6463_v27  ;;  %v6513_v63 = vsel %vm6512_vm11, %v6510_v17, %v6485_v51 }
0x271c   : > { %v6471_v32 = vpop.permute.xlu1 %6470 }
0x271d   : > { %v6508_v52 = vsel %vm6506_vm9, %v6505_v25, %v6471_v32 }
0x2720   : > { %v6479_v42 = vpop.permute.xlu1 %6478 }
0x2721   : > { %v6511_v46 = vsel %vm6509_vm10, %v6508_v52, %v6479_v42 }
0x2724   : > { %v6487_v48 = vpop.permute.xlu1 %6486 }
0x2725   : > { %v6514_v53 = vsel %vm6512_vm11, %v6511_v46, %v6487_v48 }
0x27e9   : > { %v7733_v26 = vpop.f32.mrb[16].mxu0 }
0x27ea   : > { %6494 = vrot.lane.b32.xlu1 %v7733_v26, %s9258_s3  ;;  %v6433_v11 = vpop.f32.mrb[17].mxu0 }
0x27eb   : > { %6492 = vrot.lane.b32.xlu0 %v6433_v11, %s9258_s3 }
0x285c   : > { %v6495_v38 = vpop.permute.xlu1 %6494 }
0x285d   : > { %v6517_v33 = vsel %vm6515_vm12, %v6514_v53, %v6495_v38  ;;  %v6493_v12 = vpop.permute.xlu0 %6492 }
0x285e   : > { %v6525_v0 = vadd.f32 %v7189_v16, %v6517_v33  ;;  %v6516_v49 = vsel %vm6515_vm12, %v6513_v63, %v6493_v12 }
0x285f   : > { %v6524_v14 = vadd.f32 %v7189_v16, %v6516_v49 }
0x2860   : > { %6527 = vst [vmem:[#allocation31 + $0x8] sm:$0xff] %v6525_v0 }
0x2861   : > { %6526 = vst [vmem:[#allocation31] sm:$0xff] %v6524_v14 }
0x2862 PF: > { %s10988_s0 = sld [smem:[#allocation43_spill]]  ;;  %s9265_s28 = smov [#allocation29]  }
0x2863   : > { %s6547_s8 = sshll.u32 %s9265_s28, 4  ;;  %s9266_s9 = smov [#allocation28]   ;;  %s6548_s8 = int_to_ptr.vmem [resolvable:$true] %s6547_s8 }
0x2864   : > { %s6534_s22 = sshll.u32 %s9266_s9, 4  ;;  %s9070_s27 = scalar_lea.vmem %s6548_s8, 256  ;;  %s6535_s22 = int_to_ptr.vmem [resolvable:$true] %s6534_s22 }
0x2865   : > { %p9071_p11 = scmp.ne.s32.totalorder %s6548_s8, %s9070_s27  ;;  %p9077_p5 = scmp.lt.s32.totalorder %s6548_s8, %s6548_s8 }
0x2866   : > { %p9078_p3 = scmp.lt.s32.totalorder %s9070_s27, %s9070_s27 }
0x2868   : > { %p8024_p7 = scmp.eq.s32.totalorder %s10988_s0, 5  ;;  %p9079_p10 = por %p9078_p3, %p9077_p5 }
0x286a   : > { %p9072_p2 = pnand %p9071_p11, %p8024_p7 }
0x286c   : > { %p9073_p13 = pneg %p9072_p2 }
0x286e   : > { %p9080_p8 = pnand %p9079_p10, %p9073_p13 }
0x2870   : > { %9083 = shalt.err (!%p9080_p8)
}
0x2871   : > { %s10989_s1 = sld [smem:[#allocation65_spill]] }
0x2877   : > { %s9084_s23 = scalar_lea.hbm %s10989_s1, 256 }
0x2878   : > { %p9085_p4 = scmp.ne.s32.totalorder %s10989_s1, %s9084_s23  ;;  %p9090_p6 = scmp.lt.u32.totalorder %s9084_s23, %s10989_s1 }
0x287a   : > { %p9086_p0 = pnand %p9085_p4, %p8024_p7 }
0x287c   : > { %p9087_p1 = pneg %p9086_p0 }
0x287e   : > { %p9092_p9 = pnand %p9090_p6, %p9087_p1 }
0x2880   : > { %9095 = shalt.err (!%p9092_p9)
}
0x2881   : > { %s9267_s3 = smov 128   ;;  %s9268_s4 = smov 8  }
0x2882   : > { %7939 = dma.vmem_to_hbm [thread:$0]  (%p8024_p7), %s6548_s8, 256, %s10989_s1, [#allocation30], %s9267_s3, %s9267_s3, %s9268_s4  }
0x2883   : > { %s9096_s26 = scalar_lea.vmem %s6535_s22, 256  ;;  %p9103_p13 = scmp.lt.s32.totalorder %s6535_s22, %s6535_s22 }
0x2884   : > { %p9097_p12 = scmp.ne.s32.totalorder %s6535_s22, %s9096_s26  ;;  %p9104_p5 = scmp.lt.s32.totalorder %s9096_s26, %s9096_s26 }
0x2886   : > { %p9098_p11 = pnand %p9097_p12, %p8024_p7  ;;  %p9105_p3 = por %p9104_p5, %p9103_p13 }
0x2888   : > { %p9099_p2 = pneg %p9098_p11 }
0x288a   : > { %p9106_p10 = pnand %p9105_p3, %p9099_p2 }
0x288c   : > { %9109 = shalt.err (!%p9106_p10)
}
0x288d   : > { %s10990_s28 = sld [smem:[#allocation64_spill]] }
0x2893   : > { %s10991_s9 = smov %s10990_s28  ;;  %s9110_s27 = scalar_lea.hbm %s10990_s28, 256 }
0x2894   : > { %p9111_p8 = scmp.ne.s32.totalorder %s10991_s9, %s9110_s27  ;;  %p9116_p1 = scmp.lt.u32.totalorder %s9110_s27, %s10991_s9 }
0x2896   : > { %p9112_p4 = pnand %p9111_p8, %p8024_p7 }
0x2898   : > { %p9113_p0 = pneg %p9112_p4 }
0x289a   : > { %p9118_p6 = pnand %p9116_p1, %p9113_p0 }
0x289c   : > { %9121 = shalt.err (!%p9118_p6)
}
0x289d   : > { %7937 = dma.vmem_to_hbm [thread:$0]  (%p8024_p7), %s6535_s22, 256, %s10991_s9, [#allocation5], %s9267_s3, %s9267_s3, %s9268_s4  }
0x289e   : > { %s9269_s24 = smov [#allocation31]  }
0x289f   : > { %s6560_s5 = sshll.u32 %s9269_s24, 4  ;;  %s6561_s5 = int_to_ptr.vmem [resolvable:$true] %s6560_s5 }
0x28a0   : > { %s9122_s18 = scalar_lea.vmem %s6561_s5, 256  ;;  %p9129_p2 = scmp.lt.s32.totalorder %s6561_s5, %s6561_s5 }
0x28a1   : > { %p9123_p9 = scmp.ne.s32.totalorder %s6561_s5, %s9122_s18  ;;  %p9130_p13 = scmp.lt.s32.totalorder %s9122_s18, %s9122_s18 }
0x28a3   : > { %p9124_p12 = pnand %p9123_p9, %p8024_p7  ;;  %p9131_p5 = por %p9130_p13, %p9129_p2 }
0x28a5   : > { %p9125_p11 = pneg %p9124_p12 }
0x28a7   : > { %p9132_p3 = pnand %p9131_p5, %p9125_p11 }
0x28a9   : > { %9135 = shalt.err (!%p9132_p3)
}
0x28aa   : > { %s10992_s11 = sld [smem:[#allocation66_spill]] }
0x28b0   : > { %s9136_s10 = scalar_lea.hbm %s10992_s11, 256 }
0x28b1   : > { %p9137_p10 = scmp.ne.s32.totalorder %s10992_s11, %s9136_s10  ;;  %p9142_p0 = scmp.lt.u32.totalorder %s9136_s10, %s10992_s11 }
0x28b3   : > { %p9138_p8 = pnand %p9137_p10, %p8024_p7 }
0x28b5   : > { %p9139_p4 = pneg %p9138_p8 }
0x28b7   : > { %p9144_p1 = pnand %p9142_p0, %p9139_p4 }
0x28b9   : > { %9147 = shalt.err (!%p9144_p1)
}
0x28ba   : > { %7941 = dma.vmem_to_hbm [thread:$0]  (%p8024_p7), %s6561_s5, 256, %s10992_s11, [#allocation30], %s9267_s3, %s9267_s3, %s9268_s4  }
0x28bb   : > { %9193 = dma.done.wait (%p8024_p7), [#allocation5], 256  }
0x28bc   : > { %9195 = vsyncadd (%p8024_p7), [#allocation5], 4294967040 }
0x28bd   : > { %9197 = dma.done.wait (%p8024_p7), [#allocation30], 512  }
0x28be   : > { %9199 = vsyncadd (%p8024_p7), [#allocation30], 4294966784 }
0x28bf PF: > { %s10993_s28 = sld [smem:[#allocation46_spill]]  ;;  %s10994_s5 = sld [smem:[#allocation41_spill]] }
0x28c0   : > { %s10995_s26 = sld [smem:[#allocation42_spill]]  ;;  %s10996_s27 = sld [smem:[#allocation47_spill]] }
0x28c5   : > { %p39_p6 = scmp.ge.s32.totalorder %s10993_s28, 8  }
0x28c7   :  { %41 = sbr.rel (!%p39_p6) target bundleno = 28 (0x1c), region = 313 }
0x28ce   :  { %6584 = vsyncpa [#allocation4], 1 }
0x28cf   :  { %6586 = vsyncpa [#allocation4 + $0x1], 1 }
0x28d0   :  { %6587 = vsyncpa [#allocation7], 1 }
0x28d1   :  { %6588 = vsyncpa [#allocation21], 1 }
0x28d2   :  { %6589 = vsyncpa [#allocation24], 1 }
0x28d3   :  { %6590 = vsyncpa [#allocation27], 1 }
0x28d4   :  { %6591 = vsyncpa [#allocation5], 1 }
0x28d5   :  { %6593 = vsyncpa [#allocation5 + $0x1], 1 }
0x28d6   :  { %6594 = vsyncpa [#allocation30], 1 }

</bundles_post_ra>
